<compile_context>
chip_gen: v7x
topology: tpu7x:2x2x1
jax: 0.10.0
libtpu: 0.0.40
codegen_flags: <defaults>
</compile_context>

<pallas_src>
import math
import functools

import jax
import jax.numpy as jnp
from jax.experimental import pallas as pl
from jax.experimental.pallas import tpu as pltpu  # noqa: F401  (TPU backend; no TPU-specific knobs needed at these sizes)


# ------------------------------------------------------------------ helpers

def fourier_pos_enc(max_len, embedding_dim):
    pos = jnp.arange(max_len, dtype=jnp.float32)[:, None]
    div = jnp.exp(jnp.arange(0, embedding_dim, 2, dtype=jnp.float32)
                  * (-math.log(10000.0) / embedding_dim))
    pe = jnp.zeros((max_len, embedding_dim), jnp.float32)
    pe = pe.at[:, 0::2].set(jnp.sin(pos * div))
    pe = pe.at[:, 1::2].set(jnp.cos(pos * div))
    return pe


def _layer_norm_ref(x, w, b, eps=1e-5):
    mu = jnp.mean(x, axis=-1, keepdims=True)
    var = jnp.mean((x - mu) ** 2, axis=-1, keepdims=True)
    return (x - mu) * jax.lax.rsqrt(var + eps) * w + b


def _layer_norm_fused(x, w, b, eps=1e-5):
    """Single-reduction LayerNorm: one cross-lane pass yields both E[x] and E[x^2]."""
    r = x.shape[0]
    stats = jnp.mean(jnp.concatenate([x, x * x], axis=0), axis=-1, keepdims=True)   # (2r, 1)
    mu, m2 = stats[:r], stats[r:]
    var = m2 - mu * mu
    return (x - mu) * jax.lax.rsqrt(var + eps) * w + b


# ------------------------------------------------------------------ fused Pallas kernel

def fused_forward_kernel(src_ref, emb_ref, pos_ref,
                         wqkv_ref, bqkv_ref, wo_ref, bo_ref,
                         ln1w_ref, ln1b_ref, w1_ref, b1_ref, w2_ref, b2_ref,
                         ln2w_ref, ln2b_ref, wout_ref, bout_ref, o_ref,
                         *, num_layers, num_heads, batch, seq):
    """Embedding gather -> pos-enc -> L encoder layers -> padded vocab projection (whole batch).

    src_ref : (B*S, 1) int32 token ids
    emb_ref : (V, E)  f32 embedding table (VMEM resident)
    pos_ref : (B*S, E) f32 Fourier positional encoding, pre-tiled over batch
    wqkv_ref: (L, E, 3E)   bqkv_ref: (L, 1, 3E)
    wo_ref  : (L, E, E)    bo_ref  : (L, 1, E)
    w1_ref  : (L, E, ff)   b1_ref  : (L, 1, ff)
    w2_ref  : (L, ff, E)   b2_ref  : (L, 1, E)
    ln*_ref : (L, 1, E)
    wout_ref: (E, Vpad)    bout_ref: (1, Vpad)   (vocab padded to a lane-dense 128)
    o_ref   : (B, S, Vpad)
    """
    B, S = batch, seq
    V, E = emb_ref.shape
    H = num_heads
    hd = E // H
    R = B * S
    scale = 1.0 / math.sqrt(hd)
    cd = wqkv_ref.dtype                              # matmul compute dtype (f32 or bf16)

    # ---- fused embedding gather (one-hot @ table on the MXU) + positional encoding ----
    ids = src_ref[...]                                                       # (R, 1) int32
    onehot = (jax.lax.broadcasted_iota(jnp.int32, (R, V), 1) == ids).astype(jnp.float32)
    x = jnp.dot(onehot, emb_ref[...], preferred_element_type=jnp.float32) + pos_ref[...]   # (R, E)

    # Static unroll over layers (L=2 here).
    # TODO(synk): for large L, move to lax.fori_loop with a dynamic layer index (or put the layer
    # on an "arbitrary" grid axis streaming bf16 weights) so code size / vreg pressure stay flat.
    for l in range(num_layers):
        # ---- fused Q/K/V projection: ONE (R,E)@(E,3E) MXU pass, 3E=96 dense lanes ----
        qkv = jnp.dot(x.astype(cd), wqkv_ref[l],
                      preferred_element_type=jnp.float32) + bqkv_ref[l]      # (R, 3E) f32
        q = qkv[:, :E].reshape(B, S, E)
        k = qkv[:, E:2 * E].reshape(B, S, E)
        v = qkv[:, 2 * E:].reshape(B, S, E)

        # ---- attention: transient (B,S,hd) head views, batched over B ----
        # NOTE: at production S (>=128) switch to a flash/online-softmax loop over 128x128 KV
        # tiles; at S=8 the (B,S,S) scores are a fraction of one vreg.
        # The static head loop issues the same number of MXU ops as a (B*H)-batched einsum
        # (the MXU does not batch) while avoiding any 4-D middle-axis transpose.
        ctx_heads = []
        for h in range(H):
            sl = slice(h * hd, (h + 1) * hd)
            qh = q[..., sl].astype(cd)
            kh = k[..., sl].astype(cd)
            vh = v[..., sl].astype(cd)
            s = jnp.einsum('bqd,bkd->bqk', qh, kh,
                           preferred_element_type=jnp.float32) * scale      # (B, S, S) f32
            s = s - jnp.max(s, axis=-1, keepdims=True)
            p = jnp.exp(s)                                                   # f32 softmax
            p = p * pl.reciprocal(jnp.sum(p, axis=-1, keepdims=True), approx=True)
            ctx_heads.append(jnp.einsum('bqk,bkd->bqd', p.astype(cd), vh,
                                        preferred_element_type=jnp.float32))  # (B, S, hd)
        ctx = jnp.concatenate(ctx_heads, axis=-1).reshape(R, E)             # (R, E), E dense lanes

        # ---- attention output projection: ONE (R,E)@(E,E) contraction ----
        attn = jnp.dot(ctx.astype(cd), wo_ref[l],
                       preferred_element_type=jnp.float32) + bo_ref[l]

        # ---- residual + LayerNorm1 (post-norm) ----
        y = _layer_norm_fused(x + attn, ln1w_ref[l], ln1b_ref[l])

        # ---- feed-forward: linear2(relu(linear1(y))) ----
        h1 = jnp.maximum(
            jnp.dot(y.astype(cd), w1_ref[l],
                    preferred_element_type=jnp.float32) + b1_ref[l], 0.0)
        h2 = jnp.dot(h1.astype(cd), w2_ref[l],
                     preferred_element_type=jnp.float32) + b2_ref[l]

        # ---- residual + LayerNorm2 ----
        x = _layer_norm_fused(y + h2, ln2w_ref[l], ln2b_ref[l])

    # ---- final vocab projection, lane-dense padded output (unmasked vst) ----
    logits = jnp.dot(x.astype(cd), wout_ref[...],
                     preferred_element_type=jnp.float32) + bout_ref[...]     # (R, Vpad)
    o_ref[...] = logits.reshape(B, S, -1).astype(o_ref.dtype)


# ------------------------------------------------------------------ wrappers

def prepare_params(layers, w_out, b_out, param_dtype=jnp.float32):
    """One-time host-side re-layout: matmul weights stored (in, out); vocab padded to 128 lanes.

    param_dtype=jnp.bfloat16 enables the bf16 MXU path (v6e/v7x) with f32 accumulation in-kernel;
    biases and LayerNorm params stay f32, softmax/LN math stays f32.
    """
    wqkv_s, bqkv_s, wo_s, bo_s = [], [], [], []
    ln1w_s, ln1b_s, w1_s, b1_s, w2_s, b2_s, ln2w_s, ln2b_s = ([] for _ in range(8))
    for (wqkv, bqkv, wo, bo, ln1w, ln1b, w1, b1, w2, b2, ln2w, ln2b) in layers:
        wqkv_s.append(wqkv.T.astype(param_dtype))            # (E, 3E): qkv = x @ W, 96 dense lanes
        bqkv_s.append(bqkv.reshape(1, -1))                    # (1, 3E) f32
        wo_s.append(wo.T.astype(param_dtype))                 # (E, E)
        bo_s.append(bo.reshape(1, -1))
        ln1w_s.append(ln1w.reshape(1, -1)); ln1b_s.append(ln1b.reshape(1, -1))
        w1_s.append(w1.T.astype(param_dtype)); b1_s.append(b1.reshape(1, -1))
        w2_s.append(w2.T.astype(param_dtype)); b2_s.append(b2.reshape(1, -1))
        ln2w_s.append(ln2w.reshape(1, -1)); ln2b_s.append(ln2b.reshape(1, -1))

    E = layers[0][0].shape[1]
    V = w_out.shape[0]
    Vpad = max(128, ((V + 127) // 128) * 128)                 # lane-dense output store
    wout_p = jnp.zeros((E, Vpad), jnp.float32).at[:, :V].set(w_out.T).astype(param_dtype)
    bout_p = jnp.zeros((1, Vpad), jnp.float32).at[0, :V].set(b_out)

    stacked = tuple(jnp.stack(s) for s in
                    (wqkv_s, bqkv_s, wo_s, bo_s, ln1w_s, ln1b_s,
                     w1_s, b1_s, w2_s, b2_s, ln2w_s, ln2b_s))
    return stacked + (wout_p, bout_p), V


def transformer_forward(src, emb_table, pos_enc, prepared, num_heads, num_layers):
    """Returns LANE-DENSE PADDED logits (B, S, Vpad); slice [..., :vocab] only at the consumer."""
    B, S = src.shape
    Vpad = prepared[-2].shape[1]

    src_col = src.reshape(B * S, 1).astype(jnp.int32)
    pos_tiled = jnp.tile(pos_enc[:S, :], (B, 1))              # (B*S, E)

    kernel = functools.partial(fused_forward_kernel, num_layers=num_layers,
                               num_heads=num_heads, batch=B, seq=S)

    # Single grid point, no BlockSpecs: every operand (weights ~1 MB f32 here + 8 KB emb table)
    # is placed whole in VMEM; no per-batch grid-step overhead on 1-TC chips (v5e/v6e).
    # NOTE(v7x): at production B/S/L, re-introduce a blocked batch axis ("parallel", >=128 rows
    # per TC) and stream per-layer bf16 weights over an "arbitrary" layer axis (or
    # pltpu.emit_pipeline over ff tiles) to respect the 64 MiB VMEM budget.
    out = pl.pallas_call(
        kernel,
        out_shape=jax.ShapeDtypeStruct((B, S, Vpad), jnp.float32),
    )(src_col, emb_table, pos_tiled, *prepared)
    return out


# ------------------------------------------------------------------ deterministic params (PyTorch layout)

def init_params(key, vocab, E, num_layers, ff=2048):
    ks = jax.random.split(key, 3 + num_layers)
    emb = jax.random.normal(ks[0], (vocab, E), jnp.float32) * 0.02
    layers = []
    for i in range(num_layers):
        lk = jax.random.split(ks[3 + i], 8)
        wqkv = jax.random.normal(lk[0], (3 * E, E), jnp.float32) * 0.05
        bqkv = jax.random.normal(lk[1], (3 * E,), jnp.float32) * 0.01
        wo   = jax.random.normal(lk[2], (E, E), jnp.float32) * 0.05
        bo   = jax.random.normal(lk[3], (E,), jnp.float32) * 0.01
        ln1w = jnp.ones((E,), jnp.float32)
        ln1b = jnp.zeros((E,), jnp.float32)
        w1   = jax.random.normal(lk[4], (ff, E), jnp.float32) * 0.05
        b1   = jax.random.normal(lk[5], (ff,), jnp.float32) * 0.01
        w2   = jax.random.normal(lk[6], (E, ff), jnp.float32) * 0.05
        b2   = jax.random.normal(lk[7], (E,), jnp.float32) * 0.01
        ln2w = jnp.ones((E,), jnp.float32)
        ln2b = jnp.zeros((E,), jnp.float32)
        layers.append((wqkv, bqkv, wo, bo, ln1w, ln1b, w1, b1, w2, b2, ln2w, ln2b))
    w_out = jax.random.normal(ks[1], (vocab, E), jnp.float32) * 0.05
    b_out = jax.random.normal(ks[2], (vocab,), jnp.float32) * 0.01
    return emb, layers, w_out, b_out


# ------------------------------------------------------------------ pure-JAX reference

def ref_forward(src, emb_table, pos_enc, layers, w_out, b_out, num_heads):
    x = jnp.take(emb_table, src, axis=0) + pos_enc[:src.shape[1], :][None]
    B, S, E = x.shape
    H = num_heads
    hd = E // H
    for (wqkv, bqkv, wo, bo, ln1w, ln1b, w1, b1, w2, b2, ln2w, ln2b) in layers:
        qkv = x @ wqkv.T + bqkv
        q, k, v = jnp.split(qkv, 3, axis=-1)
        qh = q.reshape(B, S, H, hd).transpose(0, 2, 1, 3)
        kh = k.reshape(B, S, H, hd).transpose(0, 2, 1, 3)
        vh = v.reshape(B, S, H, hd).transpose(0, 2, 1, 3)
        s = jnp.einsum('bhqd,bhkd->bhqk', qh, kh) / math.sqrt(hd)
        p = jax.nn.softmax(s, axis=-1)
        ctx = jnp.einsum('bhqk,bhkd->bhqd', p, vh).transpose(0, 2, 1, 3).reshape(B, S, E)
        attn = ctx @ wo.T + bo
        x = _layer_norm_ref(x + attn, ln1w, ln1b)
        h1 = jax.nn.relu(x @ w1.T + b1)
        x = _layer_norm_ref(x + (h1 @ w2.T + b2), ln2w, ln2b)
    return x @ w_out.T + b_out


# ------------------------------------------------------------------ main

if __name__ == "__main__":
    vocab_size, embedding_dim, num_layers, num_heads, seq_length = 64, 32, 2, 4, 8
    B, S = 2, 8

    key = jax.random.PRNGKey(0)
    kp, kd = jax.random.split(key)
    emb, layers, w_out, b_out = init_params(kp, vocab_size, embedding_dim, num_layers)
    pos = fourier_pos_enc(seq_length, embedding_dim)
    src = jax.random.randint(kd, (B, S), 0, vocab_size, dtype=jnp.int32)

    ref = ref_forward(src, emb, pos, layers, w_out, b_out, num_heads)

    # ---- f32 path (exact weights; approx softmax reciprocal covered by loosened tolerance) ----
    prepared_f32, _V = prepare_params(layers, w_out, b_out, param_dtype=jnp.float32)
    fwd_f32 = jax.jit(lambda s: transformer_forward(s, emb, pos, prepared_f32,
                                                    num_heads, num_layers))
    out_pad = jax.block_until_ready(fwd_f32(src))             # (B, S, 128) padded, lane-dense
    assert out_pad.shape == (B, S, 128), out_pad.shape
    out = out_pad[..., :vocab_size]                           # slice only at the consumer
    err = float(jnp.max(jnp.abs(out - ref)))
    assert jnp.allclose(out, ref, atol=2e-3, rtol=2e-3), f"f32 max abs err {err}"

    # ---- bf16-weight path (v6e/v7x MXU; f32 accumulation, f32 softmax/LayerNorm) ----
    prepared_bf16, _ = prepare_params(layers, w_out, b_out, param_dtype=jnp.bfloat16)
    fwd_bf16 = jax.jit(lambda s: transformer_forward(s, emb, pos, prepared_bf16,
                                                     num_heads, num_layers))
    out_bf16 = jax.block_until_ready(fwd_bf16(src))[..., :vocab_size]
    err_bf16 = float(jnp.max(jnp.abs(out_bf16 - ref)))
    assert jnp.allclose(out_bf16, ref, atol=5e-2, rtol=5e-2), f"bf16 max abs err {err_bf16}"

    print("KERNEL_OK")
</pallas_src>

<mosaic_0001>
module attributes {stable_mosaic.version = 11 : i64} {
  func.func @fused_forward_kernel(%arg0: memref<16x1xi32, #tpu.memory_space<vmem>>, %arg1: memref<64x32xf32, #tpu.memory_space<vmem>>, %arg2: memref<16x32xf32, #tpu.memory_space<vmem>>, %arg3: memref<2x32x96xf32, #tpu.memory_space<vmem>>, %arg4: memref<2x1x96xf32, #tpu.memory_space<vmem>>, %arg5: memref<2x32x32xf32, #tpu.memory_space<vmem>>, %arg6: memref<2x1x32xf32, #tpu.memory_space<vmem>>, %arg7: memref<2x1x32xf32, #tpu.memory_space<vmem>>, %arg8: memref<2x1x32xf32, #tpu.memory_space<vmem>>, %arg9: memref<2x32x2048xf32, #tpu.memory_space<vmem>>, %arg10: memref<2x1x2048xf32, #tpu.memory_space<vmem>>, %arg11: memref<2x2048x32xf32, #tpu.memory_space<vmem>>, %arg12: memref<2x1x32xf32, #tpu.memory_space<vmem>>, %arg13: memref<2x1x32xf32, #tpu.memory_space<vmem>>, %arg14: memref<2x1x32xf32, #tpu.memory_space<vmem>>, %arg15: memref<32x128xf32, #tpu.memory_space<vmem>>, %arg16: memref<1x128xf32, #tpu.memory_space<vmem>>, %arg17: memref<2x8x128xf32, #tpu.memory_space<vmem>>) attributes {dimension_semantics = [], scalar_prefetch = 0 : i64, scratch_operands = 0 : i64, tpu.core_type = #tpu.core_type<tc>} {
    %c0 = arith.constant 0 : index
    %c0_0 = arith.constant 0 : index
    %0 = vector.load %arg0[%c0, %c0_0] : memref<16x1xi32, #tpu.memory_space<vmem>>, vector<16x1xi32>
    %1 = tpu.iota {dimensions = array<i32: 1>} : vector<16x64xi32>
    %2 = vector.broadcast %0 : vector<16x1xi32> to vector<16x64xi32>
    %3 = arith.cmpi eq, %1, %2 : vector<16x64xi32>
    %4 = arith.extui %3 : vector<16x64xi1> to vector<16x64xi32>
    %5 = arith.sitofp %4 : vector<16x64xi32> to vector<16x64xf32>
    %c0_1 = arith.constant 0 : index
    %c0_2 = arith.constant 0 : index
    %6 = vector.load %arg1[%c0_1, %c0_2] : memref<64x32xf32, #tpu.memory_space<vmem>>, vector<64x32xf32>
    %cst = arith.constant dense<0.000000e+00> : vector<16x32xf32>
    %7 = tpu.matmul %5, %6, %cst {dimension_numbers = #tpu.dot_dimension_numbers<[1], [0], [0], [1], [0, 0, 1, 1], [], []>} : vector<16x64xf32>, vector<64x32xf32>, vector<16x32xf32> -> vector<16x32xf32>
    %c0_3 = arith.constant 0 : index
    %c0_4 = arith.constant 0 : index
    %8 = vector.load %arg2[%c0_3, %c0_4] : memref<16x32xf32, #tpu.memory_space<vmem>>, vector<16x32xf32>
    %9 = arith.addf %7, %8 : vector<16x32xf32>
    %c0_5 = arith.constant 0 : index
    %c0_6 = arith.constant 0 : index
    %c0_7 = arith.constant 0 : index
    %10 = vector.load %arg3[%c0_5, %c0_6, %c0_7] : memref<2x32x96xf32, #tpu.memory_space<vmem>>, vector<1x32x96xf32>
    %11 = vector.shape_cast %10 : vector<1x32x96xf32> to vector<32x96xf32>
    %cst_8 = arith.constant dense<0.000000e+00> : vector<16x96xf32>
    %12 = tpu.matmul %9, %11, %cst_8 {dimension_numbers = #tpu.dot_dimension_numbers<[1], [0], [0], [1], [0, 0, 1, 1], [], []>} : vector<16x32xf32>, vector<32x96xf32>, vector<16x96xf32> -> vector<16x96xf32>
    %c0_9 = arith.constant 0 : index
    %c0_10 = arith.constant 0 : index
    %c0_11 = arith.constant 0 : index
    %13 = vector.load %arg4[%c0_9, %c0_10, %c0_11] : memref<2x1x96xf32, #tpu.memory_space<vmem>>, vector<1x1x96xf32>
    %14 = vector.shape_cast %13 : vector<1x1x96xf32> to vector<1x96xf32>
    %15 = vector.broadcast %14 : vector<1x96xf32> to vector<16x96xf32>
    %16 = arith.addf %12, %15 : vector<16x96xf32>
    %17 = vector.extract_strided_slice %16 {offsets = [0, 0], sizes = [16, 32], strides = [1, 1]} : vector<16x96xf32> to vector<16x32xf32>
    %18 = vector.shape_cast %17 : vector<16x32xf32> to vector<2x8x32xf32>
    %19 = vector.extract_strided_slice %16 {offsets = [0, 32], sizes = [16, 32], strides = [1, 1]} : vector<16x96xf32> to vector<16x32xf32>
    %20 = vector.shape_cast %19 : vector<16x32xf32> to vector<2x8x32xf32>
    %21 = vector.extract_strided_slice %16 {offsets = [0, 64], sizes = [16, 32], strides = [1, 1]} : vector<16x96xf32> to vector<16x32xf32>
    %22 = vector.shape_cast %21 : vector<16x32xf32> to vector<2x8x32xf32>
    %23 = vector.extract_strided_slice %18 {offsets = [0, 0, 0], sizes = [2, 8, 8], strides = [1, 1, 1]} : vector<2x8x32xf32> to vector<2x8x8xf32>
    %24 = vector.extract_strided_slice %20 {offsets = [0, 0, 0], sizes = [2, 8, 8], strides = [1, 1, 1]} : vector<2x8x32xf32> to vector<2x8x8xf32>
    %25 = vector.extract_strided_slice %22 {offsets = [0, 0, 0], sizes = [2, 8, 8], strides = [1, 1, 1]} : vector<2x8x32xf32> to vector<2x8x8xf32>
    "tpu.trace_start"() <{level = 10 : i32, message = "bqd,bkd->bqk"}> : () -> ()
    %cst_12 = arith.constant dense<0.000000e+00> : vector<2x8x8xf32>
    %26 = tpu.matmul %23, %24, %cst_12 {dimension_numbers = #tpu.dot_dimension_numbers<[2], [2], [1], [1], [0, 0, 0, 1, 1, 1], [0], [0]>} : vector<2x8x8xf32>, vector<2x8x8xf32>, vector<2x8x8xf32> -> vector<2x8x8xf32>
    "tpu.trace_stop"() : () -> ()
    %cst_13 = arith.constant 0.353553385 : f32
    %27 = vector.broadcast %cst_13 : f32 to vector<2x8x8xf32>
    %28 = arith.mulf %26, %27 : vector<2x8x8xf32>
    %cst_14 = arith.constant dense<0xFF800000> : vector<2x8xf32>
    %29 = vector.multi_reduction <maximumf>, %28, %cst_14 [2] : vector<2x8x8xf32> to vector<2x8xf32>
    %30 = vector.shape_cast %29 : vector<2x8xf32> to vector<2x8x1xf32>
    %31 = vector.broadcast %30 : vector<2x8x1xf32> to vector<2x8x8xf32>
    %32 = arith.subf %28, %31 : vector<2x8x8xf32>
    %33 = math.exp %32 : vector<2x8x8xf32>
    %cst_15 = arith.constant dense<0.000000e+00> : vector<2x8xf32>
    %34 = vector.multi_reduction <add>, %33, %cst_15 [2] : vector<2x8x8xf32> to vector<2x8xf32>
    %35 = vector.shape_cast %34 : vector<2x8xf32> to vector<2x8x1xf32>
    %36 = tpu.reciprocal %35 {approx = true} : vector<2x8x1xf32> -> vector<2x8x1xf32>
    %37 = vector.broadcast %36 : vector<2x8x1xf32> to vector<2x8x8xf32>
    %38 = arith.mulf %33, %37 : vector<2x8x8xf32>
    "tpu.trace_start"() <{level = 10 : i32, message = "bqk,bkd->bqd"}> : () -> ()
    %cst_16 = arith.constant dense<0.000000e+00> : vector<2x8x8xf32>
    %39 = tpu.matmul %38, %25, %cst_16 {dimension_numbers = #tpu.dot_dimension_numbers<[2], [1], [1], [2], [0, 0, 0, 1, 1, 2], [0], [0]>} : vector<2x8x8xf32>, vector<2x8x8xf32>, vector<2x8x8xf32> -> vector<2x8x8xf32>
    "tpu.trace_stop"() : () -> ()
    %40 = vector.extract_strided_slice %18 {offsets = [0, 0, 8], sizes = [2, 8, 8], strides = [1, 1, 1]} : vector<2x8x32xf32> to vector<2x8x8xf32>
    %41 = vector.extract_strided_slice %20 {offsets = [0, 0, 8], sizes = [2, 8, 8], strides = [1, 1, 1]} : vector<2x8x32xf32> to vector<2x8x8xf32>
    %42 = vector.extract_strided_slice %22 {offsets = [0, 0, 8], sizes = [2, 8, 8], strides = [1, 1, 1]} : vector<2x8x32xf32> to vector<2x8x8xf32>
    "tpu.trace_start"() <{level = 10 : i32, message = "bqd,bkd->bqk"}> : () -> ()
    %cst_17 = arith.constant dense<0.000000e+00> : vector<2x8x8xf32>
    %43 = tpu.matmul %40, %41, %cst_17 {dimension_numbers = #tpu.dot_dimension_numbers<[2], [2], [1], [1], [0, 0, 0, 1, 1, 1], [0], [0]>} : vector<2x8x8xf32>, vector<2x8x8xf32>, vector<2x8x8xf32> -> vector<2x8x8xf32>
    "tpu.trace_stop"() : () -> ()
    %cst_18 = arith.constant 0.353553385 : f32
    %44 = vector.broadcast %cst_18 : f32 to vector<2x8x8xf32>
    %45 = arith.mulf %43, %44 : vector<2x8x8xf32>
    %cst_19 = arith.constant dense<0xFF800000> : vector<2x8xf32>
    %46 = vector.multi_reduction <maximumf>, %45, %cst_19 [2] : vector<2x8x8xf32> to vector<2x8xf32>
    %47 = vector.shape_cast %46 : vector<2x8xf32> to vector<2x8x1xf32>
    %48 = vector.broadcast %47 : vector<2x8x1xf32> to vector<2x8x8xf32>
    %49 = arith.subf %45, %48 : vector<2x8x8xf32>
    %50 = math.exp %49 : vector<2x8x8xf32>
    %cst_20 = arith.constant dense<0.000000e+00> : vector<2x8xf32>
    %51 = vector.multi_reduction <add>, %50, %cst_20 [2] : vector<2x8x8xf32> to vector<2x8xf32>
    %52 = vector.shape_cast %51 : vector<2x8xf32> to vector<2x8x1xf32>
    %53 = tpu.reciprocal %52 {approx = true} : vector<2x8x1xf32> -> vector<2x8x1xf32>
    %54 = vector.broadcast %53 : vector<2x8x1xf32> to vector<2x8x8xf32>
    %55 = arith.mulf %50, %54 : vector<2x8x8xf32>
    "tpu.trace_start"() <{level = 10 : i32, message = "bqk,bkd->bqd"}> : () -> ()
    %cst_21 = arith.constant dense<0.000000e+00> : vector<2x8x8xf32>
    %56 = tpu.matmul %55, %42, %cst_21 {dimension_numbers = #tpu.dot_dimension_numbers<[2], [1], [1], [2], [0, 0, 0, 1, 1, 2], [0], [0]>} : vector<2x8x8xf32>, vector<2x8x8xf32>, vector<2x8x8xf32> -> vector<2x8x8xf32>
    "tpu.trace_stop"() : () -> ()
    %57 = vector.extract_strided_slice %18 {offsets = [0, 0, 16], sizes = [2, 8, 8], strides = [1, 1, 1]} : vector<2x8x32xf32> to vector<2x8x8xf32>
    %58 = vector.extract_strided_slice %20 {offsets = [0, 0, 16], sizes = [2, 8, 8], strides = [1, 1, 1]} : vector<2x8x32xf32> to vector<2x8x8xf32>
    %59 = vector.extract_strided_slice %22 {offsets = [0, 0, 16], sizes = [2, 8, 8], strides = [1, 1, 1]} : vector<2x8x32xf32> to vector<2x8x8xf32>
    "tpu.trace_start"() <{level = 10 : i32, message = "bqd,bkd->bqk"}> : () -> ()
    %cst_22 = arith.constant dense<0.000000e+00> : vector<2x8x8xf32>
    %60 = tpu.matmul %57, %58, %cst_22 {dimension_numbers = #tpu.dot_dimension_numbers<[2], [2], [1], [1], [0, 0, 0, 1, 1, 1], [0], [0]>} : vector<2x8x8xf32>, vector<2x8x8xf32>, vector<2x8x8xf32> -> vector<2x8x8xf32>
    "tpu.trace_stop"() : () -> ()
    %cst_23 = arith.constant 0.353553385 : f32
    %61 = vector.broadcast %cst_23 : f32 to vector<2x8x8xf32>
    %62 = arith.mulf %60, %61 : vector<2x8x8xf32>
    %cst_24 = arith.constant dense<0xFF800000> : vector<2x8xf32>
    %63 = vector.multi_reduction <maximumf>, %62, %cst_24 [2] : vector<2x8x8xf32> to vector<2x8xf32>
    %64 = vector.shape_cast %63 : vector<2x8xf32> to vector<2x8x1xf32>
    %65 = vector.broadcast %64 : vector<2x8x1xf32> to vector<2x8x8xf32>
    %66 = arith.subf %62, %65 : vector<2x8x8xf32>
    %67 = math.exp %66 : vector<2x8x8xf32>
    %cst_25 = arith.constant dense<0.000000e+00> : vector<2x8xf32>
    %68 = vector.multi_reduction <add>, %67, %cst_25 [2] : vector<2x8x8xf32> to vector<2x8xf32>
    %69 = vector.shape_cast %68 : vector<2x8xf32> to vector<2x8x1xf32>
    %70 = tpu.reciprocal %69 {approx = true} : vector<2x8x1xf32> -> vector<2x8x1xf32>
    %71 = vector.broadcast %70 : vector<2x8x1xf32> to vector<2x8x8xf32>
    %72 = arith.mulf %67, %71 : vector<2x8x8xf32>
    "tpu.trace_start"() <{level = 10 : i32, message = "bqk,bkd->bqd"}> : () -> ()
    %cst_26 = arith.constant dense<0.000000e+00> : vector<2x8x8xf32>
    %73 = tpu.matmul %72, %59, %cst_26 {dimension_numbers = #tpu.dot_dimension_numbers<[2], [1], [1], [2], [0, 0, 0, 1, 1, 2], [0], [0]>} : vector<2x8x8xf32>, vector<2x8x8xf32>, vector<2x8x8xf32> -> vector<2x8x8xf32>
    "tpu.trace_stop"() : () -> ()
    %74 = vector.extract_strided_slice %18 {offsets = [0, 0, 24], sizes = [2, 8, 8], strides = [1, 1, 1]} : vector<2x8x32xf32> to vector<2x8x8xf32>
    %75 = vector.extract_strided_slice %20 {offsets = [0, 0, 24], sizes = [2, 8, 8], strides = [1, 1, 1]} : vector<2x8x32xf32> to vector<2x8x8xf32>
    %76 = vector.extract_strided_slice %22 {offsets = [0, 0, 24], sizes = [2, 8, 8], strides = [1, 1, 1]} : vector<2x8x32xf32> to vector<2x8x8xf32>
    "tpu.trace_start"() <{level = 10 : i32, message = "bqd,bkd->bqk"}> : () -> ()
    %cst_27 = arith.constant dense<0.000000e+00> : vector<2x8x8xf32>
    %77 = tpu.matmul %74, %75, %cst_27 {dimension_numbers = #tpu.dot_dimension_numbers<[2], [2], [1], [1], [0, 0, 0, 1, 1, 1], [0], [0]>} : vector<2x8x8xf32>, vector<2x8x8xf32>, vector<2x8x8xf32> -> vector<2x8x8xf32>
    "tpu.trace_stop"() : () -> ()
    %cst_28 = arith.constant 0.353553385 : f32
    %78 = vector.broadcast %cst_28 : f32 to vector<2x8x8xf32>
    %79 = arith.mulf %77, %78 : vector<2x8x8xf32>
    %cst_29 = arith.constant dense<0xFF800000> : vector<2x8xf32>
    %80 = vector.multi_reduction <maximumf>, %79, %cst_29 [2] : vector<2x8x8xf32> to vector<2x8xf32>
    %81 = vector.shape_cast %80 : vector<2x8xf32> to vector<2x8x1xf32>
    %82 = vector.broadcast %81 : vector<2x8x1xf32> to vector<2x8x8xf32>
    %83 = arith.subf %79, %82 : vector<2x8x8xf32>
    %84 = math.exp %83 : vector<2x8x8xf32>
    %cst_30 = arith.constant dense<0.000000e+00> : vector<2x8xf32>
    %85 = vector.multi_reduction <add>, %84, %cst_30 [2] : vector<2x8x8xf32> to vector<2x8xf32>
    %86 = vector.shape_cast %85 : vector<2x8xf32> to vector<2x8x1xf32>
    %87 = tpu.reciprocal %86 {approx = true} : vector<2x8x1xf32> -> vector<2x8x1xf32>
    %88 = vector.broadcast %87 : vector<2x8x1xf32> to vector<2x8x8xf32>
    %89 = arith.mulf %84, %88 : vector<2x8x8xf32>
    "tpu.trace_start"() <{level = 10 : i32, message = "bqk,bkd->bqd"}> : () -> ()
    %cst_31 = arith.constant dense<0.000000e+00> : vector<2x8x8xf32>
    %90 = tpu.matmul %89, %76, %cst_31 {dimension_numbers = #tpu.dot_dimension_numbers<[2], [1], [1], [2], [0, 0, 0, 1, 1, 2], [0], [0]>} : vector<2x8x8xf32>, vector<2x8x8xf32>, vector<2x8x8xf32> -> vector<2x8x8xf32>
    "tpu.trace_stop"() : () -> ()
    %91 = tpu.concatenate %39, %56, %73, %90 in 2 : vector<2x8x8xf32>, vector<2x8x8xf32>, vector<2x8x8xf32>, vector<2x8x8xf32> -> vector<2x8x32xf32>
    %92 = vector.shape_cast %91 : vector<2x8x32xf32> to vector<16x32xf32>
    %c0_32 = arith.constant 0 : index
    %c0_33 = arith.constant 0 : index
    %c0_34 = arith.constant 0 : index
    %93 = vector.load %arg5[%c0_32, %c0_33, %c0_34] : memref<2x32x32xf32, #tpu.memory_space<vmem>>, vector<1x32x32xf32>
    %94 = vector.shape_cast %93 : vector<1x32x32xf32> to vector<32x32xf32>
    %cst_35 = arith.constant dense<0.000000e+00> : vector<16x32xf32>
    %95 = tpu.matmul %92, %94, %cst_35 {dimension_numbers = #tpu.dot_dimension_numbers<[1], [0], [0], [1], [0, 0, 1, 1], [], []>} : vector<16x32xf32>, vector<32x32xf32>, vector<16x32xf32> -> vector<16x32xf32>
    %c0_36 = arith.constant 0 : index
    %c0_37 = arith.constant 0 : index
    %c0_38 = arith.constant 0 : index
    %96 = vector.load %arg6[%c0_36, %c0_37, %c0_38] : memref<2x1x32xf32, #tpu.memory_space<vmem>>, vector<1x1x32xf32>
    %97 = vector.shape_cast %96 : vector<1x1x32xf32> to vector<1x32xf32>
    %98 = vector.broadcast %97 : vector<1x32xf32> to vector<16x32xf32>
    %99 = arith.addf %95, %98 : vector<16x32xf32>
    %100 = arith.addf %9, %99 : vector<16x32xf32>
    %c0_39 = arith.constant 0 : index
    %c0_40 = arith.constant 0 : index
    %c0_41 = arith.constant 0 : index
    %101 = vector.load %arg7[%c0_39, %c0_40, %c0_41] : memref<2x1x32xf32, #tpu.memory_space<vmem>>, vector<1x1x32xf32>
    %102 = vector.shape_cast %101 : vector<1x1x32xf32> to vector<1x32xf32>
    %c0_42 = arith.constant 0 : index
    %c0_43 = arith.constant 0 : index
    %c0_44 = arith.constant 0 : index
    %103 = vector.load %arg8[%c0_42, %c0_43, %c0_44] : memref<2x1x32xf32, #tpu.memory_space<vmem>>, vector<1x1x32xf32>
    %104 = vector.shape_cast %103 : vector<1x1x32xf32> to vector<1x32xf32>
    %105 = arith.mulf %100, %100 : vector<16x32xf32>
    %106 = tpu.concatenate %100, %105 in 0 : vector<16x32xf32>, vector<16x32xf32> -> vector<32x32xf32>
    %cst_45 = arith.constant dense<0.000000e+00> : vector<32xf32>
    %107 = vector.multi_reduction <add>, %106, %cst_45 [1] : vector<32x32xf32> to vector<32xf32>
    %108 = vector.shape_cast %107 : vector<32xf32> to vector<32x1xf32>
    %cst_46 = arith.constant 3.200000e+01 : f32
    %109 = vector.broadcast %cst_46 : f32 to vector<32x1xf32>
    %110 = arith.divf %108, %109 : vector<32x1xf32>
    %111 = vector.extract_strided_slice %110 {offsets = [0, 0], sizes = [16, 1], strides = [1, 1]} : vector<32x1xf32> to vector<16x1xf32>
    %112 = vector.extract_strided_slice %110 {offsets = [16, 0], sizes = [16, 1], strides = [1, 1]} : vector<32x1xf32> to vector<16x1xf32>
    %113 = arith.mulf %111, %111 : vector<16x1xf32>
    %114 = arith.subf %112, %113 : vector<16x1xf32>
    %115 = vector.broadcast %111 : vector<16x1xf32> to vector<16x32xf32>
    %116 = arith.subf %100, %115 : vector<16x32xf32>
    %cst_47 = arith.constant 9.99999974E-6 : f32
    %117 = vector.broadcast %cst_47 : f32 to vector<16x1xf32>
    %118 = arith.addf %114, %117 : vector<16x1xf32>
    %119 = math.rsqrt %118 : vector<16x1xf32>
    %120 = vector.broadcast %119 : vector<16x1xf32> to vector<16x32xf32>
    %121 = arith.mulf %116, %120 : vector<16x32xf32>
    %122 = vector.broadcast %102 : vector<1x32xf32> to vector<16x32xf32>
    %123 = arith.mulf %121, %122 : vector<16x32xf32>
    %124 = vector.broadcast %104 : vector<1x32xf32> to vector<16x32xf32>
    %125 = arith.addf %123, %124 : vector<16x32xf32>
    %c0_48 = arith.constant 0 : index
    %c0_49 = arith.constant 0 : index
    %c0_50 = arith.constant 0 : index
    %126 = vector.load %arg9[%c0_48, %c0_49, %c0_50] : memref<2x32x2048xf32, #tpu.memory_space<vmem>>, vector<1x32x2048xf32>
    %127 = vector.shape_cast %126 : vector<1x32x2048xf32> to vector<32x2048xf32>
    %cst_51 = arith.constant dense<0.000000e+00> : vector<16x2048xf32>
    %128 = tpu.matmul %125, %127, %cst_51 {dimension_numbers = #tpu.dot_dimension_numbers<[1], [0], [0], [1], [0, 0, 1, 1], [], []>} : vector<16x32xf32>, vector<32x2048xf32>, vector<16x2048xf32> -> vector<16x2048xf32>
    %c0_52 = arith.constant 0 : index
    %c0_53 = arith.constant 0 : index
    %c0_54 = arith.constant 0 : index
    %129 = vector.load %arg10[%c0_52, %c0_53, %c0_54] : memref<2x1x2048xf32, #tpu.memory_space<vmem>>, vector<1x1x2048xf32>
    %130 = vector.shape_cast %129 : vector<1x1x2048xf32> to vector<1x2048xf32>
    %131 = vector.broadcast %130 : vector<1x2048xf32> to vector<16x2048xf32>
    %132 = arith.addf %128, %131 : vector<16x2048xf32>
    %cst_55 = arith.constant 0.000000e+00 : f32
    %133 = vector.broadcast %cst_55 : f32 to vector<16x2048xf32>
    %134 = arith.maximumf %132, %133 : vector<16x2048xf32>
    %c0_56 = arith.constant 0 : index
    %c0_57 = arith.constant 0 : index
    %c0_58 = arith.constant 0 : index
    %135 = vector.load %arg11[%c0_56, %c0_57, %c0_58] : memref<2x2048x32xf32, #tpu.memory_space<vmem>>, vector<1x2048x32xf32>
    %136 = vector.shape_cast %135 : vector<1x2048x32xf32> to vector<2048x32xf32>
    %cst_59 = arith.constant dense<0.000000e+00> : vector<16x32xf32>
    %137 = tpu.matmul %134, %136, %cst_59 {dimension_numbers = #tpu.dot_dimension_numbers<[1], [0], [0], [1], [0, 0, 1, 1], [], []>} : vector<16x2048xf32>, vector<2048x32xf32>, vector<16x32xf32> -> vector<16x32xf32>
    %c0_60 = arith.constant 0 : index
    %c0_61 = arith.constant 0 : index
    %c0_62 = arith.constant 0 : index
    %138 = vector.load %arg12[%c0_60, %c0_61, %c0_62] : memref<2x1x32xf32, #tpu.memory_space<vmem>>, vector<1x1x32xf32>
    %139 = vector.shape_cast %138 : vector<1x1x32xf32> to vector<1x32xf32>
    %140 = vector.broadcast %139 : vector<1x32xf32> to vector<16x32xf32>
    %141 = arith.addf %137, %140 : vector<16x32xf32>
    %142 = arith.addf %125, %141 : vector<16x32xf32>
    %c0_63 = arith.constant 0 : index
    %c0_64 = arith.constant 0 : index
    %c0_65 = arith.constant 0 : index
    %143 = vector.load %arg13[%c0_63, %c0_64, %c0_65] : memref<2x1x32xf32, #tpu.memory_space<vmem>>, vector<1x1x32xf32>
    %144 = vector.shape_cast %143 : vector<1x1x32xf32> to vector<1x32xf32>
    %c0_66 = arith.constant 0 : index
    %c0_67 = arith.constant 0 : index
    %c0_68 = arith.constant 0 : index
    %145 = vector.load %arg14[%c0_66, %c0_67, %c0_68] : memref<2x1x32xf32, #tpu.memory_space<vmem>>, vector<1x1x32xf32>
    %146 = vector.shape_cast %145 : vector<1x1x32xf32> to vector<1x32xf32>
    %147 = arith.mulf %142, %142 : vector<16x32xf32>
    %148 = tpu.concatenate %142, %147 in 0 : vector<16x32xf32>, vector<16x32xf32> -> vector<32x32xf32>
    %cst_69 = arith.constant dense<0.000000e+00> : vector<32xf32>
    %149 = vector.multi_reduction <add>, %148, %cst_69 [1] : vector<32x32xf32> to vector<32xf32>
    %150 = vector.shape_cast %149 : vector<32xf32> to vector<32x1xf32>
    %cst_70 = arith.constant 3.200000e+01 : f32
    %151 = vector.broadcast %cst_70 : f32 to vector<32x1xf32>
    %152 = arith.divf %150, %151 : vector<32x1xf32>
    %153 = vector.extract_strided_slice %152 {offsets = [0, 0], sizes = [16, 1], strides = [1, 1]} : vector<32x1xf32> to vector<16x1xf32>
    %154 = vector.extract_strided_slice %152 {offsets = [16, 0], sizes = [16, 1], strides = [1, 1]} : vector<32x1xf32> to vector<16x1xf32>
    %155 = arith.mulf %153, %153 : vector<16x1xf32>
    %156 = arith.subf %154, %155 : vector<16x1xf32>
    %157 = vector.broadcast %153 : vector<16x1xf32> to vector<16x32xf32>
    %158 = arith.subf %142, %157 : vector<16x32xf32>
    %cst_71 = arith.constant 9.99999974E-6 : f32
    %159 = vector.broadcast %cst_71 : f32 to vector<16x1xf32>
    %160 = arith.addf %156, %159 : vector<16x1xf32>
    %161 = math.rsqrt %160 : vector<16x1xf32>
    %162 = vector.broadcast %161 : vector<16x1xf32> to vector<16x32xf32>
    %163 = arith.mulf %158, %162 : vector<16x32xf32>
    %164 = vector.broadcast %144 : vector<1x32xf32> to vector<16x32xf32>
    %165 = arith.mulf %163, %164 : vector<16x32xf32>
    %166 = vector.broadcast %146 : vector<1x32xf32> to vector<16x32xf32>
    %167 = arith.addf %165, %166 : vector<16x32xf32>
    %c1 = arith.constant 1 : index
    %c0_72 = arith.constant 0 : index
    %c0_73 = arith.constant 0 : index
    %168 = vector.load %arg3[%c1, %c0_72, %c0_73] : memref<2x32x96xf32, #tpu.memory_space<vmem>>, vector<1x32x96xf32>
    %169 = vector.shape_cast %168 : vector<1x32x96xf32> to vector<32x96xf32>
    %cst_74 = arith.constant dense<0.000000e+00> : vector<16x96xf32>
    %170 = tpu.matmul %167, %169, %cst_74 {dimension_numbers = #tpu.dot_dimension_numbers<[1], [0], [0], [1], [0, 0, 1, 1], [], []>} : vector<16x32xf32>, vector<32x96xf32>, vector<16x96xf32> -> vector<16x96xf32>
    %c1_75 = arith.constant 1 : index
    %c0_76 = arith.constant 0 : index
    %c0_77 = arith.constant 0 : index
    %171 = vector.load %arg4[%c1_75, %c0_76, %c0_77] : memref<2x1x96xf32, #tpu.memory_space<vmem>>, vector<1x1x96xf32>
    %172 = vector.shape_cast %171 : vector<1x1x96xf32> to vector<1x96xf32>
    %173 = vector.broadcast %172 : vector<1x96xf32> to vector<16x96xf32>
    %174 = arith.addf %170, %173 : vector<16x96xf32>
    %175 = vector.extract_strided_slice %174 {offsets = [0, 0], sizes = [16, 32], strides = [1, 1]} : vector<16x96xf32> to vector<16x32xf32>
    %176 = vector.shape_cast %175 : vector<16x32xf32> to vector<2x8x32xf32>
    %177 = vector.extract_strided_slice %174 {offsets = [0, 32], sizes = [16, 32], strides = [1, 1]} : vector<16x96xf32> to vector<16x32xf32>
    %178 = vector.shape_cast %177 : vector<16x32xf32> to vector<2x8x32xf32>
    %179 = vector.extract_strided_slice %174 {offsets = [0, 64], sizes = [16, 32], strides = [1, 1]} : vector<16x96xf32> to vector<16x32xf32>
    %180 = vector.shape_cast %179 : vector<16x32xf32> to vector<2x8x32xf32>
    %181 = vector.extract_strided_slice %176 {offsets = [0, 0, 0], sizes = [2, 8, 8], strides = [1, 1, 1]} : vector<2x8x32xf32> to vector<2x8x8xf32>
    %182 = vector.extract_strided_slice %178 {offsets = [0, 0, 0], sizes = [2, 8, 8], strides = [1, 1, 1]} : vector<2x8x32xf32> to vector<2x8x8xf32>
    %183 = vector.extract_strided_slice %180 {offsets = [0, 0, 0], sizes = [2, 8, 8], strides = [1, 1, 1]} : vector<2x8x32xf32> to vector<2x8x8xf32>
    "tpu.trace_start"() <{level = 10 : i32, message = "bqd,bkd->bqk"}> : () -> ()
    %cst_78 = arith.constant dense<0.000000e+00> : vector<2x8x8xf32>
    %184 = tpu.matmul %181, %182, %cst_78 {dimension_numbers = #tpu.dot_dimension_numbers<[2], [2], [1], [1], [0, 0, 0, 1, 1, 1], [0], [0]>} : vector<2x8x8xf32>, vector<2x8x8xf32>, vector<2x8x8xf32> -> vector<2x8x8xf32>
    "tpu.trace_stop"() : () -> ()
    %cst_79 = arith.constant 0.353553385 : f32
    %185 = vector.broadcast %cst_79 : f32 to vector<2x8x8xf32>
    %186 = arith.mulf %184, %185 : vector<2x8x8xf32>
    %cst_80 = arith.constant dense<0xFF800000> : vector<2x8xf32>
    %187 = vector.multi_reduction <maximumf>, %186, %cst_80 [2] : vector<2x8x8xf32> to vector<2x8xf32>
    %188 = vector.shape_cast %187 : vector<2x8xf32> to vector<2x8x1xf32>
    %189 = vector.broadcast %188 : vector<2x8x1xf32> to vector<2x8x8xf32>
    %190 = arith.subf %186, %189 : vector<2x8x8xf32>
    %191 = math.exp %190 : vector<2x8x8xf32>
    %cst_81 = arith.constant dense<0.000000e+00> : vector<2x8xf32>
    %192 = vector.multi_reduction <add>, %191, %cst_81 [2] : vector<2x8x8xf32> to vector<2x8xf32>
    %193 = vector.shape_cast %192 : vector<2x8xf32> to vector<2x8x1xf32>
    %194 = tpu.reciprocal %193 {approx = true} : vector<2x8x1xf32> -> vector<2x8x1xf32>
    %195 = vector.broadcast %194 : vector<2x8x1xf32> to vector<2x8x8xf32>
    %196 = arith.mulf %191, %195 : vector<2x8x8xf32>
    "tpu.trace_start"() <{level = 10 : i32, message = "bqk,bkd->bqd"}> : () -> ()
    %cst_82 = arith.constant dense<0.000000e+00> : vector<2x8x8xf32>
    %197 = tpu.matmul %196, %183, %cst_82 {dimension_numbers = #tpu.dot_dimension_numbers<[2], [1], [1], [2], [0, 0, 0, 1, 1, 2], [0], [0]>} : vector<2x8x8xf32>, vector<2x8x8xf32>, vector<2x8x8xf32> -> vector<2x8x8xf32>
    "tpu.trace_stop"() : () -> ()
    %198 = vector.extract_strided_slice %176 {offsets = [0, 0, 8], sizes = [2, 8, 8], strides = [1, 1, 1]} : vector<2x8x32xf32> to vector<2x8x8xf32>
    %199 = vector.extract_strided_slice %178 {offsets = [0, 0, 8], sizes = [2, 8, 8], strides = [1, 1, 1]} : vector<2x8x32xf32> to vector<2x8x8xf32>
    %200 = vector.extract_strided_slice %180 {offsets = [0, 0, 8], sizes = [2, 8, 8], strides = [1, 1, 1]} : vector<2x8x32xf32> to vector<2x8x8xf32>
    "tpu.trace_start"() <{level = 10 : i32, message = "bqd,bkd->bqk"}> : () -> ()
    %cst_83 = arith.constant dense<0.000000e+00> : vector<2x8x8xf32>
    %201 = tpu.matmul %198, %199, %cst_83 {dimension_numbers = #tpu.dot_dimension_numbers<[2], [2], [1], [1], [0, 0, 0, 1, 1, 1], [0], [0]>} : vector<2x8x8xf32>, vector<2x8x8xf32>, vector<2x8x8xf32> -> vector<2x8x8xf32>
    "tpu.trace_stop"() : () -> ()
    %cst_84 = arith.constant 0.353553385 : f32
    %202 = vector.broadcast %cst_84 : f32 to vector<2x8x8xf32>
    %203 = arith.mulf %201, %202 : vector<2x8x8xf32>
    %cst_85 = arith.constant dense<0xFF800000> : vector<2x8xf32>
    %204 = vector.multi_reduction <maximumf>, %203, %cst_85 [2] : vector<2x8x8xf32> to vector<2x8xf32>
    %205 = vector.shape_cast %204 : vector<2x8xf32> to vector<2x8x1xf32>
    %206 = vector.broadcast %205 : vector<2x8x1xf32> to vector<2x8x8xf32>
    %207 = arith.subf %203, %206 : vector<2x8x8xf32>
    %208 = math.exp %207 : vector<2x8x8xf32>
    %cst_86 = arith.constant dense<0.000000e+00> : vector<2x8xf32>
    %209 = vector.multi_reduction <add>, %208, %cst_86 [2] : vector<2x8x8xf32> to vector<2x8xf32>
    %210 = vector.shape_cast %209 : vector<2x8xf32> to vector<2x8x1xf32>
    %211 = tpu.reciprocal %210 {approx = true} : vector<2x8x1xf32> -> vector<2x8x1xf32>
    %212 = vector.broadcast %211 : vector<2x8x1xf32> to vector<2x8x8xf32>
    %213 = arith.mulf %208, %212 : vector<2x8x8xf32>
    "tpu.trace_start"() <{level = 10 : i32, message = "bqk,bkd->bqd"}> : () -> ()
    %cst_87 = arith.constant dense<0.000000e+00> : vector<2x8x8xf32>
    %214 = tpu.matmul %213, %200, %cst_87 {dimension_numbers = #tpu.dot_dimension_numbers<[2], [1], [1], [2], [0, 0, 0, 1, 1, 2], [0], [0]>} : vector<2x8x8xf32>, vector<2x8x8xf32>, vector<2x8x8xf32> -> vector<2x8x8xf32>
    "tpu.trace_stop"() : () -> ()
    %215 = vector.extract_strided_slice %176 {offsets = [0, 0, 16], sizes = [2, 8, 8], strides = [1, 1, 1]} : vector<2x8x32xf32> to vector<2x8x8xf32>
    %216 = vector.extract_strided_slice %178 {offsets = [0, 0, 16], sizes = [2, 8, 8], strides = [1, 1, 1]} : vector<2x8x32xf32> to vector<2x8x8xf32>
    %217 = vector.extract_strided_slice %180 {offsets = [0, 0, 16], sizes = [2, 8, 8], strides = [1, 1, 1]} : vector<2x8x32xf32> to vector<2x8x8xf32>
    "tpu.trace_start"() <{level = 10 : i32, message = "bqd,bkd->bqk"}> : () -> ()
    %cst_88 = arith.constant dense<0.000000e+00> : vector<2x8x8xf32>
    %218 = tpu.matmul %215, %216, %cst_88 {dimension_numbers = #tpu.dot_dimension_numbers<[2], [2], [1], [1], [0, 0, 0, 1, 1, 1], [0], [0]>} : vector<2x8x8xf32>, vector<2x8x8xf32>, vector<2x8x8xf32> -> vector<2x8x8xf32>
    "tpu.trace_stop"() : () -> ()
    %cst_89 = arith.constant 0.353553385 : f32
    %219 = vector.broadcast %cst_89 : f32 to vector<2x8x8xf32>
    %220 = arith.mulf %218, %219 : vector<2x8x8xf32>
    %cst_90 = arith.constant dense<0xFF800000> : vector<2x8xf32>
    %221 = vector.multi_reduction <maximumf>, %220, %cst_90 [2] : vector<2x8x8xf32> to vector<2x8xf32>
    %222 = vector.shape_cast %221 : vector<2x8xf32> to vector<2x8x1xf32>
    %223 = vector.broadcast %222 : vector<2x8x1xf32> to vector<2x8x8xf32>
    %224 = arith.subf %220, %223 : vector<2x8x8xf32>
    %225 = math.exp %224 : vector<2x8x8xf32>
    %cst_91 = arith.constant dense<0.000000e+00> : vector<2x8xf32>
    %226 = vector.multi_reduction <add>, %225, %cst_91 [2] : vector<2x8x8xf32> to vector<2x8xf32>
    %227 = vector.shape_cast %226 : vector<2x8xf32> to vector<2x8x1xf32>
    %228 = tpu.reciprocal %227 {approx = true} : vector<2x8x1xf32> -> vector<2x8x1xf32>
    %229 = vector.broadcast %228 : vector<2x8x1xf32> to vector<2x8x8xf32>
    %230 = arith.mulf %225, %229 : vector<2x8x8xf32>
    "tpu.trace_start"() <{level = 10 : i32, message = "bqk,bkd->bqd"}> : () -> ()
    %cst_92 = arith.constant dense<0.000000e+00> : vector<2x8x8xf32>
    %231 = tpu.matmul %230, %217, %cst_92 {dimension_numbers = #tpu.dot_dimension_numbers<[2], [1], [1], [2], [0, 0, 0, 1, 1, 2], [0], [0]>} : vector<2x8x8xf32>, vector<2x8x8xf32>, vector<2x8x8xf32> -> vector<2x8x8xf32>
    "tpu.trace_stop"() : () -> ()
    %232 = vector.extract_strided_slice %176 {offsets = [0, 0, 24], sizes = [2, 8, 8], strides = [1, 1, 1]} : vector<2x8x32xf32> to vector<2x8x8xf32>
    %233 = vector.extract_strided_slice %178 {offsets = [0, 0, 24], sizes = [2, 8, 8], strides = [1, 1, 1]} : vector<2x8x32xf32> to vector<2x8x8xf32>
    %234 = vector.extract_strided_slice %180 {offsets = [0, 0, 24], sizes = [2, 8, 8], strides = [1, 1, 1]} : vector<2x8x32xf32> to vector<2x8x8xf32>
    "tpu.trace_start"() <{level = 10 : i32, message = "bqd,bkd->bqk"}> : () -> ()
    %cst_93 = arith.constant dense<0.000000e+00> : vector<2x8x8xf32>
    %235 = tpu.matmul %232, %233, %cst_93 {dimension_numbers = #tpu.dot_dimension_numbers<[2], [2], [1], [1], [0, 0, 0, 1, 1, 1], [0], [0]>} : vector<2x8x8xf32>, vector<2x8x8xf32>, vector<2x8x8xf32> -> vector<2x8x8xf32>
    "tpu.trace_stop"() : () -> ()
    %cst_94 = arith.constant 0.353553385 : f32
    %236 = vector.broadcast %cst_94 : f32 to vector<2x8x8xf32>
    %237 = arith.mulf %235, %236 : vector<2x8x8xf32>
    %cst_95 = arith.constant dense<0xFF800000> : vector<2x8xf32>
    %238 = vector.multi_reduction <maximumf>, %237, %cst_95 [2] : vector<2x8x8xf32> to vector<2x8xf32>
    %239 = vector.shape_cast %238 : vector<2x8xf32> to vector<2x8x1xf32>
    %240 = vector.broadcast %239 : vector<2x8x1xf32> to vector<2x8x8xf32>
    %241 = arith.subf %237, %240 : vector<2x8x8xf32>
    %242 = math.exp %241 : vector<2x8x8xf32>
    %cst_96 = arith.constant dense<0.000000e+00> : vector<2x8xf32>
    %243 = vector.multi_reduction <add>, %242, %cst_96 [2] : vector<2x8x8xf32> to vector<2x8xf32>
    %244 = vector.shape_cast %243 : vector<2x8xf32> to vector<2x8x1xf32>
    %245 = tpu.reciprocal %244 {approx = true} : vector<2x8x1xf32> -> vector<2x8x1xf32>
    %246 = vector.broadcast %245 : vector<2x8x1xf32> to vector<2x8x8xf32>
    %247 = arith.mulf %242, %246 : vector<2x8x8xf32>
    "tpu.trace_start"() <{level = 10 : i32, message = "bqk,bkd->bqd"}> : () -> ()
    %cst_97 = arith.constant dense<0.000000e+00> : vector<2x8x8xf32>
    %248 = tpu.matmul %247, %234, %cst_97 {dimension_numbers = #tpu.dot_dimension_numbers<[2], [1], [1], [2], [0, 0, 0, 1, 1, 2], [0], [0]>} : vector<2x8x8xf32>, vector<2x8x8xf32>, vector<2x8x8xf32> -> vector<2x8x8xf32>
    "tpu.trace_stop"() : () -> ()
    %249 = tpu.concatenate %197, %214, %231, %248 in 2 : vector<2x8x8xf32>, vector<2x8x8xf32>, vector<2x8x8xf32>, vector<2x8x8xf32> -> vector<2x8x32xf32>
    %250 = vector.shape_cast %249 : vector<2x8x32xf32> to vector<16x32xf32>
    %c1_98 = arith.constant 1 : index
    %c0_99 = arith.constant 0 : index
    %c0_100 = arith.constant 0 : index
    %251 = vector.load %arg5[%c1_98, %c0_99, %c0_100] : memref<2x32x32xf32, #tpu.memory_space<vmem>>, vector<1x32x32xf32>
    %252 = vector.shape_cast %251 : vector<1x32x32xf32> to vector<32x32xf32>
    %cst_101 = arith.constant dense<0.000000e+00> : vector<16x32xf32>
    %253 = tpu.matmul %250, %252, %cst_101 {dimension_numbers = #tpu.dot_dimension_numbers<[1], [0], [0], [1], [0, 0, 1, 1], [], []>} : vector<16x32xf32>, vector<32x32xf32>, vector<16x32xf32> -> vector<16x32xf32>
    %c1_102 = arith.constant 1 : index
    %c0_103 = arith.constant 0 : index
    %c0_104 = arith.constant 0 : index
    %254 = vector.load %arg6[%c1_102, %c0_103, %c0_104] : memref<2x1x32xf32, #tpu.memory_space<vmem>>, vector<1x1x32xf32>
    %255 = vector.shape_cast %254 : vector<1x1x32xf32> to vector<1x32xf32>
    %256 = vector.broadcast %255 : vector<1x32xf32> to vector<16x32xf32>
    %257 = arith.addf %253, %256 : vector<16x32xf32>
    %258 = arith.addf %167, %257 : vector<16x32xf32>
    %c1_105 = arith.constant 1 : index
    %c0_106 = arith.constant 0 : index
    %c0_107 = arith.constant 0 : index
    %259 = vector.load %arg7[%c1_105, %c0_106, %c0_107] : memref<2x1x32xf32, #tpu.memory_space<vmem>>, vector<1x1x32xf32>
    %260 = vector.shape_cast %259 : vector<1x1x32xf32> to vector<1x32xf32>
    %c1_108 = arith.constant 1 : index
    %c0_109 = arith.constant 0 : index
    %c0_110 = arith.constant 0 : index
    %261 = vector.load %arg8[%c1_108, %c0_109, %c0_110] : memref<2x1x32xf32, #tpu.memory_space<vmem>>, vector<1x1x32xf32>
    %262 = vector.shape_cast %261 : vector<1x1x32xf32> to vector<1x32xf32>
    %263 = arith.mulf %258, %258 : vector<16x32xf32>
    %264 = tpu.concatenate %258, %263 in 0 : vector<16x32xf32>, vector<16x32xf32> -> vector<32x32xf32>
    %cst_111 = arith.constant dense<0.000000e+00> : vector<32xf32>
    %265 = vector.multi_reduction <add>, %264, %cst_111 [1] : vector<32x32xf32> to vector<32xf32>
    %266 = vector.shape_cast %265 : vector<32xf32> to vector<32x1xf32>
    %cst_112 = arith.constant 3.200000e+01 : f32
    %267 = vector.broadcast %cst_112 : f32 to vector<32x1xf32>
    %268 = arith.divf %266, %267 : vector<32x1xf32>
    %269 = vector.extract_strided_slice %268 {offsets = [0, 0], sizes = [16, 1], strides = [1, 1]} : vector<32x1xf32> to vector<16x1xf32>
    %270 = vector.extract_strided_slice %268 {offsets = [16, 0], sizes = [16, 1], strides = [1, 1]} : vector<32x1xf32> to vector<16x1xf32>
    %271 = arith.mulf %269, %269 : vector<16x1xf32>
    %272 = arith.subf %270, %271 : vector<16x1xf32>
    %273 = vector.broadcast %269 : vector<16x1xf32> to vector<16x32xf32>
    %274 = arith.subf %258, %273 : vector<16x32xf32>
    %cst_113 = arith.constant 9.99999974E-6 : f32
    %275 = vector.broadcast %cst_113 : f32 to vector<16x1xf32>
    %276 = arith.addf %272, %275 : vector<16x1xf32>
    %277 = math.rsqrt %276 : vector<16x1xf32>
    %278 = vector.broadcast %277 : vector<16x1xf32> to vector<16x32xf32>
    %279 = arith.mulf %274, %278 : vector<16x32xf32>
    %280 = vector.broadcast %260 : vector<1x32xf32> to vector<16x32xf32>
    %281 = arith.mulf %279, %280 : vector<16x32xf32>
    %282 = vector.broadcast %262 : vector<1x32xf32> to vector<16x32xf32>
    %283 = arith.addf %281, %282 : vector<16x32xf32>
    %c1_114 = arith.constant 1 : index
    %c0_115 = arith.constant 0 : index
    %c0_116 = arith.constant 0 : index
    %284 = vector.load %arg9[%c1_114, %c0_115, %c0_116] : memref<2x32x2048xf32, #tpu.memory_space<vmem>>, vector<1x32x2048xf32>
    %285 = vector.shape_cast %284 : vector<1x32x2048xf32> to vector<32x2048xf32>
    %cst_117 = arith.constant dense<0.000000e+00> : vector<16x2048xf32>
    %286 = tpu.matmul %283, %285, %cst_117 {dimension_numbers = #tpu.dot_dimension_numbers<[1], [0], [0], [1], [0, 0, 1, 1], [], []>} : vector<16x32xf32>, vector<32x2048xf32>, vector<16x2048xf32> -> vector<16x2048xf32>
    %c1_118 = arith.constant 1 : index
    %c0_119 = arith.constant 0 : index
    %c0_120 = arith.constant 0 : index
    %287 = vector.load %arg10[%c1_118, %c0_119, %c0_120] : memref<2x1x2048xf32, #tpu.memory_space<vmem>>, vector<1x1x2048xf32>
    %288 = vector.shape_cast %287 : vector<1x1x2048xf32> to vector<1x2048xf32>
    %289 = vector.broadcast %288 : vector<1x2048xf32> to vector<16x2048xf32>
    %290 = arith.addf %286, %289 : vector<16x2048xf32>
    %cst_121 = arith.constant 0.000000e+00 : f32
    %291 = vector.broadcast %cst_121 : f32 to vector<16x2048xf32>
    %292 = arith.maximumf %290, %291 : vector<16x2048xf32>
    %c1_122 = arith.constant 1 : index
    %c0_123 = arith.constant 0 : index
    %c0_124 = arith.constant 0 : index
    %293 = vector.load %arg11[%c1_122, %c0_123, %c0_124] : memref<2x2048x32xf32, #tpu.memory_space<vmem>>, vector<1x2048x32xf32>
    %294 = vector.shape_cast %293 : vector<1x2048x32xf32> to vector<2048x32xf32>
    %cst_125 = arith.constant dense<0.000000e+00> : vector<16x32xf32>
    %295 = tpu.matmul %292, %294, %cst_125 {dimension_numbers = #tpu.dot_dimension_numbers<[1], [0], [0], [1], [0, 0, 1, 1], [], []>} : vector<16x2048xf32>, vector<2048x32xf32>, vector<16x32xf32> -> vector<16x32xf32>
    %c1_126 = arith.constant 1 : index
    %c0_127 = arith.constant 0 : index
    %c0_128 = arith.constant 0 : index
    %296 = vector.load %arg12[%c1_126, %c0_127, %c0_128] : memref<2x1x32xf32, #tpu.memory_space<vmem>>, vector<1x1x32xf32>
    %297 = vector.shape_cast %296 : vector<1x1x32xf32> to vector<1x32xf32>
    %298 = vector.broadcast %297 : vector<1x32xf32> to vector<16x32xf32>
    %299 = arith.addf %295, %298 : vector<16x32xf32>
    %300 = arith.addf %283, %299 : vector<16x32xf32>
    %c1_129 = arith.constant 1 : index
    %c0_130 = arith.constant 0 : index
    %c0_131 = arith.constant 0 : index
    %301 = vector.load %arg13[%c1_129, %c0_130, %c0_131] : memref<2x1x32xf32, #tpu.memory_space<vmem>>, vector<1x1x32xf32>
    %302 = vector.shape_cast %301 : vector<1x1x32xf32> to vector<1x32xf32>
    %c1_132 = arith.constant 1 : index
    %c0_133 = arith.constant 0 : index
    %c0_134 = arith.constant 0 : index
    %303 = vector.load %arg14[%c1_132, %c0_133, %c0_134] : memref<2x1x32xf32, #tpu.memory_space<vmem>>, vector<1x1x32xf32>
    %304 = vector.shape_cast %303 : vector<1x1x32xf32> to vector<1x32xf32>
    %305 = arith.mulf %300, %300 : vector<16x32xf32>
    %306 = tpu.concatenate %300, %305 in 0 : vector<16x32xf32>, vector<16x32xf32> -> vector<32x32xf32>
    %cst_135 = arith.constant dense<0.000000e+00> : vector<32xf32>
    %307 = vector.multi_reduction <add>, %306, %cst_135 [1] : vector<32x32xf32> to vector<32xf32>
    %308 = vector.shape_cast %307 : vector<32xf32> to vector<32x1xf32>
    %cst_136 = arith.constant 3.200000e+01 : f32
    %309 = vector.broadcast %cst_136 : f32 to vector<32x1xf32>
    %310 = arith.divf %308, %309 : vector<32x1xf32>
    %311 = vector.extract_strided_slice %310 {offsets = [0, 0], sizes = [16, 1], strides = [1, 1]} : vector<32x1xf32> to vector<16x1xf32>
    %312 = vector.extract_strided_slice %310 {offsets = [16, 0], sizes = [16, 1], strides = [1, 1]} : vector<32x1xf32> to vector<16x1xf32>
    %313 = arith.mulf %311, %311 : vector<16x1xf32>
    %314 = arith.subf %312, %313 : vector<16x1xf32>
    %315 = vector.broadcast %311 : vector<16x1xf32> to vector<16x32xf32>
    %316 = arith.subf %300, %315 : vector<16x32xf32>
    %cst_137 = arith.constant 9.99999974E-6 : f32
    %317 = vector.broadcast %cst_137 : f32 to vector<16x1xf32>
    %318 = arith.addf %314, %317 : vector<16x1xf32>
    %319 = math.rsqrt %318 : vector<16x1xf32>
    %320 = vector.broadcast %319 : vector<16x1xf32> to vector<16x32xf32>
    %321 = arith.mulf %316, %320 : vector<16x32xf32>
    %322 = vector.broadcast %302 : vector<1x32xf32> to vector<16x32xf32>
    %323 = arith.mulf %321, %322 : vector<16x32xf32>
    %324 = vector.broadcast %304 : vector<1x32xf32> to vector<16x32xf32>
    %325 = arith.addf %323, %324 : vector<16x32xf32>
    %c0_138 = arith.constant 0 : index
    %c0_139 = arith.constant 0 : index
    %326 = vector.load %arg15[%c0_138, %c0_139] : memref<32x128xf32, #tpu.memory_space<vmem>>, vector<32x128xf32>
    %cst_140 = arith.constant dense<0.000000e+00> : vector<16x128xf32>
    %327 = tpu.matmul %325, %326, %cst_140 {dimension_numbers = #tpu.dot_dimension_numbers<[1], [0], [0], [1], [0, 0, 1, 1], [], []>} : vector<16x32xf32>, vector<32x128xf32>, vector<16x128xf32> -> vector<16x128xf32>
    %c0_141 = arith.constant 0 : index
    %c0_142 = arith.constant 0 : index
    %328 = vector.load %arg16[%c0_141, %c0_142] : memref<1x128xf32, #tpu.memory_space<vmem>>, vector<1x128xf32>
    %329 = vector.broadcast %328 : vector<1x128xf32> to vector<16x128xf32>
    %330 = arith.addf %327, %329 : vector<16x128xf32>
    %331 = vector.shape_cast %330 : vector<16x128xf32> to vector<2x8x128xf32>
    %c0_143 = arith.constant 0 : index
    %c0_144 = arith.constant 0 : index
    %c0_145 = arith.constant 0 : index
    %332 = vector.load %arg17[%c0_143, %c0_144, %c0_145] : memref<2x8x128xf32, #tpu.memory_space<vmem>>, vector<2x8x128xf32>
    tpu.vector_store %arg17[%c0_143, %c0_144, %c0_145], %331 {strides = array<i32>} : memref<2x8x128xf32, #tpu.memory_space<vmem>>, vector<2x8x128xf32>,
    return
  }
}

</mosaic_0001>

<bundles_post_ra>
// kernel: _lambda_.1
= control target key start
LH: loop header
LB: loop body
LE: loop exit
PB: predicated region body
PF: predicated region fallthrough
CT: control target
= control target key end

     0   :  { %s10328_s0 = inlined_call_operand.vmem [shape: s32[16,1], index: 0, kind: input, shape index: {}]   ;;  %s10329_s1 = inlined_call_operand.hbm [shape: f32[64,32], index: 1, kind: input, shape index: {}]   ;;  %s10330_s2 = inlined_call_operand.vmem [shape: f32[16,32], index: 2, kind: input, shape index: {}]   ;;  %s10331_s3 = inlined_call_operand.hbm [shape: f32[2,32,96], index: 3, kind: input, shape index: {}]   ;;  %s10332_s4 = inlined_call_operand.hbm [shape: f32[2,1,96], index: 4, kind: input, shape index: {}]   ;;  %s10333_s5 = inlined_call_operand.hbm [shape: f32[2,32,32], index: 5, kind: input, shape index: {}]   ;;  %s10334_s6 = inlined_call_operand.hbm [shape: f32[2,1,32], index: 6, kind: input, shape index: {}]   ;;  %s10335_s7 = inlined_call_operand.vmem [shape: f32[2,1,32], index: 7, kind: input, shape index: {}, may-alias: {7,13}]   ;;  %s10336_s8 = inlined_call_operand.vmem [shape: f32[2,1,32], index: 8, kind: input, shape index: {}, may-alias: {8,14}]   ;;  %s10337_s9 = inlined_call_operand.hbm [shape: f32[2,32,2048], index: 9, kind: input, shape index: {}]   ;;  %s10338_s10 = inlined_call_operand.hbm [shape: f32[2,1,2048], index: 10, kind: input, shape index: {}]   ;;  %s10339_s11 = inlined_call_operand.hbm [shape: f32[2,2048,32], index: 11, kind: input, shape index: {}]   ;;  %s10340_s12 = inlined_call_operand.hbm [shape: f32[2,1,32], index: 12, kind: input, shape index: {}]   ;;  %s10341_s13 = inlined_call_operand.vmem [shape: f32[2,1,32], index: 13, kind: input, shape index: {}, may-alias: {7,13}]   ;;  %s10342_s14 = inlined_call_operand.vmem [shape: f32[2,1,32], index: 14, kind: input, shape index: {}, may-alias: {8,14}]   ;;  %s10343_s15 = inlined_call_operand.hbm [shape: f32[32,128], index: 15, kind: input, shape index: {}]   ;;  %s10344_s16 = inlined_call_operand.hbm [shape: f32[1,128], index: 16, kind: input, shape index: {}]   ;;  %s10345_s17 = inlined_call_operand.hbm [shape: f32[2,8,128], index: 17, kind: output, shape index: {}]  }
   0x1   :  { %10348 = sst [smem:[#allocation28_spill]] %s10328_s0 }
   0x2   :  { %10349 = sst [smem:[#allocation29_spill]] %s10329_s1 }
   0x3   :  { %22 = vsyncpa [#allocation3], 0 }
   0x4   :  { %23 = vsyncpa [#allocation6], 0 }
   0x5   :  { %24 = vsyncpa [#allocation9], 0 }
   0x6   :  { %25 = vsyncpa [#allocation12], 0 }
   0x7   :  { %26 = vsyncpa [#allocation15], 0 }
   0x8   :  { %27 = vsyncpa [#allocation18], 0 }
   0x9   :  { %28 = vsyncpa [#allocation4], 0  ;;  %s9202_s24 = smov [#allocation5]   ;;  %s9203_s26 = smov [#allocation8]  }
   0xa   :  { %s50_s25 = sshll.u32 %s9202_s24, 4  ;;  %s74_s27 = sshll.u32 %s9203_s26, 4  ;;  %s51_s25 = int_to_ptr.vmem [resolvable:$true] %s50_s25  ;;  %s9325_s27 = int_to_ptr.vmem [resolvable:$true] %s74_s27 }
   0xb   :  { %s8924_s0 = scalar_lea.hbm %s10331_s3, 1024 }
   0xc   :  { %p8925_p0 = scmp.ne.s32.totalorder %s10331_s3, %s8924_s0  ;;  %p8928_p1 = scmp.lt.u32.totalorder %s8924_s0, %s10331_s3 }
   0xe   :  { %p8930_p2 = pnand %p8928_p1, %p8925_p0 }
  0x10   :  { %8933 = shalt.err (!%p8930_p2)
}
  0x11   :  { %s8934_s20 = scalar_lea.vmem %s51_s25, 1024  ;;  %p8939_p4 = scmp.lt.s32.totalorder %s51_s25, %s51_s25 }
  0x12   :  { %p8935_p3 = scmp.ne.s32.totalorder %s51_s25, %s8934_s20  ;;  %p8940_p5 = scmp.lt.s32.totalorder %s8934_s20, %s8934_s20 }
  0x14   :  { %p8941_p6 = por %p8940_p5, %p8939_p4 }
  0x16   :  { %p8942_p7 = pnand %p8941_p6, %p8935_p3 }
  0x18   :  { %8945 = shalt.err (!%p8942_p7)
}
  0x19   :  { %s9204_s21 = smov 128   ;;  %s9205_s22 = smov 8  }
  0x1a   :  { %56 = dma.hbm_to_vmem [thread:$0]  %s10331_s3, 1024, %s51_s25, [#allocation6], %s9204_s21, %s9204_s21, %s9205_s22  }
  0x1b   :  { %s8946_s29 = scalar_lea.hbm %s10333_s5, 1024 }
  0x1c   :  { %p8947_p8 = scmp.ne.s32.totalorder %s10333_s5, %s8946_s29  ;;  %p8950_p9 = scmp.lt.u32.totalorder %s8946_s29, %s10333_s5 }
  0x1e   :  { %p8952_p10 = pnand %p8950_p9, %p8947_p8 }
  0x20   :  { %8955 = shalt.err (!%p8952_p10)
}
  0x21   :  { %s8956_s1 = scalar_lea.vmem %s9325_s27, 1024  ;;  %p8961_p12 = scmp.lt.s32.totalorder %s9325_s27, %s9325_s27 }
  0x22   :  { %p8957_p11 = scmp.ne.s32.totalorder %s9325_s27, %s8956_s1  ;;  %p8962_p13 = scmp.lt.s32.totalorder %s8956_s1, %s8956_s1 }
  0x24   :  { %p8963_p0 = por %p8962_p13, %p8961_p12 }
  0x26   :  { %p8964_p1 = pnand %p8963_p0, %p8957_p11 }
  0x28   :  { %8967 = shalt.err (!%p8964_p1)
}
  0x29   :  { %80 = dma.hbm_to_vmem [thread:$0]  %s10333_s5, 1024, %s9325_s27, [#allocation9], %s9204_s21, %s9204_s21, %s9205_s22  }
  0x2a   :  { %s9206_s20 = smov [#allocation11]   ;;  %s9207_s24 = smov [#allocation14]  }
  0x2b   :  { %s102_s23 = sshll.u32 %s9206_s20, 4  ;;  %s126_s26 = sshll.u32 %s9207_s24, 4  ;;  %s103_s23 = int_to_ptr.vmem [resolvable:$true] %s102_s23  ;;  %s127_s26 = int_to_ptr.vmem [resolvable:$true] %s126_s26 }
  0x2c   :  { %s8968_s0 = scalar_lea.hbm %s10337_s9, 16384 }
  0x2d   :  { %p8969_p2 = scmp.ne.s32.totalorder %s10337_s9, %s8968_s0  ;;  %p8972_p3 = scmp.lt.u32.totalorder %s8968_s0, %s10337_s9 }
  0x2f   :  { %p8974_p4 = pnand %p8972_p3, %p8969_p2 }
  0x31   :  { %8977 = shalt.err (!%p8974_p4)
}
  0x32   :  { %s8978_s5 = scalar_lea.vmem %s103_s23, 16384  ;;  %p8983_p6 = scmp.lt.s32.totalorder %s103_s23, %s103_s23 }
  0x33   :  { %p8979_p5 = scmp.ne.s32.totalorder %s103_s23, %s8978_s5  ;;  %p8984_p7 = scmp.lt.s32.totalorder %s8978_s5, %s8978_s5 }
  0x35   :  { %p8985_p8 = por %p8984_p7, %p8983_p6 }
  0x37   :  { %p8986_p9 = pnand %p8985_p8, %p8979_p5 }
  0x39   :  { %8989 = shalt.err (!%p8986_p9)
}
  0x3a   :  { %s9208_s27 = smov 2048   ;;  %s8990_s28 = scalar_lea.hbm %s10339_s11, 65536 }
  0x3b   :  { %108 = dma.hbm_to_vmem [thread:$0]  %s10337_s9, 16384, %s103_s23, [#allocation12], %s9208_s27, %s9208_s27, %s9204_s21  }
  0x3c   :  { %p8991_p10 = scmp.ne.s32.totalorder %s10339_s11, %s8990_s28  ;;  %p8994_p11 = scmp.lt.u32.totalorder %s8990_s28, %s10339_s11 }
  0x3e   :  { %p8996_p12 = pnand %p8994_p11, %p8991_p10 }
  0x40   :  { %8999 = shalt.err (!%p8996_p12)
}
  0x41   :  { %s9000_s19 = scalar_lea.vmem %s127_s26, 65536  ;;  %p9005_p0 = scmp.lt.s32.totalorder %s127_s26, %s127_s26 }
  0x42   :  { %p9001_p13 = scmp.ne.s32.totalorder %s127_s26, %s9000_s19  ;;  %p9006_p1 = scmp.lt.s32.totalorder %s9000_s19, %s9000_s19 }
  0x44   :  { %p9007_p2 = por %p9006_p1, %p9005_p0 }
  0x46   :  { %p9008_p3 = pnand %p9007_p2, %p9001_p13 }
  0x48   :  { %9011 = shalt.err (!%p9008_p3)
}
  0x49   :  { %132 = dma.hbm_to_vmem [thread:$0]  %s10339_s11, 65536, %s127_s26, [#allocation15], %s9204_s21, %s9204_s21, %s9205_s22  }
  0x4a   :  { %s9209_s1 = smov [#allocation17]   ;;  %s9210_s27 = smov [#allocation2]  }
  0x4b   :  { %s154_s5 = sshll.u32 %s9209_s1, 4  ;;  %s36_s3 = sshll.u32 %s9210_s27, 4  ;;  %s155_s5 = int_to_ptr.vmem [resolvable:$true] %s154_s5  ;;  %s37_s3 = int_to_ptr.vmem [resolvable:$true] %s36_s3 }
  0x4c   :  { %s9012_s24 = scalar_lea.hbm %s10343_s15, 512 }
  0x4d   :  { %p9013_p4 = scmp.ne.s32.totalorder %s10343_s15, %s9012_s24  ;;  %p9016_p5 = scmp.lt.u32.totalorder %s9012_s24, %s10343_s15 }
  0x4f   :  { %p9018_p6 = pnand %p9016_p5, %p9013_p4 }
  0x51   :  { %9021 = shalt.err (!%p9018_p6)
}
  0x52   :  { %s9022_s11 = scalar_lea.vmem %s155_s5, 512  ;;  %p9027_p8 = scmp.lt.s32.totalorder %s155_s5, %s155_s5 }
  0x53   :  { %p9023_p7 = scmp.ne.s32.totalorder %s155_s5, %s9022_s11  ;;  %p9028_p9 = scmp.lt.s32.totalorder %s9022_s11, %s9022_s11 }
  0x55   :  { %p9029_p10 = por %p9028_p9, %p9027_p8 }
  0x57   :  { %p9030_p11 = pnand %p9029_p10, %p9023_p7 }
  0x59   :  { %9033 = shalt.err (!%p9030_p11)
}
  0x5a   :  { %160 = dma.hbm_to_vmem [thread:$0]  %s10343_s15, 512, %s155_s5, [#allocation18], %s9204_s21, %s9204_s21, %s9205_s22  }
  0x5b   :  { %s10350_s23 = sld [smem:[#allocation29_spill]] }
  0x61   :  { %s9034_s1 = scalar_lea.hbm %s10350_s23, 1024 }
  0x62   :  { %p9035_p12 = scmp.ne.s32.totalorder %s10350_s23, %s9034_s1  ;;  %p9038_p13 = scmp.lt.u32.totalorder %s9034_s1, %s10350_s23 }
  0x64   :  { %p9040_p0 = pnand %p9038_p13, %p9035_p12 }
  0x66   :  { %9043 = shalt.err (!%p9040_p0)
}
  0x67   :  { %s9044_s28 = scalar_lea.vmem %s37_s3, 1024  ;;  %p9049_p2 = scmp.lt.s32.totalorder %s37_s3, %s37_s3 }
  0x68   :  { %p9045_p1 = scmp.ne.s32.totalorder %s37_s3, %s9044_s28  ;;  %p9050_p3 = scmp.lt.s32.totalorder %s9044_s28, %s9044_s28 }
  0x6a   :  { %p9051_p4 = por %p9050_p3, %p9049_p2 }
  0x6c   :  { %p9052_p5 = pnand %p9051_p4, %p9045_p1 }
  0x6e   :  { %9055 = shalt.err (!%p9052_p5)
}
  0x6f   :  { %42 = dma.hbm_to_vmem [thread:$0]  %s10350_s23, 1024, %s37_s3, [#allocation3], %s9204_s21, %s9204_s21, %s9205_s22  }
  0x70   :  { %s9211_s29 = smov [#allocation7]   ;;  %s9056_s26 = scalar_lea.hbm %s10332_s4, 32 }
  0x71   :  { %s62_s0 = sshll.u32 %s9211_s29, 4  ;;  %p9057_p6 = scmp.ne.s32.totalorder %s10332_s4, %s9056_s26  ;;  %s63_s0 = int_to_ptr.vmem [resolvable:$true] %s62_s0 }
  0x72   :  { %p9060_p7 = scmp.lt.u32.totalorder %s9056_s26, %s10332_s4 }
  0x74   :  { %p9062_p8 = pnand %p9060_p7, %p9057_p6 }
  0x76   :  { %9065 = shalt.err (!%p9062_p8)
}
  0x77   :  { %s9066_s27 = scalar_lea.vmem %s63_s0, 32  ;;  %p9071_p10 = scmp.lt.s32.totalorder %s63_s0, %s63_s0 }
  0x78   :  { %p9067_p9 = scmp.ne.s32.totalorder %s63_s0, %s9066_s27  ;;  %p9072_p11 = scmp.lt.s32.totalorder %s9066_s27, %s9066_s27 }
  0x7a   :  { %p9073_p12 = por %p9072_p11, %p9071_p10 }
  0x7c   :  { %p9074_p13 = pnand %p9073_p12, %p9067_p9 }
  0x7e   :  { %9077 = shalt.err (!%p9074_p13)
}
  0x7f   :  { %s9212_s3 = smov 16   ;;  %s9213_s23 = smov 1  }
  0x80   :  { %68 = dma.hbm_to_vmem [thread:$0]  %s10332_s4, 32, %s63_s0, [#allocation6], %s9212_s3, %s9212_s3, %s9213_s23  }
  0x81   :  { %s9214_s24 = smov [#allocation10]   ;;  %s9215_s15 = smov [#allocation13]  }
  0x82   :  { %s86_s28 = sshll.u32 %s9214_s24, 4  ;;  %s114_s5 = sshll.u32 %s9215_s15, 4  ;;  %s87_s28 = int_to_ptr.vmem [resolvable:$true] %s86_s28  ;;  %s9435_s5 = int_to_ptr.vmem [resolvable:$true] %s114_s5 }
  0x83   :  { %s9078_s11 = scalar_lea.hbm %s10334_s6, 32 }
  0x84   :  { %p9079_p0 = scmp.ne.s32.totalorder %s10334_s6, %s9078_s11  ;;  %p9082_p1 = scmp.lt.u32.totalorder %s9078_s11, %s10334_s6 }
  0x86   :  { %p9084_p2 = pnand %p9082_p1, %p9079_p0 }
  0x88   :  { %9087 = shalt.err (!%p9084_p2)
}
  0x89   :  { %s9088_s4 = scalar_lea.vmem %s87_s28, 32  ;;  %p9093_p4 = scmp.lt.s32.totalorder %s87_s28, %s87_s28 }
  0x8a   :  { %p9089_p3 = scmp.ne.s32.totalorder %s87_s28, %s9088_s4  ;;  %p9094_p5 = scmp.lt.s32.totalorder %s9088_s4, %s9088_s4 }
  0x8c   :  { %p9095_p6 = por %p9094_p5, %p9093_p4 }
  0x8e   :  { %p9096_p7 = pnand %p9095_p6, %p9089_p3 }
  0x90   :  { %9099 = shalt.err (!%p9096_p7)
}
  0x91   :  { %92 = dma.hbm_to_vmem [thread:$0]  %s10334_s6, 32, %s87_s28, [#allocation9], %s9212_s3, %s9212_s3, %s9213_s23  }
  0x92   :  { %s9100_s20 = scalar_lea.hbm %s10338_s10, 512 }
  0x93   :  { %p9101_p8 = scmp.ne.s32.totalorder %s10338_s10, %s9100_s20  ;;  %p9104_p9 = scmp.lt.u32.totalorder %s9100_s20, %s10338_s10 }
  0x95   :  { %p9106_p10 = pnand %p9104_p9, %p9101_p8 }
  0x97   :  { %9109 = shalt.err (!%p9106_p10)
}
  0x98   :  { %s9110_s11 = scalar_lea.vmem %s9435_s5, 512  ;;  %p9115_p12 = scmp.lt.s32.totalorder %s9435_s5, %s9435_s5 }
  0x99   :  { %p9111_p11 = scmp.ne.s32.totalorder %s9435_s5, %s9110_s11  ;;  %p9116_p13 = scmp.lt.s32.totalorder %s9110_s11, %s9110_s11 }
  0x9b   :  { %p9117_p0 = por %p9116_p13, %p9115_p12 }
  0x9d   :  { %p9118_p1 = pnand %p9117_p0, %p9111_p11 }
  0x9f   :  { %9121 = shalt.err (!%p9118_p1)
}
  0xa0   :  { %s9216_s6 = smov 256   ;;  %s9217_s18 = smov [#allocation16]  }
  0xa1   :  { %120 = dma.hbm_to_vmem [thread:$0]  %s10338_s10, 512, %s9435_s5, [#allocation12], %s9216_s6, %s9216_s6, %s9212_s3  }
  0xa2   :  { %s138_s19 = sshll.u32 %s9217_s18, 4  ;;  %s9218_s9 = smov [#allocation19]   ;;  %s139_s19 = int_to_ptr.vmem [resolvable:$true] %s138_s19 }
  0xa3   :  { %s167_s4 = sshll.u32 %s9218_s9, 4  ;;  %s9122_s27 = scalar_lea.hbm %s10340_s12, 32  ;;  %s168_s4 = int_to_ptr.vmem [resolvable:$true] %s167_s4 }
  0xa4   :  { %p9123_p2 = scmp.ne.s32.totalorder %s10340_s12, %s9122_s27  ;;  %p9126_p3 = scmp.lt.u32.totalorder %s9122_s27, %s10340_s12 }
  0xa6   :  { %p9128_p4 = pnand %p9126_p3, %p9123_p2 }
  0xa8   :  { %9131 = shalt.err (!%p9128_p4)
}
  0xa9   :  { %s9132_s10 = scalar_lea.vmem %s139_s19, 32  ;;  %p9137_p6 = scmp.lt.s32.totalorder %s139_s19, %s139_s19 }
  0xaa   :  { %p9133_p5 = scmp.ne.s32.totalorder %s139_s19, %s9132_s10  ;;  %p9138_p7 = scmp.lt.s32.totalorder %s9132_s10, %s9132_s10 }
  0xac   :  { %p9139_p8 = por %p9138_p7, %p9137_p6 }
  0xae   :  { %p9140_p9 = pnand %p9139_p8, %p9133_p5 }
  0xb0   :  { %9143 = shalt.err (!%p9140_p9)
}
  0xb1   :  { %144 = dma.hbm_to_vmem [thread:$0]  %s10340_s12, 32, %s139_s19, [#allocation15], %s9212_s3, %s9212_s3, %s9213_s23  }
  0xb2   :  { %s9144_s6 = scalar_lea.hbm %s10344_s16, 16 }
  0xb3   :  { %p9145_p10 = scmp.ne.s32.totalorder %s10344_s16, %s9144_s6  ;;  %p9148_p11 = scmp.lt.u32.totalorder %s9144_s6, %s10344_s16 }
  0xb5   :  { %p9150_p12 = pnand %p9148_p11, %p9145_p10 }
  0xb7   :  { %9153 = shalt.err (!%p9150_p12)
}
  0xb8   :  { %s9154_s0 = scalar_lea.vmem %s168_s4, 16  ;;  %s9158_s1 = scalar_lea.vmem %s168_s4, 32 }
  0xb9   :  { %p9155_p13 = scmp.ne.s32.totalorder %s168_s4, %s9154_s0  ;;  %p9159_p0 = scmp.lt.s32.totalorder %s168_s4, %s168_s4 }
  0xba   :  { %p9160_p1 = scmp.lt.s32.totalorder %s9158_s1, %s9154_s0 }
  0xbc   :  { %p9161_p2 = por %p9160_p1, %p9159_p0 }
  0xbe   :  { %p9162_p3 = pnand %p9161_p2, %p9155_p13 }
  0xc0   :  { %9165 = shalt.err (!%p9162_p3)
}
  0xc1   :  { %170 = dma.hbm_to_vmem [thread:$0]  %s10344_s16, 16, %s168_s4, [#allocation18]  }
  0xc2   :  { %9188 = dma.done.wait [#allocation3], 1024  }
  0xc3   :  { %9189 = vsyncadd [#allocation3], 4294966272 }
  0xc4   :  { %9190 = dma.done.wait [#allocation6], 1056  }
  0xc5   :  { %9191 = vsyncadd [#allocation6], 4294966240 }
  0xc6   :  { %9192 = dma.done.wait [#allocation9], 1056  }
  0xc7   :  { %9193 = vsyncadd [#allocation9], 4294966240 }
  0xc8   :  { %9194 = dma.done.wait [#allocation12], 16896  }
  0xc9   :  { %9195 = vsyncadd [#allocation12], 4294950400 }
  0xca   :  { %9196 = dma.done.wait [#allocation15], 65568  }
  0xcb   :  { %9197 = vsyncadd [#allocation15], 4294901728 }
  0xcc   :  { %9198 = dma.done.wait [#allocation18], 528  }
  0xcd   :  { %9199 = vsyncadd [#allocation18], 4294966768  ;;  %v9219_v0 = vmov 0   ;;  %s10351_s25 = sld [smem:[#allocation28_spill]]  ;;  %v220_v2 = vld [vmem:[#allocation2] sm:$0xff]  ;;  %v221_v3 = vld [vmem:[#allocation2 + $0x8] sm:$0xff]  ;;  %v206_v19 = vlaneseq }
  0xce   :  { %8843 = vset.pattern.permute.xlu0 %v9219_v0  ;;  %v222_v4 = vld [vmem:[#allocation2 + $0x10] sm:$0xff]  ;;  %v223_v5 = vld [vmem:[#allocation2 + $0x18] sm:$0xff]  ;;  %v8114_v7 = vpack.c.bf16 %v221_v3, %v220_v2  ;;  %v224_v9 = vld [vmem:[#allocation2 + $0x20] sm:$0xff]  ;;  %v9220_v18 = vmov 0.0   ;;  %vm230_vm0 = vcmask 523264   ;;  %vm323_vm3 = vcmask 261120  }
  0xcf   :  { %v8118_v8 = vpack.c.bf16 %v223_v5, %v222_v4  ;;  %v225_v10 = vld [vmem:[#allocation2 + $0x28] sm:$0xff]  ;;  %v226_v12 = vld [vmem:[#allocation2 + $0x30] sm:$0xff]  ;;  %v227_v13 = vld [vmem:[#allocation2 + $0x38] sm:$0xff]  ;;  %v207_v20 = vand.u32 127, %v206_v19  ;;  %vm9221_vm4 = vmmov 0   ;;  %vm408_vm5 = vcmask 64512  }
  0xd0   :  { %8115 = vmatprep.subr.bf16.mxu0 %v8114_v7  ;;  %v8122_v11 = vpack.c.bf16 %v225_v10, %v224_v9  ;;  %v312_v14 = vld [vmem:[#allocation5] sm:$0xff]  ;;  %v313_v15 = vld [vmem:[#allocation5 + $0x8] sm:$0xff]  ;;  %v8126_v17 = vpack.c.bf16 %v227_v13, %v226_v12  ;;  %v314_v25 = vld [vmem:[#allocation5 + $0x10] sm:$0xff]  ;;  %s9223_s5 = smov 64   ;;  %s9224_s29 = smov 88   ;;  %vm1761_vm6 = vcmask 195584  }
  0xd1   :  { %8117 = vmatpush3.bf16.msra.mxu0 %v8114_v7  ;;  %v8130_v16 = vpack.c.bf16 %v313_v15, %v312_v14  ;;  %v315_v26 = vld [vmem:[#allocation5 + $0x18] sm:$0xff]  ;;  %v228_v28 = vld [vmem:[%s10330_s2] sm:$0xff]  ;;  %v229_v29 = vld [vmem:[%s10330_s2 + $0x8] sm:$0xff]  ;;  %s9222_s2 = smov 96   ;;  %s9225_s30 = smov 120   ;;  %vm1758_vm7 = vcmask 130048  }
  0xd2   :  { %8119 = vmatprep.subr.bf16.mxu0 %v8118_v8  ;;  %v8134_v27 = vpack.c.bf16 %v315_v26, %v314_v25  ;;  %v7059_v34 = vld [vmem:[#allocation7] ss:$0 sm:$0xff]  ;;  %s9226_s11 = smov 56   ;;  %s9227_s6 = smov 80  }
  0xd3   :  { %v204_v1 = vld [vmem:[%s10351_s25] sm:$0xff]  ;;  %v205_v6 = vld [vmem:[%s10351_s25 + $0x8] sm:$0xff]  ;;  %8131 = vmatprep.subr.bf16.mxu1 %v8130_v16  ;;  %s9228_s28 = smov 112   ;;  %s9229_s26 = smov 48  }
  0xd4   :  { %209 = vperm.xlu0 %8843, %v204_v1   ;;  %8133 = vmatpush3.bf16.msra.mxu1 %v8130_v16  ;;  %s9230_s18 = smov 72   ;;  %s9231_s9 = smov 104  }
  0xd5   :  { %8121 = vmatpush3.bf16.msra.mxu0 %v8118_v8  ;;  %8135 = vmatprep.subr.bf16.mxu1 %v8134_v27  ;;  %s9232_s0 = smov 40   ;;  %s9233_s1 = smov 24  }
  0xd6   :  { %8123 = vmatprep.subr.bf16.mxu0 %v8122_v11 }
  0xd8   :  { %212 = vperm.xlu0 %8843, %v205_v6   ;;  %8137 = vmatpush3.bf16.msra.mxu1 %v8134_v27 }
  0xd9   :  { %8125 = vmatpush3.bf16.msra.mxu0 %v8122_v11  ;;  %7910 = vmatprep.subr.mxu1 %v9220_v18 }
  0xda   :  { %8127 = vmatprep.subr.bf16.mxu0 %v8126_v17 }
  0xdd   :  { %8129 = vmatpush3.bf16.msra.mxu0 %v8126_v17 }
  0xde   :  { %7920 = vmatprep.subr.mxu0 %v9220_v18 }
 0x153   :  { %v210_v21 = vpop.permute.xlu0 %209 }
 0x154   :  { %vm214_vm1 = vcmp.eq.s32.totalorder %v207_v20, %v210_v21 }
 0x155   :  { %v7055_v22 = vsel %vm214_vm1, 1.0, %v9220_v18 }
 0x156   :  { %7896 = vmatprep.mubr.msk.f32.mxu0 %vm230_vm0, %v7055_v22 }
 0x157   :  { %v213_v23 = vpop.permute.xlu0 %212 }
 0x158   :  { %vm215_vm2 = vcmp.eq.s32.totalorder %v207_v20, %v213_v23 }
 0x159   :  { %v7056_v24 = vsel %vm215_vm2, 1.0, %v9220_v18 }
 0x15a   :  { %7897 = vmatmul.mubr.msk.f32.vlgmr.msra.gmra.mrb[0].mxu0 %vm230_vm0, %v7056_v24 }
 0x15b   :  { %7922 = vmatprep.mubr.msk.f32.mxu0 %vm9221_vm4, %v9220_v18 }
 0x22d   :  { %v7898_v30 = vpop.f32.mrb[0].mxu0 }
 0x22e   :  { %v303_v31 = vpop.f32.mrb[1].mxu0  ;;  %v9516_v33 = vadd.f32 %v7898_v30, %v229_v29 }
 0x22f   :  { %v9514_v32 = vadd.f32 %v303_v31, %v228_v28 }
 0x231   :  { %7907 = vmatprep.mubr.msk.f32.mxu1 %vm323_vm3, %v9514_v32 }
 0x232   :  { %7908 = vmatmul.mubr.msk.f32.vlgmr.msra.gmra.mrb[0].mxu1 %vm323_vm3, %v9516_v33 }
 0x233   :  { %7912 = vmatprep.mubr.msk.f32.mxu1 %vm9221_vm4, %v9220_v18 }
 0x305   :  { %v7909_v35 = vpop.f32.mrb[0].mxu1 }
 0x306   :  { %v396_v36 = vpop.f32.mrb[1].mxu1  ;;  %v9530_v38 = vadd.f32 %v7909_v35, %v7059_v34 }
 0x307   :  { %v9526_v37 = vadd.f32 %v7059_v34, %v396_v36 }
 0x309   :  { %406 = vrot.lane.b32.xlu1 %v9526_v37, %s9222_s2 }
 0x30d   :  { %484 = vrot.lane.b32.xlu1 %v9530_v38, %s9222_s2 }
 0x37b   :  { %v407_v39 = vpop.permute.xlu1 %406 }
 0x37c   :  { %7911 = vmatpush3.xpose.msk.msra.mxu1 %vm408_vm5, %v407_v39 }
 0x37d   :  { %7915 = vmatprep.subr.mxu1 %v9220_v18 }
 0x37f   :  { %7913 = vmatmul.mubr.msk.f32.vlgmr.msra.gmra.mrb[2].mxu1 %vm408_vm5, %v9526_v37  ;;  %v485_v40 = vpop.permute.xlu1 %484 }
 0x380   :  { %7916 = vmatpush3.xpose.msk.msra.mxu1 %vm408_vm5, %v485_v40  ;;  %7917 = vmatprep.mubr.msk.f32.mxu1 %vm9221_vm4, %v9220_v18 }
 0x381   :  { %7925 = vmatprep.subr.mxu1 %v9220_v18 }
 0x383   :  { %7918 = vmatmul.mubr.msk.f32.vlgmr.msra.gmra.mrb[4].mxu1 %vm408_vm5, %v9530_v38 }
 0x384   :  { %7927 = vmatprep.mubr.msk.f32.mxu1 %vm9221_vm4, %v9220_v18 }
 0x452   :  { %v479_v41 = vpop.f32.mrb[2].mxu1 }
 0x453   :  { %v560_v42 = vmul.f32 0.35355338, %v479_v41  ;;  %v7914_v43 = vpop.f32.mrb[3].mxu1 }
 0x455   :  { %v562_v44 = vsel %vm408_vm5, %v560_v42, -inf }
 0x456   :  { %563 = vmax.xlane.f32.xlu0 %v562_v44  ;;  %v556_v45 = vpop.f32.mrb[4].mxu1 }
 0x457   :  { %v561_v46 = vmul.f32 0.35355338, %v556_v45  ;;  %v7919_v47 = vpop.f32.mrb[5].mxu1 }
 0x459   :  { %v565_v48 = vsel %vm408_vm5, %v561_v46, -inf }
 0x45a   :  { %566 = vmax.xlane.f32.xlu1 %v565_v48 }
 0x46b   :  { %584 = vrot.lane.b32.xlu1 %v9526_v37, %s9223_s5 }
 0x46c   :  { %660 = vrot.lane.b32.xlu0 %v9530_v38, %s9223_s5 }
 0x46f   :  { %738 = vrot.lane.b32.xlu1 %v9526_v37, %s9224_s29 }
 0x473   :  { %816 = vrot.lane.b32.xlu1 %v9530_v38, %s9224_s29 }
 0x477   :  { %814 = vrot.lane.b32.xlu1 %v9530_v38, %s9225_s30 }
 0x4e3   :  { %v564_v49 = vpop.xlane.xlu0 %563 }
 0x4e4   :  { %v568_v50 = vsub.f32 %v560_v42, %v564_v49 }
 0x4e6   :  { %v570_v51 = vmul.f32 1.442695, %v568_v50 }
 0x4e7   :  { %v661_v52 = vpop.permute.xlu0 %660  ;;  %v567_v53 = vpop.xlane.xlu1 %566 }
 0x4e8   :  { %8844 = vpow2.f32 %v570_v51  ;;  %v569_v54 = vsub.f32 %v561_v46, %v567_v53  ;;  %7926 = vmatpush3.msra.mxu1 %v661_v52 }
 0x4e9   :  { %7935 = vmatprep.subr.mxu1 %v9220_v18 }
 0x4ea   :  { %v572_v55 = vmul.f32 1.442695, %v569_v54 }
 0x4eb   :  { %v585_v56 = vpop.permute.xlu1 %584 }
 0x4ec   :  { %8846 = vpow2.f32 %v572_v55  ;;  %7921 = vmatpush3.msra.mxu0 %v585_v56 }
 0x4ed   :  { %7930 = vmatprep.subr.mxu0 %v9220_v18 }
 0x4ef   :  { %v739_v63 = vpop.permute.xlu1 %738 }
 0x4f2   :  { %v8845_v57 = vpop.eup %8844 }
 0x4f3   :  { %v574_v58 = vsel %vm408_vm5, %v8845_v57, 0.0  ;;  %v817_v3 = vpop.permute.xlu1 %816 }
 0x4f4   :  { %575 = vadd.xlane.f32.xlu0 %v574_v58 }
 0x4f6   :  { %v8847_v59 = vpop.eup %8846 }
 0x4f7   :  { %v577_v60 = vsel %vm408_vm5, %v8847_v59, 0.0  ;;  %v815_v6 = vpop.permute.xlu1 %814 }
 0x4f8   :  { %578 = vadd.xlane.f32.xlu0 %v577_v60 }
 0x50e   :  { %736 = vrot.lane.b32.xlu0 %v9526_v37, %s9225_s30 }
 0x581   :  { %v576_v61 = vpop.xlane.xlu0 %575 }
 0x582   :  { %8848 = vrcp.f32 %v576_v61 }
 0x585   :  { %v579_v62 = vpop.xlane.xlu0 %578 }
 0x586   :  { %8850 = vrcp.f32 %v579_v62 }
 0x589   :  { %v737_v5 = vpop.permute.xlu0 %736 }
 0x58c   :  { %v8849_v0 = vpop.eup %8848 }
 0x58d   :  { %v582_v1 = vmul.f32 %v8849_v0, %v8845_v57 }
 0x58f   :  { %7923 = vmatmul.mubr.msk.f32.vlgmr.msra.gmra.mrb[2].mxu0 %vm408_vm5, %v582_v1 }
 0x590   :  { %v8851_v2 = vpop.eup %8850  ;;  %7931 = vmatpush3.xpose.msk.msra.mxu0 %vm408_vm5, %v739_v63  ;;  %7932 = vmatprep.mubr.msk.f32.mxu0 %vm9221_vm4, %v9220_v18 }
 0x591   :  { %v583_v4 = vmul.f32 %v8851_v2, %v8847_v59  ;;  %7940 = vmatprep.subr.mxu0 %v9220_v18 }
 0x593   :  { %7928 = vmatmul.mubr.msk.f32.vlgmr.msra.gmra.mrb[6].mxu1 %vm408_vm5, %v583_v4  ;;  %7933 = vmatmul.mubr.msk.f32.vlgmr.msra.gmra.mrb[4].mxu0 %vm408_vm5, %v737_v5 }
 0x594   :  { %7936 = vmatpush3.xpose.msk.msra.mxu1 %vm408_vm5, %v817_v3  ;;  %7937 = vmatprep.mubr.msk.f32.mxu1 %vm9221_vm4, %v9220_v18 }
 0x595   :  { %7945 = vmatprep.subr.mxu1 %v9220_v18  ;;  %7942 = vmatprep.mubr.msk.f32.mxu0 %vm9221_vm4, %v9220_v18 }
 0x597   :  { %7938 = vmatmul.mubr.msk.f32.vlgmr.msra.gmra.mrb[8].mxu1 %vm408_vm5, %v815_v6 }
 0x598   :  { %7947 = vmatprep.mubr.msk.f32.mxu1 %vm9221_vm4, %v9220_v18 }
 0x662   :  { %v9580_v7 = vpop.f32.mrb[2].mxu0 }
 0x663   :  { %v7924_v8 = vpop.f32.mrb[3].mxu0 }
 0x666   :  { %v9582_v9 = vpop.f32.mrb[6].mxu1  ;;  %v810_v10 = vpop.f32.mrb[4].mxu0 }
 0x667   :  { %v892_v11 = vmul.f32 0.35355338, %v810_v10  ;;  %v7929_v12 = vpop.f32.mrb[7].mxu1  ;;  %v7934_v13 = vpop.f32.mrb[5].mxu0 }
 0x669   :  { %v894_v14 = vsel %vm408_vm5, %v892_v11, -inf }
 0x66a   :  { %895 = vmax.xlane.f32.xlu0 %v894_v14  ;;  %v888_v15 = vpop.f32.mrb[8].mxu1 }
 0x66b   :  { %v893_v16 = vmul.f32 0.35355338, %v888_v15  ;;  %v7939_v17 = vpop.f32.mrb[9].mxu1 }
 0x66d   :  { %v897_v20 = vsel %vm408_vm5, %v893_v16, -inf }
 0x66e   :  { %898 = vmax.xlane.f32.xlu1 %v897_v20 }
 0x67f   :  { %916 = vrot.lane.b32.xlu1 %v9526_v37, %s9226_s11 }
 0x680   :  { %992 = vrot.lane.b32.xlu0 %v9530_v38, %s9226_s11 }
 0x683   :  { %1070 = vrot.lane.b32.xlu1 %v9526_v37, %s9227_s6 }
 0x687   :  { %1148 = vrot.lane.b32.xlu1 %v9530_v38, %s9227_s6 }
 0x68b   :  { %1146 = vrot.lane.b32.xlu1 %v9530_v38, %s9228_s28 }
 0x6f7   :  { %v896_v21 = vpop.xlane.xlu0 %895 }
 0x6f8   :  { %v900_v22 = vsub.f32 %v892_v11, %v896_v21 }
 0x6fa   :  { %v902_v23 = vmul.f32 1.442695, %v900_v22 }
 0x6fb   :  { %v993_v24 = vpop.permute.xlu0 %992  ;;  %v899_v25 = vpop.xlane.xlu1 %898 }
 0x6fc   :  { %8852 = vpow2.f32 %v902_v23  ;;  %v901_v26 = vsub.f32 %v893_v16, %v899_v25  ;;  %7946 = vmatpush3.msra.mxu1 %v993_v24 }
 0x6fd   :  { %7955 = vmatprep.subr.mxu1 %v9220_v18 }
 0x6fe   :  { %v904_v27 = vmul.f32 1.442695, %v901_v26 }
 0x6ff   :  { %v917_v28 = vpop.permute.xlu1 %916 }
 0x700   :  { %8854 = vpow2.f32 %v904_v27  ;;  %7941 = vmatpush3.msra.mxu0 %v917_v28 }
 0x701   :  { %7950 = vmatprep.subr.mxu0 %v9220_v18 }
 0x703   :  { %v1071_v39 = vpop.permute.xlu1 %1070 }
 0x706   :  { %v8853_v29 = vpop.eup %8852 }
 0x707   :  { %v906_v30 = vsel %vm408_vm5, %v8853_v29, 0.0  ;;  %v1149_v43 = vpop.permute.xlu1 %1148 }
 0x708   :  { %907 = vadd.xlane.f32.xlu0 %v906_v30 }
 0x70a   :  { %v8855_v31 = vpop.eup %8854 }
 0x70b   :  { %v909_v34 = vsel %vm408_vm5, %v8855_v31, 0.0  ;;  %v1147_v46 = vpop.permute.xlu1 %1146 }
 0x70c   :  { %910 = vadd.xlane.f32.xlu0 %v909_v34 }
 0x722   :  { %1068 = vrot.lane.b32.xlu0 %v9526_v37, %s9228_s28 }
 0x795   :  { %v908_v35 = vpop.xlane.xlu0 %907 }
 0x796   :  { %8856 = vrcp.f32 %v908_v35 }
 0x799   :  { %v911_v36 = vpop.xlane.xlu0 %910 }
 0x79a   :  { %8858 = vrcp.f32 %v911_v36 }
 0x79d   :  { %v1069_v45 = vpop.permute.xlu0 %1068 }
 0x7a0   :  { %v8857_v40 = vpop.eup %8856 }
 0x7a1   :  { %v914_v41 = vmul.f32 %v8857_v40, %v8853_v29 }
 0x7a3   :  { %7943 = vmatmul.mubr.msk.f32.vlgmr.msra.gmra.mrb[6].mxu0 %vm408_vm5, %v914_v41 }
 0x7a4   :  { %v8859_v42 = vpop.eup %8858  ;;  %7951 = vmatpush3.xpose.msk.msra.mxu0 %vm408_vm5, %v1071_v39  ;;  %7952 = vmatprep.mubr.msk.f32.mxu0 %vm9221_vm4, %v9220_v18 }
 0x7a5   :  { %v915_v44 = vmul.f32 %v8859_v42, %v8855_v31  ;;  %7960 = vmatprep.subr.mxu0 %v9220_v18 }
 0x7a7   :  { %7948 = vmatmul.mubr.msk.f32.vlgmr.msra.gmra.mrb[10].mxu1 %vm408_vm5, %v915_v44  ;;  %7953 = vmatmul.mubr.msk.f32.vlgmr.msra.gmra.mrb[8].mxu0 %vm408_vm5, %v1069_v45 }
 0x7a8   :  { %7956 = vmatpush3.xpose.msk.msra.mxu1 %vm408_vm5, %v1149_v43  ;;  %7957 = vmatprep.mubr.msk.f32.mxu1 %vm9221_vm4, %v9220_v18 }
 0x7a9   :  { %7965 = vmatprep.subr.mxu1 %v9220_v18  ;;  %7962 = vmatprep.mubr.msk.f32.mxu0 %vm9221_vm4, %v9220_v18 }
 0x7ab   :  { %7958 = vmatmul.mubr.msk.f32.vlgmr.msra.gmra.mrb[12].mxu1 %vm408_vm5, %v1147_v46 }
 0x7ac   :  { %7967 = vmatprep.mubr.msk.f32.mxu1 %vm9221_vm4, %v9220_v18 }
 0x876   :  { %v9618_v47 = vpop.f32.mrb[6].mxu0 }
 0x877   :  { %v7944_v48 = vpop.f32.mrb[7].mxu0 }
 0x87a   :  { %v9620_v49 = vpop.f32.mrb[10].mxu1  ;;  %v1142_v50 = vpop.f32.mrb[8].mxu0 }
 0x87b   :  { %v1224_v51 = vmul.f32 0.35355338, %v1142_v50  ;;  %v7949_v52 = vpop.f32.mrb[11].mxu1  ;;  %v7954_v53 = vpop.f32.mrb[9].mxu0 }
 0x87d   :  { %v1226_v54 = vsel %vm408_vm5, %v1224_v51, -inf }
 0x87e   :  { %1227 = vmax.xlane.f32.xlu0 %v1226_v54  ;;  %v1220_v55 = vpop.f32.mrb[12].mxu1  ;;  %v1764_v54 = vld [vmem:[#allocation8] sm:$0xff] }
 0x87f   :  { %v1225_v56 = vmul.f32 0.35355338, %v1220_v55  ;;  %v7959_v57 = vpop.f32.mrb[13].mxu1 }
 0x880   :  { %v1767_v57 = vld [vmem:[#allocation8 + $0x18] sm:$0xff] }
 0x881   :  { %v1229_v58 = vsel %vm408_vm5, %v1225_v56, -inf }
 0x882   :  { %1230 = vmax.xlane.f32.xlu1 %v1229_v58 }
 0x893   :  { %1248 = vrot.lane.b32.xlu1 %v9526_v37, %s9229_s26 }
 0x894   :  { %1324 = vrot.lane.b32.xlu0 %v9530_v38, %s9229_s26 }
 0x897   :  { %1402 = vrot.lane.b32.xlu1 %v9526_v37, %s9230_s18 }
 0x89b   :  { %1480 = vrot.lane.b32.xlu1 %v9530_v38, %s9230_s18 }
 0x89f   :  { %1478 = vrot.lane.b32.xlu1 %v9530_v38, %s9231_s9 }
 0x90b   :  { %v1228_v59 = vpop.xlane.xlu0 %1227 }
 0x90c   :  { %v1232_v60 = vsub.f32 %v1224_v51, %v1228_v59 }
 0x90e   :  { %v1234_v61 = vmul.f32 1.442695, %v1232_v60 }
 0x90f   :  { %v1325_v62 = vpop.permute.xlu0 %1324  ;;  %v1231_v63 = vpop.xlane.xlu1 %1230 }
 0x910   :  { %8860 = vpow2.f32 %v1234_v61  ;;  %v1233_v0 = vsub.f32 %v1225_v56, %v1231_v63  ;;  %7966 = vmatpush3.msra.mxu1 %v1325_v62  ;;  %v1766_v56 = vld [vmem:[#allocation8 + $0x10] sm:$0xff] }
 0x911   :  { %7975 = vmatprep.subr.mxu1 %v9220_v18  ;;  %v8142_v58 = vpack.c.bf16 %v1767_v57, %v1766_v56 }
 0x912   :  { %v1236_v1 = vmul.f32 1.442695, %v1233_v0 }
 0x913   :  { %v1249_v2 = vpop.permute.xlu1 %1248 }
 0x914   :  { %8862 = vpow2.f32 %v1236_v1  ;;  %7961 = vmatpush3.msra.mxu0 %v1249_v2 }
 0x915   :  { %7970 = vmatprep.subr.mxu0 %v9220_v18 }
 0x917   :  { %v1403_v11 = vpop.permute.xlu1 %1402 }
 0x91a   :  { %v8861_v3 = vpop.eup %8860 }
 0x91b   :  { %v1238_v4 = vsel %vm408_vm5, %v8861_v3, 0.0  ;;  %v1481_v15 = vpop.permute.xlu1 %1480 }
 0x91c   :  { %1239 = vadd.xlane.f32.xlu0 %v1238_v4 }
 0x91e   :  { %v8863_v5 = vpop.eup %8862 }
 0x91f   :  { %v1241_v6 = vsel %vm408_vm5, %v8863_v5, 0.0  ;;  %v1479_v20 = vpop.permute.xlu1 %1478 }
 0x920   :  { %1242 = vadd.xlane.f32.xlu0 %v1241_v6 }
 0x936   :  { %1400 = vrot.lane.b32.xlu0 %v9526_v37, %s9231_s9 }
 0x9a9   :  { %v1240_v8 = vpop.xlane.xlu0 %1239 }
 0x9aa   :  { %8864 = vrcp.f32 %v1240_v8 }
 0x9ad   :  { %v1243_v10 = vpop.xlane.xlu0 %1242 }
 0x9ae   :  { %8866 = vrcp.f32 %v1243_v10 }
 0x9b1   :  { %v1401_v17 = vpop.permute.xlu0 %1400 }
 0x9b4   :  { %v8865_v12 = vpop.eup %8864 }
 0x9b5   :  { %v1246_v13 = vmul.f32 %v8865_v12, %v8861_v3 }
 0x9b7   :  { %7963 = vmatmul.mubr.msk.f32.vlgmr.msra.gmra.mrb[10].mxu0 %vm408_vm5, %v1246_v13 }
 0x9b8   :  { %v8867_v14 = vpop.eup %8866  ;;  %7971 = vmatpush3.xpose.msk.msra.mxu0 %vm408_vm5, %v1403_v11  ;;  %7972 = vmatprep.mubr.msk.f32.mxu0 %vm9221_vm4, %v9220_v18 }
 0x9b9   :  { %v1247_v16 = vmul.f32 %v8867_v14, %v8863_v5  ;;  %7980 = vmatprep.subr.mxu0 %v9220_v18 }
 0x9bb   :  { %7968 = vmatmul.mubr.msk.f32.vlgmr.msra.gmra.mrb[14].mxu1 %vm408_vm5, %v1247_v16  ;;  %7973 = vmatmul.mubr.msk.f32.vlgmr.msra.gmra.mrb[12].mxu0 %vm408_vm5, %v1401_v17 }
 0x9bc   :  { %7976 = vmatpush3.xpose.msk.msra.mxu1 %vm408_vm5, %v1481_v15  ;;  %7977 = vmatprep.mubr.msk.f32.mxu1 %vm9221_vm4, %v9220_v18 }
 0x9bd   :  { %7985 = vmatprep.subr.mxu1 %v9220_v18  ;;  %7982 = vmatprep.mubr.msk.f32.mxu0 %vm9221_vm4, %v9220_v18 }
 0x9bf   :  { %7978 = vmatmul.mubr.msk.f32.vlgmr.msra.gmra.mrb[16].mxu1 %vm408_vm5, %v1479_v20 }
 0x9c0   :  { %7987 = vmatprep.mubr.msk.f32.mxu1 %vm9221_vm4, %v9220_v18 }
 0xa8a   :  { %v1320_v21 = vpop.f32.mrb[10].mxu0 }
 0xa8b   :  { %v7964_v22 = vpop.f32.mrb[11].mxu0 }
 0xa8e   :  { %v1396_v23 = vpop.f32.mrb[14].mxu1  ;;  %v1474_v24 = vpop.f32.mrb[12].mxu0 }
 0xa8f   :  { %v1556_v25 = vmul.f32 0.35355338, %v1474_v24  ;;  %v7969_v26 = vpop.f32.mrb[15].mxu1  ;;  %v7974_v27 = vpop.f32.mrb[13].mxu0  ;;  %v1908_v24 = vld [vmem:[#allocation11 + $0x8] sm:$0xff] }
 0xa90   :  { %v1910_v26 = vld [vmem:[#allocation11 + $0x18] sm:$0xff] }
 0xa91   :  { %v1558_v28 = vsel %vm408_vm5, %v1556_v25, -inf }
 0xa92   :  { %1559 = vmax.xlane.f32.xlu0 %v1558_v28  ;;  %v1552_v29 = vpop.f32.mrb[16].mxu1  ;;  %v1926_v28 = vld [vmem:[#allocation11 + $0x98] sm:$0xff] }
 0xa93   :  { %v1557_v30 = vmul.f32 0.35355338, %v1552_v29  ;;  %v7979_v31 = vpop.f32.mrb[17].mxu1  ;;  %v1907_v29 = vld [vmem:[#allocation11] sm:$0xff] }
 0xa94   :  { %v8154_v31 = vpack.c.bf16 %v1926_v28, %v1910_v26  ;;  %v1959_v26 = vld [vmem:[#allocation11 + $0x1a0] sm:$0xff]  ;;  %v1961_v28 = vld [vmem:[#allocation11 + $0x1b0] sm:$0xff] }
 0xa95   :  { %v1561_v34 = vsel %vm408_vm5, %v1557_v30, -inf }
 0xa96   :  { %1562 = vmax.xlane.f32.xlu1 %v1561_v34 }
 0xaa7   :  { %1580 = vrot.lane.b32.xlu1 %v9526_v37, %s9232_s0 }
 0xaab   :  { %1734 = vrot.lane.b32.xlu1 %v9618_v47, %s9205_s22 }
 0xaaf   :  { %1736 = vrot.lane.b32.xlu1 %v9620_v49, %s9205_s22 }
 0xab3   :  { %1744 = vrot.lane.b32.xlu1 %v1396_v23, %s9212_s3 }
 0xb1f   :  { %v1560_v35 = vpop.xlane.xlu0 %1559 }
 0xb20   :  { %v1564_v36 = vsub.f32 %v1556_v25, %v1560_v35  ;;  %v1924_v25 = vld [vmem:[#allocation11 + $0x88] sm:$0xff]  ;;  %v1909_v35 = vld [vmem:[#allocation11 + $0x10] sm:$0xff] }
 0xb21   :  { %v8146_v27 = vpack.c.bf16 %v1924_v25, %v1908_v24 }
 0xb22   :  { %v1566_v39 = vmul.f32 1.442695, %v1564_v36  ;;  %v1925_v36 = vld [vmem:[#allocation11 + $0x90] sm:$0xff] }
 0xb23   :  { %v1563_v40 = vpop.xlane.xlu1 %1562 }
 0xb24   :  { %8868 = vpow2.f32 %v1566_v39  ;;  %v1565_v41 = vsub.f32 %v1557_v30, %v1563_v40  ;;  %v1923_v30 = vld [vmem:[#allocation11 + $0x80] sm:$0xff]  ;;  %v8156_v39 = vpack.c.bf16 %v1925_v36, %v1909_v35  ;;  %v1940_v40 = vld [vmem:[#allocation11 + $0x108] sm:$0xff] }
 0xb25   :  { %v8148_v34 = vpack.c.bf16 %v1923_v30, %v1907_v29  ;;  %v1916_v35 = vld [vmem:[#allocation11 + $0x48] sm:$0xff] }
 0xb26   :  { %v1568_v42 = vmul.f32 1.442695, %v1565_v41  ;;  %v1956_v41 = vld [vmem:[#allocation11 + $0x188] sm:$0xff] }
 0xb27   :  { %v1581_v43 = vpop.permute.xlu1 %1580 }
 0xb28   :  { %8870 = vpow2.f32 %v1568_v42  ;;  %7981 = vmatpush3.msra.mxu0 %v1581_v43  ;;  %v1942_v42 = vld [vmem:[#allocation11 + $0x118] sm:$0xff]  ;;  %v8150_v43 = vpack.c.bf16 %v1956_v41, %v1940_v40  ;;  %v1932_v40 = vld [vmem:[#allocation11 + $0xc8] sm:$0xff] }
 0xb29   :  { %v1934_v41 = vld [vmem:[#allocation11 + $0xd8] sm:$0xff] }
 0xb2b   :  { %v1735_v63 = vpop.permute.xlu1 %1734 }
 0xb2c   :  { %v1756_v2 = vsel %vm408_vm5, %v9580_v7, %v1735_v63  ;;  %v7086_v7 = vld [vmem:[#allocation10] ss:$0 sm:$0xff] }
 0xb2e   :  { %v8869_v44 = vpop.eup %8868 }
 0xb2f   :  { %v1570_v37 = vsel %vm408_vm5, %v8869_v44, 0.0  ;;  %v1737_v0 = vpop.permute.xlu1 %1736 }
 0xb30   :  { %1571 = vadd.xlane.f32.xlu0 %v1570_v37  ;;  %v1757_v8 = vsel %vm408_vm5, %v9582_v9, %v1737_v0  ;;  %v1939_v37 = vld [vmem:[#allocation11 + $0x100] sm:$0xff] }
 0xb32   :  { %v8871_v45 = vpop.eup %8870 }
 0xb33   :  { %v1573_v46 = vsel %vm408_vm5, %v8871_v45, 0.0  ;;  %v1745_v3 = vpop.permute.xlu1 %1744 }
 0xb34   :  { %1574 = vadd.xlane.f32.xlu0 %v1573_v46  ;;  %v1760_v10 = vsel %vm1758_vm7, %v1757_v8, %v1745_v3 }
 0xb4a   :  { %1656 = vrot.lane.b32.xlu0 %v9530_v38, %s9232_s0  ;;  %v1765_v38 = vld [vmem:[#allocation8 + $0x8] sm:$0xff] }
 0xb4b   :  { %v8138_v55 = vpack.c.bf16 %v1765_v38, %v1764_v54  ;;  %v1930_v38 = vld [vmem:[#allocation11 + $0xb8] sm:$0xff] }
 0xb4d   :  { %8139 = vmatprep.subr.bf16.mxu0 %v8138_v55 }
 0xb4e   :  { %1742 = vrot.lane.b32.xlu0 %v1320_v21, %s9212_s3 }
 0xbbd   :  { %v1572_v47 = vpop.xlane.xlu0 %1571 }
 0xbbe   :  { %8872 = vrcp.f32 %v1572_v47 }
 0xbc1   :  { %v1575_v48 = vpop.xlane.xlu0 %1574 }
 0xbc2   :  { %8874 = vrcp.f32 %v1575_v48  ;;  %v1941_v48 = vld [vmem:[#allocation11 + $0x110] sm:$0xff] }
 0xbc5   :  { %v1657_v49 = vpop.permute.xlu0 %1656 }
 0xbc6   :  { %7986 = vmatpush3.msra.mxu1 %v1657_v49  ;;  %v1957_v49 = vld [vmem:[#allocation11 + $0x190] sm:$0xff] }
 0xbc7   :  { %8147 = vmatprep.subr.bf16.mxu1 %v8146_v27  ;;  %v1945_v27 = vld [vmem:[#allocation11 + $0x130] sm:$0xff] }
 0xbc8   :  { %v8873_v50 = vpop.eup %8872 }
 0xbc9   :  { %v1578_v51 = vmul.f32 %v8873_v50, %v8869_v44  ;;  %v1743_v1 = vpop.permute.xlu0 %1742  ;;  %v1958_v44 = vld [vmem:[#allocation11 + $0x198] sm:$0xff]  ;;  %v8160_v50 = vpack.c.bf16 %v1957_v49, %v1941_v48  ;;  %v1933_v48 = vld [vmem:[#allocation11 + $0xd0] sm:$0xff]  ;;  %v1948_v49 = vld [vmem:[#allocation11 + $0x148] sm:$0xff] }
 0xbca   :  { %v1759_v4 = vsel %vm1758_vm7, %v1756_v2, %v1743_v1  ;;  %v8158_v46 = vpack.c.bf16 %v1958_v44, %v1942_v42 }
 0xbcb   :  { %7983 = vmatmul.mubr.msk.f32.vlgmr.msra.gmra.mrb[14].mxu0 %vm408_vm5, %v1578_v51  ;;  %v1912_v51 = vld [vmem:[#allocation11 + $0x28] sm:$0xff] }
 0xbcc   :  { %v8875_v52 = vpop.eup %8874  ;;  %8141 = vmatpush3.bf16.msra.mxu0 %v8138_v55 }
 0xbcd   :  { %v1579_v53 = vmul.f32 %v8875_v52, %v8871_v45  ;;  %8143 = vmatprep.subr.bf16.mxu0 %v8142_v58  ;;  %v1955_v45 = vld [vmem:[#allocation11 + $0x180] sm:$0xff]  ;;  %v1928_v52 = vld [vmem:[#allocation11 + $0xa8] sm:$0xff] }
 0xbce   :  { %v8152_v47 = vpack.c.bf16 %v1955_v45, %v1939_v37  ;;  %v8162_v54 = vpack.c.bf16 %v1928_v52, %v1912_v51  ;;  %v8178_v37 = vpack.c.bf16 %v1932_v40, %v1916_v35  ;;  %v1950_v51 = vld [vmem:[#allocation11 + $0x158] sm:$0xff]  ;;  %v2742_v35 = vld [vmem:[#allocation14 + $0x108] sm:$0xff]  ;;  %v2759_v40 = vld [vmem:[#allocation14 + $0x190] sm:$0xff] }
 0xbcf   :  { %7988 = vmatmul.mubr.msk.f32.vlgmr.msra.gmra.mrb[18].mxu1 %vm408_vm5, %v1579_v53  ;;  %v1914_v53 = vld [vmem:[#allocation11 + $0x38] sm:$0xff] }
 0xbd0   :  { %2125 = vmatprep.mubr.f32.mxu1 %v9220_v18  ;;  %8145 = vmatpush3.bf16.msra.mxu0 %v8142_v58  ;;  %v8170_v55 = vpack.c.bf16 %v1930_v38, %v1914_v53  ;;  %v1966_v52 = vld [vmem:[#allocation11 + $0x1d8] sm:$0xff]  ;;  %v1947_v38 = vld [vmem:[#allocation11 + $0x140] sm:$0xff] }
 0xbd1   :  { %8155 = vmatprep.subr.bf16.mxu0 %v8154_v31  ;;  %8149 = vmatpush1.bf16.msra.mxu1 %v8148_v34 }
 0xbd2   :  { %8151 = vmatprep.subr.bf16.mxu1 %v8150_v43  ;;  %v1915_v43 = vld [vmem:[#allocation11 + $0x40] sm:$0xff] }
 0xbd5   :  { %8153 = vmatpush1.bf16.msra.mxu1 %v8152_v47  ;;  %v1917_v47 = vld [vmem:[#allocation11 + $0x50] sm:$0xff] }
 0xbd6   :  { %8163 = vmatprep.subr.bf16.mxu1 %v8162_v54  ;;  %v8188_v54 = vpack.c.bf16 %v1933_v48, %v1917_v47  ;;  %v2743_v47 = vld [vmem:[#allocation14 + $0x110] sm:$0xff]  ;;  %v2744_v48 = vld [vmem:[#allocation14 + $0x118] sm:$0xff] }
 0xc9e   :  { %v1652_v59 = vpop.f32.mrb[14].mxu0 }
 0xc9f   :  { %1750 = vrot.lane.b32.xlu0 %v1652_v59, %s9233_s1  ;;  %v7984_v60 = vpop.f32.mrb[15].mxu0 }
 0xca2   :  { %v1728_v61 = vpop.f32.mrb[18].mxu1 }
 0xca3   :  { %1752 = vrot.lane.b32.xlu1 %v1728_v61, %s9233_s1  ;;  %v7989_v62 = vpop.f32.mrb[19].mxu1 }
 0xd11   :  { %v1751_v5 = vpop.permute.xlu0 %1750 }
 0xd12   :  { %v1762_v6 = vsel %vm1761_vm6, %v1759_v4, %v1751_v5 }
 0xd13   :  { %7998 = vmatprep.mubr.msk.f32.mxu0 %vm323_vm3, %v1762_v6 }
 0xd15   :  { %v1753_v11 = vpop.permute.xlu1 %1752 }
 0xd16   :  { %v1763_v12 = vsel %vm1761_vm6, %v1760_v10, %v1753_v11  ;;  %v7089_v10 = vld [vmem:[%s10335_s7] ss:$0 sm:$0xff]  ;;  %v1911_v11 = vld [vmem:[#allocation11 + $0x20] sm:$0xff] }
 0xd17   :  { %7999 = vmatmul.mubr.msk.f32.vlgmr.msra.gmra.mrb[16].mxu0 %vm323_vm3, %v1763_v12 }
 0xd18   :  { %2202 = vmatprep.mubr.f32.mxu0 %v9220_v18  ;;  %8157 = vmatpush1.bf16.msra.mxu0 %v8156_v39  ;;  %v8176_v39 = vpack.c.bf16 %v1961_v28, %v1945_v27  ;;  %v2709_v28 = vld [vmem:[#allocation14] sm:$0xff] }
 0xd19   :  { %8159 = vmatprep.subr.bf16.mxu0 %v8158_v46  ;;  %v1931_v46 = vld [vmem:[#allocation11 + $0xc0] sm:$0xff] }
 0xd1a   :  { %v8180_v53 = vpack.c.bf16 %v1931_v46, %v1915_v43  ;;  %v2711_v43 = vld [vmem:[#allocation14 + $0x10] sm:$0xff] }
 0xd1c   :  { %8161 = vmatpush1.bf16.msra.mxu0 %v8160_v50  ;;  %v1964_v50 = vld [vmem:[#allocation11 + $0x1c8] sm:$0xff] }
 0xd1d   :  { %8171 = vmatprep.subr.bf16.mxu0 %v8170_v55  ;;  %v1963_v55 = vld [vmem:[#allocation11 + $0x1c0] sm:$0xff] }
 0xdea   :  { %v8000_v13 = vpop.f32.mrb[16].mxu0 }
 0xdeb   :  { %v1847_v14 = vpop.f32.mrb[17].mxu0  ;;  %v1853_v15 = vadd.f32 %v8000_v13, %v7086_v7  ;;  %v1913_v13 = vld [vmem:[#allocation11 + $0x30] sm:$0xff] }
 0xdec   :  { %v1848_v16 = vadd.f32 %v7086_v7, %v1847_v14  ;;  %v1927_v7 = vld [vmem:[#allocation11 + $0xa0] sm:$0xff]  ;;  %v1929_v14 = vld [vmem:[#allocation11 + $0xb0] sm:$0xff] }
 0xded   :  { %v9690_v20 = vadd.f32 %v1853_v15, %v9516_v33  ;;  %v7090_v15 = vld [vmem:[%s10336_s8] ss:$0 sm:$0xff] }
 0xdee   :  { %v9687_v17 = vadd.f32 %v1848_v16, %v9514_v32  ;;  %v1944_v16 = vld [vmem:[#allocation11 + $0x128] sm:$0xff] }
 0xdef   :  { %v1865_v23 = vsel %vm323_vm3, %v9690_v20, 0.0  ;;  %v1861_v32 = vmul.f32 %v9690_v20, %v9690_v20 }
 0xdf0   :  { %v1862_v9 = vsel %vm323_vm3, %v9687_v17, 0.0  ;;  %v1860_v21 = vmul.f32 %v9687_v17, %v9687_v17 }
 0xdf1   :  { %1863 = vadd.xlane.f32.xlu0 %v1862_v9  ;;  %v1871_v33 = vsel %vm323_vm3, %v1861_v32, 0.0  ;;  %v8172_v32 = vpack.c.bf16 %v1929_v14, %v1913_v13 }
 0xdf2   :  { %v1868_v22 = vsel %vm323_vm3, %v1860_v21, 0.0  ;;  %v1960_v21 = vld [vmem:[#allocation11 + $0x1a8] sm:$0xff] }
 0xdf3   :  { %1869 = vadd.xlane.f32.xlu1 %v1868_v22  ;;  %v1946_v22 = vld [vmem:[#allocation11 + $0x138] sm:$0xff]  ;;  %v8166_v30 = vpack.c.bf16 %v1960_v21, %v1944_v16  ;;  %v1967_v16 = vld [vmem:[#allocation11 + $0x1e0] sm:$0xff]  ;;  %v1969_v21 = vld [vmem:[#allocation11 + $0x1f0] sm:$0xff] }
 0xdf5   :  { %1866 = vadd.xlane.f32.xlu0 %v1865_v23  ;;  %v1962_v23 = vld [vmem:[#allocation11 + $0x1b8] sm:$0xff] }
 0xdf6   :  { %v8174_v31 = vpack.c.bf16 %v1962_v23, %v1946_v22 }
 0xdf9   :  { %1872 = vadd.xlane.f32.xlu0 %v1871_v33  ;;  %v1943_v33 = vld [vmem:[#allocation11 + $0x120] sm:$0xff] }
 0xdfa   :  { %v8168_v36 = vpack.c.bf16 %v1959_v26, %v1943_v33  ;;  %v2757_v33 = vld [vmem:[#allocation14 + $0x180] sm:$0xff] }
 0xe7e   :  { %v1864_v56 = vpop.xlane.xlu0 %1863 }
 0xe7f   :  { %v1875_v57 = vmul.f32 0.03125, %v1864_v56  ;;  %v1949_v56 = vld [vmem:[#allocation11 + $0x150] sm:$0xff] }
 0xe80   :  { %v1870_v58 = vpop.xlane.xlu1 %1869 }
 0xe81   :  { %v1879_v59 = vmul.f32 %v1875_v57, %v1875_v57  ;;  %v1877_v60 = vmul.f32 0.03125, %v1870_v58  ;;  %v1883_v6 = vsub.f32 %v9687_v17, %v1875_v57  ;;  %v8164_v17 = vpack.c.bf16 %v1927_v7, %v1911_v11  ;;  %v1965_v57 = vld [vmem:[#allocation11 + $0x1d0] sm:$0xff]  ;;  %v1968_v11 = vld [vmem:[#allocation11 + $0x1e8] sm:$0xff]  ;;  %v1970_v7 = vld [vmem:[#allocation11 + $0x1f8] sm:$0xff] }
 0xe82   :  { %v1867_v61 = vpop.xlane.xlu0 %1866  ;;  %v8182_v58 = vpack.c.bf16 %v1964_v50, %v1948_v49  ;;  %v2729_v49 = vld [vmem:[#allocation14 + $0xa0] sm:$0xff]  ;;  %v2730_v50 = vld [vmem:[#allocation14 + $0xa8] sm:$0xff] }
 0xe83   :  { %v1881_v62 = vsub.f32 %v1877_v60, %v1879_v59  ;;  %v1876_v63 = vmul.f32 0.03125, %v1867_v61  ;;  %v8190_v59 = vpack.c.bf16 %v1966_v52, %v1950_v51  ;;  %v1920_v60 = vld [vmem:[#allocation11 + $0x68] sm:$0xff]  ;;  %v2761_v51 = vld [vmem:[#allocation14 + $0x1a0] sm:$0xff] }
 0xe84   :  { %v1936_v61 = vld [vmem:[#allocation11 + $0xe8] sm:$0xff] }
 0xe85   :  { %v1885_v0 = vadd.f32 1e-05, %v1881_v62  ;;  %v1880_v2 = vmul.f32 %v1876_v63, %v1876_v63  ;;  %v1884_v25 = vsub.f32 %v9690_v20, %v1876_v63  ;;  %v1918_v20 = vld [vmem:[#allocation11 + $0x58] sm:$0xff]  ;;  %v2762_v52 = vld [vmem:[#allocation14 + $0x1a8] sm:$0xff] }
 0xe86   :  { %v1873_v1 = vpop.xlane.xlu0 %1872  ;;  %v8186_v45 = vpack.c.bf16 %v1934_v41, %v1918_v20  ;;  %v1922_v62 = vld [vmem:[#allocation11 + $0x78] sm:$0xff] }
 0xe87   :  { %8876 = vrsqrt.f32 %v1885_v0  ;;  %v1878_v3 = vmul.f32 0.03125, %v1873_v1  ;;  %v1938_v63 = vld [vmem:[#allocation11 + $0xf8] sm:$0xff]  ;;  %v8184_v0 = vpack.c.bf16 %v1963_v55, %v1947_v38  ;;  %v8192_v1 = vpack.c.bf16 %v1965_v57, %v1949_v56  ;;  %v2713_v38 = vld [vmem:[#allocation14 + $0x20] sm:$0xff]  ;;  %v2714_v55 = vld [vmem:[#allocation14 + $0x28] sm:$0xff] }
 0xe88   :  { %v2760_v20 = vld [vmem:[#allocation14 + $0x198] sm:$0xff]  ;;  %v8218_v56 = vpack.c.bf16 %v2730_v50, %v2729_v49  ;;  %v8250_v57 = vpack.c.bf16 %v2762_v52, %v2761_v51  ;;  %v2739_v51 = vld [vmem:[#allocation14 + $0xf0] sm:$0xff] }
 0xe89   :  { %v1882_v4 = vsub.f32 %v1878_v3, %v1880_v2  ;;  %v1919_v2 = vld [vmem:[#allocation11 + $0x60] sm:$0xff]  ;;  %v8246_v46 = vpack.c.bf16 %v2760_v20, %v2759_v40  ;;  %v2770_v20 = vld [vmem:[#allocation14 + $0x1e8] sm:$0xff]  ;;  %v2740_v52 = vld [vmem:[#allocation14 + $0xf8] sm:$0xff] }
 0xe8a   :  { %v1935_v3 = vld [vmem:[#allocation11 + $0xe0] sm:$0xff] }
 0xe8b   :  { %v1886_v5 = vadd.f32 1e-05, %v1882_v4  ;;  %v1921_v4 = vld [vmem:[#allocation11 + $0x70] sm:$0xff]  ;;  %v8196_v13 = vpack.c.bf16 %v1935_v3, %v1919_v2  ;;  %v2716_v3 = vld [vmem:[#allocation14 + $0x38] sm:$0xff]  ;;  %v2769_v40 = vld [vmem:[#allocation14 + $0x1e0] sm:$0xff] }
 0xe8c   :  { %v2715_v2 = vld [vmem:[#allocation14 + $0x30] sm:$0xff] }
 0xe8d   :  { %8878 = vrsqrt.f32 %v1886_v5  ;;  %v1937_v5 = vld [vmem:[#allocation11 + $0xf0] sm:$0xff] }
 0xe8e   :  { %v8204_v14 = vpack.c.bf16 %v1937_v5, %v1921_v4 }
 0xe91   :  { %v8877_v8 = vpop.eup %8876 }
 0xe92   :  { %v1889_v12 = vmul.f32 %v8877_v8, %v1883_v6  ;;  %v8194_v6 = vpack.c.bf16 %v1936_v61, %v1920_v60  ;;  %v8202_v8 = vpack.c.bf16 %v1938_v63, %v1922_v62  ;;  %v2731_v60 = vld [vmem:[#allocation14 + $0xb0] sm:$0xff]  ;;  %v2732_v61 = vld [vmem:[#allocation14 + $0xb8] sm:$0xff] }
 0xe93   :  { %v2763_v62 = vld [vmem:[#allocation14 + $0x1b0] sm:$0xff]  ;;  %v2764_v63 = vld [vmem:[#allocation14 + $0x1b8] sm:$0xff]  ;;  %v8222_v4 = vpack.c.bf16 %v2732_v61, %v2731_v60 }
 0xe94   :  { %v1897_v9 = vmul.f32 %v7089_v10, %v1889_v12  ;;  %v1954_v12 = vld [vmem:[#allocation11 + $0x178] sm:$0xff]  ;;  %v8254_v5 = vpack.c.bf16 %v2764_v63, %v2763_v62  ;;  %v2789_v62 = vld [vmem:[#allocation14 + $0x280] sm:$0xff]  ;;  %v2790_v63 = vld [vmem:[#allocation14 + $0x288] sm:$0xff] }
 0xe95   :  { %v8206_v23 = vpack.c.bf16 %v1970_v7, %v1954_v12  ;;  %v2765_v12 = vld [vmem:[#allocation14 + $0x1c0] sm:$0xff]  ;;  %v2766_v7 = vld [vmem:[#allocation14 + $0x1c8] sm:$0xff]  ;;  %v2756_v60 = vld [vmem:[#allocation14 + $0x178] sm:$0xff] }
 0xe96   :  { %v9709_v24 = vadd.f32 %v7090_v15, %v1897_v9  ;;  %v1953_v9 = vld [vmem:[#allocation11 + $0x170] sm:$0xff] }
 0xe97   :  { %v8879_v29 = vpop.eup %8878  ;;  %v8208_v27 = vpack.c.bf16 %v1969_v21, %v1953_v9  ;;  %v8258_v21 = vpack.c.bf16 %v2766_v7, %v2765_v12 }
 0xe98   :  { %v1890_v34 = vmul.f32 %v8879_v29, %v1884_v25  ;;  %7091 = vmatmul.mubr.msk.f32.vlgmr.msra.gmra.mrb[20].mxu1 %vm323_vm3, %v9709_v24  ;;  %7093 = vmatmul.mubr.msk.f32.vlgmr.msra.gmra.mrb[18].mxu0 %vm323_vm3, %v9709_v24  ;;  %v2758_v25 = vld [vmem:[#allocation14 + $0x188] sm:$0xff] }
 0xe99   :  { %8165 = vmatpush1.bf16.msra.mxu1 %v8164_v17  ;;  %8173 = vmatpush1.bf16.msra.mxu0 %v8172_v32  ;;  %v2725_v17 = vld [vmem:[#allocation14 + $0x80] sm:$0xff]  ;;  %v2726_v32 = vld [vmem:[#allocation14 + $0x88] sm:$0xff] }
 0xe9a   :  { %v1898_v42 = vmul.f32 %v7089_v10, %v1890_v34  ;;  %2131 = vmatprep.mubr.f32.mxu1 %v9220_v18  ;;  %2208 = vmatprep.mubr.f32.mxu0 %v9220_v18  ;;  %v1952_v10 = vld [vmem:[#allocation11 + $0x168] sm:$0xff]  ;;  %v2741_v34 = vld [vmem:[#allocation14 + $0x100] sm:$0xff] }
 0xe9b   :  { %8167 = vmatprep.subr.bf16.mxu1 %v8166_v30  ;;  %8175 = vmatprep.subr.bf16.mxu0 %v8174_v31  ;;  %v8198_v22 = vpack.c.bf16 %v1968_v11, %v1952_v10  ;;  %v2710_v29 = vld [vmem:[#allocation14 + $0x8] sm:$0xff]  ;;  %v8210_v30 = vpack.c.bf16 %v2726_v32, %v2725_v17  ;;  %v8242_v31 = vpack.c.bf16 %v2758_v25, %v2757_v33  ;;  %v2733_v10 = vld [vmem:[#allocation14 + $0xc0] sm:$0xff]  ;;  %v2735_v17 = vld [vmem:[#allocation14 + $0xd0] sm:$0xff] }
 0xe9c   :  { %v9718_v44 = vadd.f32 %v7090_v15, %v1898_v42  ;;  %v1951_v15 = vld [vmem:[#allocation11 + $0x160] sm:$0xff]  ;;  %v8212_v41 = vpack.c.bf16 %v2710_v29, %v2709_v28  ;;  %v8244_v42 = vpack.c.bf16 %v2742_v35, %v2741_v34  ;;  %v2734_v11 = vld [vmem:[#allocation14 + $0xc8] sm:$0xff]  ;;  %v2736_v32 = vld [vmem:[#allocation14 + $0xd8] sm:$0xff] }
 0xe9d   :  { %8169 = vmatpush1.bf16.msra.mxu1 %v8168_v36  ;;  %8177 = vmatpush1.bf16.msra.mxu0 %v8176_v39  ;;  %v8200_v26 = vpack.c.bf16 %v1967_v16, %v1951_v15  ;;  %v2727_v36 = vld [vmem:[#allocation14 + $0x90] sm:$0xff]  ;;  %v2728_v39 = vld [vmem:[#allocation14 + $0x98] sm:$0xff]  ;;  %v2717_v15 = vld [vmem:[#allocation14 + $0x40] sm:$0xff]  ;;  %v8226_v9 = vpack.c.bf16 %v2734_v11, %v2733_v10 }
 0xe9e   :  { %7092 = vmatmul.mubr.msk.f32.gmra.mrb[22].mxu1 %vm323_vm3, %v9718_v44  ;;  %7094 = vmatmul.mubr.msk.f32.gmra.mrb[20].mxu0 %vm323_vm3, %v9718_v44  ;;  %v2718_v16 = vld [vmem:[#allocation14 + $0x48] sm:$0xff]  ;;  %v2767_v33 = vld [vmem:[#allocation14 + $0x1d0] sm:$0xff]  ;;  %v2768_v25 = vld [vmem:[#allocation14 + $0x1d8] sm:$0xff] }
 0xe9f   :  { %2279 = vmatprep.mubr.f32.mxu1 %v9220_v18  ;;  %2356 = vmatprep.mubr.f32.mxu0 %v9220_v18  ;;  %v2719_v28 = vld [vmem:[#allocation14 + $0x50] sm:$0xff]  ;;  %v2720_v29 = vld [vmem:[#allocation14 + $0x58] sm:$0xff] }
 0xea0   :  { %8179 = vmatprep.subr.bf16.mxu1 %v8178_v37  ;;  %8187 = vmatprep.subr.bf16.mxu0 %v8186_v45  ;;  %v2712_v37 = vld [vmem:[#allocation14 + $0x18] sm:$0xff]  ;;  %v8214_v45 = vpack.c.bf16 %v2728_v39, %v2727_v36  ;;  %v2751_v34 = vld [vmem:[#allocation14 + $0x150] sm:$0xff]  ;;  %v2737_v36 = vld [vmem:[#allocation14 + $0xe0] sm:$0xff] }
 0xea1   :  { %v2752_v35 = vld [vmem:[#allocation14 + $0x158] sm:$0xff]  ;;  %v2738_v39 = vld [vmem:[#allocation14 + $0xe8] sm:$0xff] }
 0xea2   :  { %7095 = vmatmul.mubr.msk.f32.vlgmr.msra.gmra.mrb[24].mxu1 %vm323_vm3, %v9709_v24  ;;  %7097 = vmatmul.mubr.msk.f32.vlgmr.msra.gmra.mrb[22].mxu0 %vm323_vm3, %v9709_v24 }
 0xea3   :  { %8181 = vmatpush1.bf16.msra.mxu1 %v8180_v53  ;;  %8189 = vmatpush1.bf16.msra.mxu0 %v8188_v54  ;;  %v8216_v53 = vpack.c.bf16 %v2712_v37, %v2711_v43  ;;  %v8248_v54 = vpack.c.bf16 %v2744_v48, %v2743_v47  ;;  %v2721_v43 = vld [vmem:[#allocation14 + $0x60] sm:$0xff]  ;;  %v8234_v37 = vpack.c.bf16 %v2738_v39, %v2737_v36  ;;  %v2754_v48 = vld [vmem:[#allocation14 + $0x168] sm:$0xff]  ;;  %v2776_v36 = vld [vmem:[#allocation14 + $0x218] sm:$0xff] }
 0xea4   :  { %2285 = vmatprep.mubr.f32.mxu1 %v9220_v18  ;;  %2362 = vmatprep.mubr.f32.mxu0 %v9220_v18  ;;  %v2753_v47 = vld [vmem:[#allocation14 + $0x160] sm:$0xff] }
 0xea5   :  { %8183 = vmatprep.subr.bf16.mxu1 %v8182_v58  ;;  %8191 = vmatprep.subr.bf16.mxu0 %v8190_v59  ;;  %v2745_v58 = vld [vmem:[#allocation14 + $0x120] sm:$0xff]  ;;  %v2746_v59 = vld [vmem:[#allocation14 + $0x128] sm:$0xff]  ;;  %v8268_v50 = vpack.c.bf16 %v2754_v48, %v2753_v47 }
 0xea6   :  { %7096 = vmatmul.mubr.msk.f32.gmra.mrb[26].mxu1 %vm323_vm3, %v9718_v44  ;;  %7098 = vmatmul.mubr.msk.f32.gmra.mrb[24].mxu0 %vm323_vm3, %v9718_v44 }
 0xea7   :  { %8185 = vmatpush1.bf16.msra.mxu1 %v8184_v0  ;;  %8193 = vmatpush1.bf16.msra.mxu0 %v8192_v1  ;;  %v8220_v0 = vpack.c.bf16 %v2714_v55, %v2713_v38  ;;  %v8252_v1 = vpack.c.bf16 %v2746_v59, %v2745_v58  ;;  %v2772_v38 = vld [vmem:[#allocation14 + $0x1f8] sm:$0xff]  ;;  %v2723_v55 = vld [vmem:[#allocation14 + $0x70] sm:$0xff] }
 0xea8   :  { %2433 = vmatprep.mubr.f32.mxu1 %v9220_v18  ;;  %2510 = vmatprep.mubr.f32.mxu0 %v9220_v18  ;;  %v2755_v59 = vld [vmem:[#allocation14 + $0x170] sm:$0xff] }
 0xea9   :  { %8195 = vmatprep.subr.bf16.mxu1 %v8194_v6  ;;  %8203 = vmatprep.subr.bf16.mxu0 %v8202_v8  ;;  %v2747_v6 = vld [vmem:[#allocation14 + $0x130] sm:$0xff]  ;;  %v2748_v8 = vld [vmem:[#allocation14 + $0x138] sm:$0xff]  ;;  %v8272_v61 = vpack.c.bf16 %v2756_v60, %v2755_v59  ;;  %v2826_v59 = vld [vmem:[#allocation14 + $0x3a8] sm:$0xff] }
 0xeaa   :  { %7099 = vmatmul.mubr.msk.f32.vlgmr.msra.gmra.mrb[28].mxu1 %vm323_vm3, %v9709_v24  ;;  %7101 = vmatmul.mubr.msk.f32.vlgmr.msra.gmra.mrb[26].mxu0 %vm323_vm3, %v9709_v24  ;;  %v2777_v60 = vld [vmem:[#allocation14 + $0x220] sm:$0xff] }
 0xeab   :  { %8197 = vmatpush1.bf16.msra.mxu1 %v8196_v13  ;;  %8205 = vmatpush1.bf16.msra.mxu0 %v8204_v14  ;;  %v8224_v13 = vpack.c.bf16 %v2716_v3, %v2715_v2  ;;  %v8256_v14 = vpack.c.bf16 %v2748_v8, %v2747_v6  ;;  %v2822_v2 = vld [vmem:[#allocation14 + $0x388] sm:$0xff]  ;;  %v9769_v8 = vld [vmem:[#allocation13] sm:$0xff] }
 0xeac   :  { %2439 = vmatprep.mubr.f32.mxu1 %v9220_v18  ;;  %2516 = vmatprep.mubr.f32.mxu0 %v9220_v18 }
 0xead   :  { %8199 = vmatprep.subr.bf16.mxu1 %v8198_v22  ;;  %8207 = vmatprep.subr.bf16.mxu0 %v8206_v23  ;;  %v2749_v22 = vld [vmem:[#allocation14 + $0x140] sm:$0xff]  ;;  %v2750_v23 = vld [vmem:[#allocation14 + $0x148] sm:$0xff] }
 0xeae   :  { %7100 = vmatmul.mubr.msk.f32.gmra.mrb[30].mxu1 %vm323_vm3, %v9718_v44  ;;  %7102 = vmatmul.mubr.msk.f32.gmra.mrb[28].mxu0 %vm323_vm3, %v9718_v44 }
 0xeaf   :  { %8201 = vmatpush1.bf16.msra.mxu1 %v8200_v26  ;;  %8209 = vmatpush1.bf16.msra.mxu0 %v8208_v27  ;;  %v8228_v26 = vpack.c.bf16 %v2718_v16, %v2717_v15  ;;  %v8260_v27 = vpack.c.bf16 %v2750_v23, %v2749_v22  ;;  %v2773_v16 = vld [vmem:[#allocation14 + $0x200] sm:$0xff] }
 0xeb0   :  { %2587 = vmatprep.mubr.f32.mxu1 %v9220_v18  ;;  %2664 = vmatprep.mubr.f32.mxu0 %v9220_v18 }
 0xeb1   :  { %8211 = vmatprep.subr.bf16.mxu1 %v8210_v30  ;;  %8243 = vmatprep.subr.bf16.mxu0 %v8242_v31  ;;  %v8230_v30 = vpack.c.bf16 %v2736_v32, %v2735_v17  ;;  %v8262_v31 = vpack.c.bf16 %v2768_v25, %v2767_v33  ;;  %v2805_v32 = vld [vmem:[#allocation14 + $0x300] sm:$0xff]  ;;  %v2806_v33 = vld [vmem:[#allocation14 + $0x308] sm:$0xff]  ;;  %v2791_v25 = vld [vmem:[#allocation14 + $0x290] sm:$0xff] }
 0xeb2   :  { %7103 = vmatmul.mubr.msk.f32.vlgmr.msra.gmra.mrb[32].mxu1 %vm323_vm3, %v9709_v24  ;;  %7105 = vmatmul.mubr.msk.f32.vlgmr.msra.gmra.mrb[30].mxu0 %vm323_vm3, %v9709_v24 }
 0xeb3   :  { %2593 = vmatprep.mubr.f32.mxu1 %v9220_v18  ;;  %2670 = vmatprep.mubr.f32.mxu0 %v9220_v18 }
 0xeb4   :  { %8213 = vmatpush3.bf16.msra.mxu1 %v8212_v41  ;;  %8245 = vmatpush3.bf16.msra.mxu0 %v8244_v42  ;;  %v8232_v41 = vpack.c.bf16 %v2720_v29, %v2719_v28  ;;  %v8264_v42 = vpack.c.bf16 %v2752_v35, %v2751_v34  ;;  %v2792_v28 = vld [vmem:[#allocation14 + $0x298] sm:$0xff]  ;;  %v2823_v29 = vld [vmem:[#allocation14 + $0x390] sm:$0xff] }
 0xeb5   :  { %8215 = vmatprep.subr.bf16.mxu1 %v8214_v45  ;;  %8247 = vmatprep.subr.bf16.mxu0 %v8246_v46  ;;  %v8266_v45 = vpack.c.bf16 %v2770_v20, %v2769_v40  ;;  %v2722_v46 = vld [vmem:[#allocation14 + $0x68] sm:$0xff]  ;;  %v2775_v35 = vld [vmem:[#allocation14 + $0x210] sm:$0xff] }
 0xeb6   :  { %7104 = vmatmul.mubr.msk.f32.gmra.mrb[34].mxu1 %vm323_vm3, %v9718_v44  ;;  %7106 = vmatmul.mubr.msk.f32.gmra.mrb[32].mxu0 %vm323_vm3, %v9718_v44  ;;  %v8236_v49 = vpack.c.bf16 %v2722_v46, %v2721_v43  ;;  %v2808_v43 = vld [vmem:[#allocation14 + $0x318] sm:$0xff]  ;;  %v8278_v46 = vpack.c.bf16 %v2792_v28, %v2791_v25  ;;  %v2779_v28 = vld [vmem:[#allocation14 + $0x230] sm:$0xff] }
 0xeb8   :  { %8217 = vmatpush3.bf16.msra.mxu1 %v8216_v53  ;;  %8249 = vmatpush3.bf16.msra.mxu0 %v8248_v54  ;;  %v2771_v53 = vld [vmem:[#allocation14 + $0x1f0] sm:$0xff]  ;;  %v8238_v54 = vpack.c.bf16 %v2740_v52, %v2739_v51  ;;  %v8280_v51 = vpack.c.bf16 %v2776_v36, %v2775_v35  ;;  %v2793_v52 = vld [vmem:[#allocation14 + $0x2a0] sm:$0xff]  ;;  %v2812_v35 = vld [vmem:[#allocation14 + $0x338] sm:$0xff] }
 0xeb9   :  { %8219 = vmatprep.subr.bf16.mxu1 %v8218_v56  ;;  %8251 = vmatprep.subr.bf16.mxu0 %v8250_v57  ;;  %v2724_v56 = vld [vmem:[#allocation14 + $0x78] sm:$0xff]  ;;  %v8270_v57 = vpack.c.bf16 %v2772_v38, %v2771_v53  ;;  %v2794_v53 = vld [vmem:[#allocation14 + $0x2a8] sm:$0xff]  ;;  %v2797_v36 = vld [vmem:[#allocation14 + $0x2c0] sm:$0xff] }
 0xeba   :  { %v8240_v58 = vpack.c.bf16 %v2724_v56, %v2723_v55 }
 0xebc   :  { %8221 = vmatpush3.bf16.msra.mxu1 %v8220_v0  ;;  %8253 = vmatpush3.bf16.msra.mxu0 %v8252_v1  ;;  %v2821_v0 = vld [vmem:[#allocation14 + $0x380] sm:$0xff]  ;;  %v8274_v1 = vpack.c.bf16 %v2790_v63, %v2789_v62 }
 0xebd   :  { %8223 = vmatprep.subr.bf16.mxu1 %v8222_v4  ;;  %8255 = vmatprep.subr.bf16.mxu0 %v8254_v5  ;;  %v8306_v3 = vpack.c.bf16 %v2822_v2, %v2821_v0  ;;  %v9761_v4 = vshrl.u32 %v206_v19, 7  ;;  %v2778_v0 = vld [vmem:[#allocation14 + $0x228] sm:$0xff] }
 0xebe   :  { %v2810_v2 = vld [vmem:[#allocation14 + $0x328] sm:$0xff] }
 0xebf   :  { %v9764_v5 = vsub.s32 0, %v9761_v4  ;;  %v9767_v6 = vsub.s32 2, %v9761_v4  ;;  %v9772_v10 = vsub.s32 1, %v9761_v4  ;;  %v9775_v11 = vsub.s32 3, %v9761_v4 }
 0xec0   :  { %8225 = vmatpush3.bf16.msra.mxu1 %v8224_v13  ;;  %8257 = vmatpush3.bf16.msra.mxu0 %v8256_v14  ;;  %v9789_v34 = vsub.s32 7, %v9761_v4 }
 0xec1   :  { %8227 = vmatprep.subr.bf16.mxu1 %v8226_v9  ;;  %8259 = vmatprep.subr.bf16.mxu0 %v8258_v21  ;;  %v1978_v12 = vrot.slane %v9769_v8, %v9764_v5  ;;  %v1986_v19 = vrot.slane %v9769_v8, %v9767_v6  ;;  %v1982_v7 = vrot.slane %v9769_v8, %v9772_v10  ;;  %v2774_v9 = vld [vmem:[#allocation14 + $0x208] sm:$0xff] }
 0xec2   :  { %v1990_v13 = vrot.slane %v9769_v8, %v9775_v11  ;;  %v8276_v20 = vpack.c.bf16 %v2774_v9, %v2773_v16  ;;  %v9797_v56 = vrot.slane %v9769_v8, %v9789_v34  ;;  %v2795_v16 = vld [vmem:[#allocation14 + $0x2b0] sm:$0xff] }
 0xec4   :  { %8229 = vmatpush3.bf16.msra.mxu1 %v8228_v26  ;;  %8261 = vmatpush3.bf16.msra.mxu0 %v8260_v27 }
 0xec5   :  { %8231 = vmatprep.subr.bf16.mxu1 %v8230_v30  ;;  %8263 = vmatprep.subr.bf16.mxu0 %v8262_v31  ;;  %v2824_v30 = vld [vmem:[#allocation14 + $0x398] sm:$0xff]  ;;  %v9786_v31 = vsub.s32 5, %v9761_v4 }
 0xec6   :  { %v8310_v47 = vpack.c.bf16 %v2824_v30, %v2823_v29  ;;  %v2780_v29 = vld [vmem:[#allocation14 + $0x238] sm:$0xff]  ;;  %v2811_v30 = vld [vmem:[#allocation14 + $0x330] sm:$0xff] }
 0xec8   :  { %8233 = vmatpush3.bf16.msra.mxu1 %v8232_v41  ;;  %8265 = vmatpush3.bf16.msra.mxu0 %v8264_v42  ;;  %v8308_v41 = vpack.c.bf16 %v2806_v33, %v2805_v32  ;;  %v2807_v42 = vld [vmem:[#allocation14 + $0x310] sm:$0xff]  ;;  %v2828_v32 = vld [vmem:[#allocation14 + $0x3b8] sm:$0xff] }
 0xec9   :  { %8235 = vmatprep.subr.bf16.mxu1 %v8234_v37  ;;  %8267 = vmatprep.subr.bf16.mxu0 %v8266_v45 }
 0xecc   :  { %8237 = vmatpush3.bf16.msra.mxu1 %v8236_v49  ;;  %8269 = vmatpush3.bf16.msra.mxu0 %v8268_v50  ;;  %v9793_v50 = vrot.slane %v9769_v8, %v9786_v31 }
 0xecd   :  { %8239 = vmatprep.subr.bf16.mxu1 %v8238_v54  ;;  %8271 = vmatprep.subr.bf16.mxu0 %v8270_v57  ;;  %v8312_v57 = vpack.c.bf16 %v2808_v43, %v2807_v42 }
 0xed0   :  { %8241 = vmatpush3.bf16.msra.mxu1 %v8240_v58  ;;  %8273 = vmatpush3.bf16.msra.mxu0 %v8272_v61  ;;  %v2825_v58 = vld [vmem:[#allocation14 + $0x3a0] sm:$0xff] }
 0xed1   :  { %8275 = vmatprep.subr.bf16.mxu1 %v8274_v1  ;;  %8307 = vmatprep.subr.bf16.mxu0 %v8306_v3  ;;  %v2809_v1 = vld [vmem:[#allocation14 + $0x320] sm:$0xff] }
 0xf6b   :  { %v2127_v14 = vpop.f32.mrb[20].mxu1  ;;  %v2204_v15 = vpop.f32.mrb[18].mxu0 }
 0xf6c   :  { %v2128_v21 = vadd.f32 %v2127_v14, %v1978_v12  ;;  %v2205_v22 = vadd.f32 %v2204_v15, %v1986_v19  ;;  %v2129_v23 = vpop.f32.mrb[21].mxu1  ;;  %v2206_v17 = vpop.f32.mrb[19].mxu0 }
 0xf6d   :  { %v2130_v26 = vadd.f32 %v2129_v23, %v1982_v7  ;;  %v2207_v27 = vadd.f32 %v2206_v17, %v1990_v13  ;;  %v2796_v23 = vld [vmem:[#allocation14 + $0x2b8] sm:$0xff]  ;;  %v2827_v17 = vld [vmem:[#allocation14 + $0x3b0] sm:$0xff] }
 0xf6e   :  { %v2677_v37 = vmax.f32 %v2128_v21, 0.0  ;;  %v2679_v45 = vmax.f32 %v2205_v22, 0.0  ;;  %v8282_v22 = vpack.c.bf16 %v2794_v53, %v2793_v52  ;;  %v8286_v43 = vpack.c.bf16 %v2796_v23, %v2795_v16  ;;  %v2781_v52 = vld [vmem:[#allocation14 + $0x240] sm:$0xff]  ;;  %v2782_v53 = vld [vmem:[#allocation14 + $0x248] sm:$0xff]  ;;  %v2784_v16 = vld [vmem:[#allocation14 + $0x258] sm:$0xff] }
 0xf6f   :  { %v2678_v39 = vmax.f32 %v2130_v26, 0.0  ;;  %v2680_v40 = vmax.f32 %v2207_v27, 0.0 }
 0xf71   :  { %v2133_v48 = vpop.f32.mrb[22].mxu1  ;;  %v2210_v49 = vpop.f32.mrb[20].mxu0  ;;  %3036 = vmatprep.mubr.f32.mxu1 %v2678_v39  ;;  %3111 = vmatprep.mubr.f32.mxu0 %v2680_v40  ;;  %v2798_v39 = vld [vmem:[#allocation14 + $0x2c8] sm:$0xff] }
 0xf72   :  { %v2134_v54 = vadd.f32 %v2133_v48, %v1978_v12  ;;  %v2135_v38 = vpop.f32.mrb[23].mxu1  ;;  %v2212_v55 = vpop.f32.mrb[21].mxu0  ;;  %3037 = vmatmul.mubr.f32.vlgmr.msra.gmra.mrb[36].mxu1 %v2677_v37  ;;  %3112 = vmatmul.mubr.f32.vlgmr.msra.gmra.mrb[34].mxu0 %v2679_v45  ;;  %v2211_v61 = vadd.f32 %v2210_v49, %v1986_v19  ;;  %v8314_v19 = vpack.c.bf16 %v2826_v59, %v2825_v58  ;;  %v2829_v45 = vld [vmem:[#allocation14 + $0x3c0] sm:$0xff]  ;;  %v2799_v58 = vld [vmem:[#allocation14 + $0x2d0] sm:$0xff] }
 0xf73   :  { %v2136_v62 = vadd.f32 %v2135_v38, %v1982_v7  ;;  %v2213_v63 = vadd.f32 %v2212_v55, %v1990_v13  ;;  %8277 = vmatpush3.bf16.msra.mxu1 %v8276_v20  ;;  %8309 = vmatpush3.bf16.msra.mxu0 %v8308_v41  ;;  %v8284_v7 = vpack.c.bf16 %v2778_v0, %v2777_v60  ;;  %v2813_v55 = vld [vmem:[#allocation14 + $0x340] sm:$0xff] }
 0xf74   :  { %8279 = vmatprep.subr.bf16.mxu1 %v8278_v46  ;;  %8311 = vmatprep.subr.bf16.mxu0 %v8310_v47  ;;  %v8316_v13 = vpack.c.bf16 %v2810_v2, %v2809_v1  ;;  %v2693_v33 = vmax.f32 %v2134_v54, 0.0  ;;  %v2695_v25 = vmax.f32 %v2211_v61, 0.0  ;;  %v8318_v37 = vpack.c.bf16 %v2828_v32, %v2827_v17  ;;  %v2830_v46 = vld [vmem:[#allocation14 + $0x3c8] sm:$0xff]  ;;  %v2800_v61 = vld [vmem:[#allocation14 + $0x2d8] sm:$0xff]  ;;  %v2833_v32 = vld [vmem:[#allocation14 + $0x3e0] sm:$0xff] }
 0xf75   :  { %v2694_v3 = vmax.f32 %v2136_v62, 0.0  ;;  %v2696_v12 = vmax.f32 %v2213_v63, 0.0  ;;  %v9799_v14 = vpop.f32.mrb[24].mxu1  ;;  %v9801_v15 = vpop.f32.mrb[22].mxu0  ;;  %v8288_v49 = vpack.c.bf16 %v2780_v29, %v2779_v28  ;;  %v8290_v54 = vpack.c.bf16 %v2798_v39, %v2797_v36  ;;  %v2831_v62 = vld [vmem:[#allocation14 + $0x3d0] sm:$0xff]  ;;  %v2832_v63 = vld [vmem:[#allocation14 + $0x3d8] sm:$0xff] }
 0xf76   :  { %v2283_v9 = vpop.f32.mrb[25].mxu1  ;;  %v2360_v21 = vpop.f32.mrb[23].mxu0  ;;  %v8322_v38 = vpack.c.bf16 %v2830_v46, %v2829_v45  ;;  %v8292_v2 = vpack.c.bf16 %v2782_v53, %v2781_v52  ;;  %v2802_v17 = vld [vmem:[#allocation14 + $0x2e8] sm:$0xff]  ;;  %v9833_v36 = vsub.s32 6, %v9761_v4  ;;  %v2836_v52 = vld [vmem:[#allocation14 + $0x3f8] sm:$0xff] }
 0xf77   :  { %v2284_v26 = vadd.f32 %v2283_v9, %v9793_v50  ;;  %v2361_v27 = vadd.f32 %v2360_v21, %v9797_v56  ;;  %8281 = vmatpush3.bf16.msra.mxu1 %v8280_v51  ;;  %8313 = vmatpush3.bf16.msra.mxu0 %v8312_v57  ;;  %v8320_v51 = vpack.c.bf16 %v2812_v35, %v2811_v30  ;;  %v2814_v57 = vld [vmem:[#allocation14 + $0x348] sm:$0xff]  ;;  %v2785_v30 = vld [vmem:[#allocation14 + $0x260] sm:$0xff] }
 0xf78   :  { %3041 = vmatprep.mubr.f32.mxu1 %v2694_v3  ;;  %3116 = vmatprep.mubr.f32.mxu0 %v2696_v12  ;;  %v8324_v3 = vpack.c.bf16 %v2814_v57, %v2813_v55  ;;  %v2783_v12 = vld [vmem:[#allocation14 + $0x250] sm:$0xff]  ;;  %v8294_v9 = vpack.c.bf16 %v2800_v61, %v2799_v58  ;;  %v8326_v21 = vpack.c.bf16 %v2832_v63, %v2831_v62  ;;  %v2786_v35 = vld [vmem:[#allocation14 + $0x268] sm:$0xff]  ;;  %v2788_v58 = vld [vmem:[#allocation14 + $0x278] sm:$0xff] }
 0xf79   :  { %v2682_v40 = vmax.f32 %v2284_v26, 0.0  ;;  %v2684_v20 = vmax.f32 %v2361_v27, 0.0  ;;  %3042 = vmatmul.mubr.f32.gmra.mrb[38].mxu1 %v2693_v33  ;;  %3117 = vmatmul.mubr.f32.gmra.mrb[36].mxu0 %v2695_v25  ;;  %v9805_v41 = vpop.f32.mrb[26].mxu1  ;;  %v9807_v42 = vpop.f32.mrb[24].mxu0  ;;  %v2834_v33 = vld [vmem:[#allocation14 + $0x3e8] sm:$0xff]  ;;  %v9830_v27 = vsub.s32 4, %v9761_v4  ;;  %v8296_v28 = vpack.c.bf16 %v2784_v16, %v2783_v12 }
 0xf7a   :  { %8283 = vmatprep.subr.bf16.mxu1 %v8282_v22  ;;  %8315 = vmatprep.subr.bf16.mxu0 %v8314_v19  ;;  %v9809_v47 = vpop.f32.mrb[27].mxu1  ;;  %v9811_v48 = vpop.f32.mrb[25].mxu0  ;;  %v2815_v22 = vld [vmem:[#allocation14 + $0x350] sm:$0xff]  ;;  %v2816_v19 = vld [vmem:[#allocation14 + $0x358] sm:$0xff]  ;;  %v2002_v62 = vrot.slane %v9769_v8, %v9833_v36  ;;  %v2853_v12 = vld [vmem:[#allocation14 + $0x480] sm:$0xff] }
 0xf7b   :  { %8285 = vmatpush3.bf16.msra.mxu1 %v8284_v7  ;;  %8317 = vmatpush3.bf16.msra.mxu0 %v8316_v13  ;;  %v2801_v7 = vld [vmem:[#allocation14 + $0x2e0] sm:$0xff]  ;;  %v8328_v29 = vpack.c.bf16 %v2816_v19, %v2815_v22  ;;  %v1994_v4 = vrot.slane %v9769_v8, %v9830_v27  ;;  %v2787_v57 = vld [vmem:[#allocation14 + $0x270] sm:$0xff]  ;;  %v2854_v16 = vld [vmem:[#allocation14 + $0x488] sm:$0xff] }
 0xf7c   :  { %3186 = vmatprep.mubr.f32.mxu1 %v2682_v40  ;;  %3261 = vmatprep.mubr.f32.mxu0 %v2684_v20  ;;  %v8298_v39 = vpack.c.bf16 %v2802_v17, %v2801_v7  ;;  %v8330_v40 = vpack.c.bf16 %v2834_v33, %v2833_v32  ;;  %v2817_v20 = vld [vmem:[#allocation14 + $0x360] sm:$0xff]  ;;  %v2819_v61 = vld [vmem:[#allocation14 + $0x370] sm:$0xff]  ;;  %v2886_v19 = vld [vmem:[#allocation14 + $0x588] sm:$0xff] }
 0xf7d   :  { %v9813_v59 = vpop.f32.mrb[28].mxu1  ;;  %v9815_v60 = vpop.f32.mrb[26].mxu0  ;;  %8287 = vmatprep.subr.bf16.mxu1 %v8286_v43  ;;  %8319 = vmatprep.subr.bf16.mxu0 %v8318_v37  ;;  %v2818_v43 = vld [vmem:[#allocation14 + $0x368] sm:$0xff]  ;;  %v2803_v37 = vld [vmem:[#allocation14 + $0x2f0] sm:$0xff]  ;;  %v2885_v22 = vld [vmem:[#allocation14 + $0x580] sm:$0xff] }
 0xf7e   :  { %v9817_v0 = vpop.f32.mrb[29].mxu1  ;;  %v9819_v1 = vpop.f32.mrb[27].mxu0  ;;  %v8332_v55 = vpack.c.bf16 %v2818_v43, %v2817_v20  ;;  %v9851_v7 = vld [vmem:[#allocation13 + $0x8] sm:$0xff]  ;;  %v2837_v8 = vld [vmem:[#allocation14 + $0x400] sm:$0xff]  ;;  %v2282_v20 = vadd.f32 %v9799_v14, %v1994_v4  ;;  %v2359_v43 = vadd.f32 %v9801_v15, %v2002_v62 }
 0xf7f   :  { %8289 = vmatpush3.bf16.msra.mxu1 %v8288_v49  ;;  %8321 = vmatpush3.bf16.msra.mxu0 %v8320_v51  ;;  %v2804_v49 = vld [vmem:[#allocation14 + $0x2f8] sm:$0xff]  ;;  %v2835_v51 = vld [vmem:[#allocation14 + $0x3f0] sm:$0xff]  ;;  %v2838_v33 = vld [vmem:[#allocation14 + $0x408] sm:$0xff]  ;;  %v9869_v14 = vrot.slane %v9851_v7, %v9775_v11 }
 0xf80   :  { %8291 = vmatprep.subr.bf16.mxu1 %v8290_v54  ;;  %8323 = vmatprep.subr.bf16.mxu0 %v8322_v38  ;;  %v8300_v38 = vpack.c.bf16 %v2786_v35, %v2785_v30  ;;  %v8302_v63 = vpack.c.bf16 %v2804_v49, %v2803_v37  ;;  %v8338_v30 = vpack.c.bf16 %v2854_v16, %v2853_v12  ;;  %v2869_v35 = vld [vmem:[#allocation14 + $0x500] sm:$0xff]  ;;  %v2856_v49 = vld [vmem:[#allocation14 + $0x498] sm:$0xff] }
 0xf81   :  { %v9821_v13 = vpop.f32.mrb[30].mxu1  ;;  %v9823_v23 = vpop.f32.mrb[28].mxu0  ;;  %v8370_v37 = vpack.c.bf16 %v2886_v19, %v2885_v22  ;;  %v8340_v15 = vpack.c.bf16 %v2838_v33, %v2837_v8  ;;  %v2515_v19 = vadd.f32 %v9819_v1, %v9869_v14  ;;  %v2871_v8 = vld [vmem:[#allocation14 + $0x510] sm:$0xff]  ;;  %v2872_v33 = vld [vmem:[#allocation14 + $0x518] sm:$0xff] }
 0xf82   :  { %v9825_v25 = vpop.f32.mrb[31].mxu1  ;;  %v9827_v26 = vpop.f32.mrb[29].mxu0 }
 0xf83   :  { %8293 = vmatpush3.bf16.msra.mxu1 %v8292_v2  ;;  %8325 = vmatpush3.bf16.msra.mxu0 %v8324_v3  ;;  %v8334_v2 = vpack.c.bf16 %v2836_v52, %v2835_v51  ;;  %v2820_v3 = vld [vmem:[#allocation14 + $0x378] sm:$0xff]  ;;  %v2887_v51 = vld [vmem:[#allocation14 + $0x590] sm:$0xff]  ;;  %v2688_v1 = vmax.f32 %v2515_v19, 0.0 }
 0xf84   :  { %8295 = vmatprep.subr.bf16.mxu1 %v8294_v9  ;;  %8327 = vmatprep.subr.bf16.mxu0 %v8326_v21  ;;  %v2888_v52 = vld [vmem:[#allocation14 + $0x598] sm:$0xff] }
 0xf85   :  { %v9835_v45 = vpop.f32.mrb[32].mxu1  ;;  %v9837_v46 = vpop.f32.mrb[30].mxu0 }
 0xf86   :  { %v9839_v53 = vpop.f32.mrb[33].mxu1  ;;  %v9841_v54 = vpop.f32.mrb[31].mxu0 }
 0xf87   :  { %8297 = vmatpush3.bf16.msra.mxu1 %v8296_v28  ;;  %8329 = vmatpush3.bf16.msra.mxu0 %v8328_v29  ;;  %v8304_v28 = vpack.c.bf16 %v2788_v58, %v2787_v57  ;;  %v8336_v29 = vpack.c.bf16 %v2820_v3, %v2819_v61  ;;  %v9865_v57 = vrot.slane %v9851_v7, %v9772_v10  ;;  %v2683_v3 = vmax.f32 %v2359_v43, 0.0 }
 0xf88   :  { %8299 = vmatprep.subr.bf16.mxu1 %v8298_v39  ;;  %8331 = vmatprep.subr.bf16.mxu0 %v8330_v40  ;;  %v2870_v39 = vld [vmem:[#allocation14 + $0x508] sm:$0xff]  ;;  %v2855_v40 = vld [vmem:[#allocation14 + $0x490] sm:$0xff] }
 0xf89   :  { %v9847_v9 = vpop.f32.mrb[34].mxu1  ;;  %v9849_v21 = vpop.f32.mrb[32].mxu0  ;;  %v8372_v58 = vpack.c.bf16 %v2870_v39, %v2869_v35  ;;  %v8342_v61 = vpack.c.bf16 %v2856_v49, %v2855_v40  ;;  %v2438_v22 = vadd.f32 %v9817_v0, %v9865_v57  ;;  %v8376_v35 = vpack.c.bf16 %v2872_v33, %v2871_v8  ;;  %v2841_v0 = vld [vmem:[#allocation14 + $0x420] sm:$0xff]  ;;  %v2842_v39 = vld [vmem:[#allocation14 + $0x428] sm:$0xff] }
 0xf8a   :  { %v9853_v17 = vpop.f32.mrb[35].mxu1  ;;  %v9855_v32 = vpop.f32.mrb[33].mxu0  ;;  %v2874_v49 = vld [vmem:[#allocation14 + $0x528] sm:$0xff]  ;;  %v2845_v8 = vld [vmem:[#allocation14 + $0x440] sm:$0xff] }
 0xf8b   :  { %8301 = vmatpush3.bf16.msra.mxu1 %v8300_v38  ;;  %8333 = vmatpush3.bf16.msra.mxu0 %v8332_v55  ;;  %v2290_v38 = vadd.f32 %v9809_v47, %v9793_v50  ;;  %v2367_v55 = vadd.f32 %v9811_v48, %v9797_v56  ;;  %v2288_v50 = vadd.f32 %v9805_v41, %v1994_v4  ;;  %v2839_v47 = vld [vmem:[#allocation14 + $0x410] sm:$0xff]  ;;  %v2840_v48 = vld [vmem:[#allocation14 + $0x418] sm:$0xff]  ;;  %v2858_v41 = vld [vmem:[#allocation14 + $0x4a8] sm:$0xff]  ;;  %v2686_v40 = vmax.f32 %v2438_v22, 0.0 }
 0xf8c   :  { %8303 = vmatprep.subr.bf16.mxu1 %v8302_v63  ;;  %8335 = vmatprep.subr.bf16.mxu0 %v8334_v2  ;;  %v8374_v63 = vpack.c.bf16 %v2888_v52, %v2887_v51  ;;  %v2681_v2 = vmax.f32 %v2282_v20, 0.0  ;;  %v2365_v56 = vadd.f32 %v9807_v42, %v2002_v62  ;;  %v2889_v4 = vld [vmem:[#allocation14 + $0x5a0] sm:$0xff]  ;;  %v2890_v42 = vld [vmem:[#allocation14 + $0x5a8] sm:$0xff]  ;;  %v2859_v51 = vld [vmem:[#allocation14 + $0x4b0] sm:$0xff] }
 0xf8d   :  { %v2698_v12 = vmax.f32 %v2290_v38, 0.0  ;;  %v2700_v16 = vmax.f32 %v2367_v55, 0.0  ;;  %v2697_v62 = vmax.f32 %v2288_v50, 0.0  ;;  %v8378_v43 = vpack.c.bf16 %v2890_v42, %v2889_v4  ;;  %v2860_v52 = vld [vmem:[#allocation14 + $0x4b8] sm:$0xff]  ;;  %v2891_v38 = vld [vmem:[#allocation14 + $0x5b0] sm:$0xff]  ;;  %v2846_v33 = vld [vmem:[#allocation14 + $0x448] sm:$0xff] }
 0xf8e   :  { %v2892_v55 = vld [vmem:[#allocation14 + $0x5b8] sm:$0xff]  ;;  %v2875_v50 = vld [vmem:[#allocation14 + $0x530] sm:$0xff]  ;;  %v2877_v4 = vld [vmem:[#allocation14 + $0x540] sm:$0xff] }
 0xf8f   :  { %8305 = vmatpush3.bf16.msra.mxu1 %v8304_v28  ;;  %8337 = vmatpush3.bf16.msra.mxu0 %v8336_v29  ;;  %v2857_v28 = vld [vmem:[#allocation14 + $0x4a0] sm:$0xff]  ;;  %v2699_v29 = vmax.f32 %v2365_v56, 0.0  ;;  %v2876_v56 = vld [vmem:[#allocation14 + $0x538] sm:$0xff]  ;;  %v2878_v42 = vld [vmem:[#allocation14 + $0x548] sm:$0xff] }
 0xf90   :  { %8339 = vmatprep.subr.bf16.mxu1 %v8338_v30  ;;  %8371 = vmatprep.subr.bf16.mxu0 %v8370_v37  ;;  %v8344_v30 = vpack.c.bf16 %v2840_v48, %v2839_v47  ;;  %v8346_v20 = vpack.c.bf16 %v2858_v41, %v2857_v28  ;;  %v2873_v37 = vld [vmem:[#allocation14 + $0x520] sm:$0xff]  ;;  %v2862_v48 = vld [vmem:[#allocation14 + $0x4c8] sm:$0xff]  ;;  %v8384_v19 = vpack.c.bf16 %v2876_v56, %v2875_v50 }
 0xf91   :  { %v2861_v47 = vld [vmem:[#allocation14 + $0x4c0] sm:$0xff]  ;;  %v2882_v56 = vld [vmem:[#allocation14 + $0x568] sm:$0xff] }
 0xf92   :  { %3187 = vmatmul.mubr.f32.vlgmr.msra.gmra.mrb[40].mxu1 %v2681_v2  ;;  %3262 = vmatmul.mubr.f32.vlgmr.msra.gmra.mrb[38].mxu0 %v2683_v3  ;;  %v2843_v2 = vld [vmem:[#allocation14 + $0x430] sm:$0xff]  ;;  %v2844_v3 = vld [vmem:[#allocation14 + $0x438] sm:$0xff]  ;;  %v8354_v28 = vpack.c.bf16 %v2862_v48, %v2861_v47  ;;  %v2881_v50 = vld [vmem:[#allocation14 + $0x560] sm:$0xff] }
 0xf93   :  { %3191 = vmatprep.mubr.f32.mxu1 %v2698_v12  ;;  %3266 = vmatprep.mubr.f32.mxu0 %v2700_v16  ;;  %v2893_v12 = vld [vmem:[#allocation14 + $0x5c0] sm:$0xff]  ;;  %v2894_v16 = vld [vmem:[#allocation14 + $0x5c8] sm:$0xff]  ;;  %v8352_v22 = vpack.c.bf16 %v2844_v3, %v2843_v2  ;;  %v2867_v47 = vld [vmem:[#allocation14 + $0x4f0] sm:$0xff] }
 0xf94   :  { %8341 = vmatpush3.bf16.msra.mxu1 %v8340_v15  ;;  %8373 = vmatpush3.bf16.msra.mxu0 %v8372_v58  ;;  %v8348_v15 = vpack.c.bf16 %v2842_v39, %v2841_v0  ;;  %v8380_v58 = vpack.c.bf16 %v2874_v49, %v2873_v37  ;;  %v8386_v41 = vpack.c.bf16 %v2894_v16, %v2893_v12  ;;  %v2879_v37 = vld [vmem:[#allocation14 + $0x550] sm:$0xff]  ;;  %v2880_v49 = vld [vmem:[#allocation14 + $0x558] sm:$0xff]  ;;  %v2849_v2 = vld [vmem:[#allocation14 + $0x460] sm:$0xff] }
 0xf95   :  { %8343 = vmatprep.subr.bf16.mxu1 %v8342_v61  ;;  %8375 = vmatprep.subr.bf16.mxu0 %v8374_v63  ;;  %v8350_v61 = vpack.c.bf16 %v2860_v52, %v2859_v51  ;;  %v8382_v63 = vpack.c.bf16 %v2892_v55, %v2891_v38  ;;  %v8356_v0 = vpack.c.bf16 %v2846_v33, %v2845_v8  ;;  %v2865_v51 = vld [vmem:[#allocation14 + $0x4e0] sm:$0xff]  ;;  %v2866_v52 = vld [vmem:[#allocation14 + $0x4e8] sm:$0xff]  ;;  %v2868_v48 = vld [vmem:[#allocation14 + $0x4f8] sm:$0xff] }
 0xf96   :  { %3192 = vmatmul.mubr.f32.gmra.mrb[42].mxu1 %v2697_v62  ;;  %3267 = vmatmul.mubr.f32.gmra.mrb[40].mxu0 %v2699_v29  ;;  %v2863_v62 = vld [vmem:[#allocation14 + $0x4d0] sm:$0xff]  ;;  %v2864_v29 = vld [vmem:[#allocation14 + $0x4d8] sm:$0xff]  ;;  %v8388_v39 = vpack.c.bf16 %v2878_v42, %v2877_v4  ;;  %v2897_v38 = vld [vmem:[#allocation14 + $0x5e0] sm:$0xff]  ;;  %v8396_v8 = vpack.c.bf16 %v2882_v56, %v2881_v50  ;;  %v2018_v4 = vrot.slane %v9851_v7, %v9767_v6 }
 0xf97   :  { %3336 = vmatprep.mubr.f32.mxu1 %v2686_v40  ;;  %3411 = vmatprep.mubr.f32.mxu0 %v2688_v1  ;;  %v2847_v40 = vld [vmem:[#allocation14 + $0x450] sm:$0xff]  ;;  %v2848_v1 = vld [vmem:[#allocation14 + $0x458] sm:$0xff]  ;;  %v2898_v55 = vld [vmem:[#allocation14 + $0x5e8] sm:$0xff]  ;;  %v8366_v42 = vpack.c.bf16 %v2868_v48, %v2867_v47  ;;  %v9889_v50 = vrot.slane %v9851_v7, %v9786_v31 }
 0xf98   :  { %8345 = vmatpush3.bf16.msra.mxu1 %v8344_v30  ;;  %8377 = vmatpush3.bf16.msra.mxu0 %v8376_v35  ;;  %v2895_v30 = vld [vmem:[#allocation14 + $0x5d0] sm:$0xff]  ;;  %v2896_v35 = vld [vmem:[#allocation14 + $0x5d8] sm:$0xff]  ;;  %v2850_v3 = vld [vmem:[#allocation14 + $0x468] sm:$0xff] }
 0xf99   :  { %8347 = vmatprep.subr.bf16.mxu1 %v8346_v20  ;;  %8379 = vmatprep.subr.bf16.mxu0 %v8378_v43  ;;  %v8358_v20 = vpack.c.bf16 %v2864_v29, %v2863_v62  ;;  %v8390_v43 = vpack.c.bf16 %v2896_v35, %v2895_v30  ;;  %v2899_v12 = vld [vmem:[#allocation14 + $0x5f0] sm:$0xff]  ;;  %v2900_v16 = vld [vmem:[#allocation14 + $0x5f8] sm:$0xff]  ;;  %v2917_v30 = vld [vmem:[#allocation14 + $0x680] sm:$0xff] }
 0xf9a   :  { %v2851_v33 = vld [vmem:[#allocation14 + $0x470] sm:$0xff]  ;;  %v8398_v62 = vpack.c.bf16 %v2900_v16, %v2899_v12  ;;  %v2884_v29 = vld [vmem:[#allocation14 + $0x578] sm:$0xff]  ;;  %v2918_v35 = vld [vmem:[#allocation14 + $0x688] sm:$0xff] }
 0xf9c   :  { %8349 = vmatpush3.bf16.msra.mxu1 %v8348_v15  ;;  %8381 = vmatpush3.bf16.msra.mxu0 %v8380_v58  ;;  %v8360_v15 = vpack.c.bf16 %v2848_v1, %v2847_v40  ;;  %v8392_v58 = vpack.c.bf16 %v2880_v49, %v2879_v37  ;;  %v2901_v40 = vld [vmem:[#allocation14 + $0x600] sm:$0xff]  ;;  %v2902_v1 = vld [vmem:[#allocation14 + $0x608] sm:$0xff]  ;;  %v8402_v37 = vpack.c.bf16 %v2918_v35, %v2917_v30 }
 0xf9d   :  { %8351 = vmatprep.subr.bf16.mxu1 %v8350_v61  ;;  %8383 = vmatprep.subr.bf16.mxu0 %v8382_v63  ;;  %v8362_v61 = vpack.c.bf16 %v2866_v52, %v2865_v51  ;;  %v8394_v63 = vpack.c.bf16 %v2898_v55, %v2897_v38  ;;  %v2933_v49 = vld [vmem:[#allocation14 + $0x700] sm:$0xff]  ;;  %v2934_v51 = vld [vmem:[#allocation14 + $0x708] sm:$0xff]  ;;  %v2919_v52 = vld [vmem:[#allocation14 + $0x690] sm:$0xff]  ;;  %v2513_v55 = vadd.f32 %v9815_v60, %v2018_v4 }
 0xf9e   :  { %v8404_v60 = vpack.c.bf16 %v2902_v1, %v2901_v40  ;;  %v8436_v56 = vpack.c.bf16 %v2934_v51, %v2933_v49  ;;  %v2924_v49 = vld [vmem:[#allocation14 + $0x6b8] sm:$0xff]  ;;  %v2955_v51 = vld [vmem:[#allocation14 + $0x7b0] sm:$0xff] }
 0xf9f   :  { %v2687_v16 = vmax.f32 %v2513_v55, 0.0 }
 0xfa0   :  { %8353 = vmatpush3.bf16.msra.mxu1 %v8352_v22  ;;  %8385 = vmatpush3.bf16.msra.mxu0 %v8384_v19  ;;  %v2010_v22 = vrot.slane %v9851_v7, %v9764_v5  ;;  %v8364_v19 = vpack.c.bf16 %v2850_v3, %v2849_v2  ;;  %v2951_v2 = vld [vmem:[#allocation14 + $0x790] sm:$0xff]  ;;  %v2952_v3 = vld [vmem:[#allocation14 + $0x798] sm:$0xff] }
 0xfa1   :  { %8355 = vmatprep.subr.bf16.mxu1 %v8354_v28  ;;  %8387 = vmatprep.subr.bf16.mxu0 %v8386_v41  ;;  %v2852_v28 = vld [vmem:[#allocation14 + $0x478] sm:$0xff]  ;;  %v2883_v41 = vld [vmem:[#allocation14 + $0x570] sm:$0xff]  ;;  %v8438_v48 = vpack.c.bf16 %v2952_v3, %v2951_v2 }
 0xfa2   :  { %v2436_v38 = vadd.f32 %v9813_v59, %v2010_v22  ;;  %v9893_v59 = vrot.slane %v9851_v7, %v9789_v34 }
 0xfa4   :  { %8357 = vmatpush3.bf16.msra.mxu1 %v8356_v0  ;;  %8389 = vmatpush3.bf16.msra.mxu0 %v8388_v39  ;;  %v2949_v0 = vld [vmem:[#allocation14 + $0x780] sm:$0xff]  ;;  %v2950_v39 = vld [vmem:[#allocation14 + $0x788] sm:$0xff]  ;;  %v2685_v12 = vmax.f32 %v2436_v38, 0.0 }
 0xfa5   :  { %8359 = vmatprep.subr.bf16.mxu1 %v8358_v20  ;;  %8391 = vmatprep.subr.bf16.mxu0 %v8390_v43  ;;  %v8368_v20 = vpack.c.bf16 %v2852_v28, %v2851_v33  ;;  %v8400_v43 = vpack.c.bf16 %v2884_v29, %v2883_v41  ;;  %v2592_v33 = vadd.f32 %v9839_v53, %v9889_v50  ;;  %v2935_v41 = vld [vmem:[#allocation14 + $0x710] sm:$0xff]  ;;  %v2905_v53 = vld [vmem:[#allocation14 + $0x620] sm:$0xff] }
 0xfa6   :  { %v2669_v28 = vadd.f32 %v9841_v54, %v9893_v59 }
 0xfa8   :  { %8361 = vmatpush3.bf16.msra.mxu1 %v8360_v15  ;;  %8393 = vmatpush3.bf16.msra.mxu0 %v8392_v58  ;;  %v8434_v15 = vpack.c.bf16 %v2950_v39, %v2949_v0  ;;  %v2920_v58 = vld [vmem:[#allocation14 + $0x698] sm:$0xff]  ;;  %v2906_v0 = vld [vmem:[#allocation14 + $0x628] sm:$0xff]  ;;  %v2690_v39 = vmax.f32 %v2592_v33, 0.0  ;;  %v2692_v54 = vmax.f32 %v2669_v28, 0.0  ;;  %v2927_v33 = vld [vmem:[#allocation14 + $0x6d0] sm:$0xff] }
 0xfa9   :  { %8363 = vmatprep.subr.bf16.mxu1 %v8362_v61  ;;  %8395 = vmatprep.subr.bf16.mxu0 %v8394_v63  ;;  %v2444_v61 = vadd.f32 %v9825_v25, %v9865_v57  ;;  %v2521_v63 = vadd.f32 %v9827_v26, %v9869_v14  ;;  %v8406_v47 = vpack.c.bf16 %v2920_v58, %v2919_v52  ;;  %v2903_v57 = vld [vmem:[#allocation14 + $0x610] sm:$0xff]  ;;  %v2904_v14 = vld [vmem:[#allocation14 + $0x618] sm:$0xff] }
 0xfaa   :  { %v2442_v25 = vadd.f32 %v9821_v13, %v2010_v22  ;;  %v2519_v26 = vadd.f32 %v9823_v23, %v2018_v4  ;;  %v2922_v13 = vld [vmem:[#allocation14 + $0x6a8] sm:$0xff]  ;;  %v2953_v22 = vld [vmem:[#allocation14 + $0x7a0] sm:$0xff]  ;;  %v8408_v30 = vpack.c.bf16 %v2904_v14, %v2903_v57  ;;  %v2956_v52 = vld [vmem:[#allocation14 + $0x7b8] sm:$0xff]  ;;  %v8412_v38 = vpack.c.bf16 %v2906_v0, %v2905_v53 }
 0xfab   :  { %v2954_v23 = vld [vmem:[#allocation14 + $0x7a8] sm:$0xff]  ;;  %v2908_v58 = vld [vmem:[#allocation14 + $0x638] sm:$0xff]  ;;  %v8446_v3 = vpack.c.bf16 %v2956_v52, %v2955_v51  ;;  %v2929_v53 = vld [vmem:[#allocation14 + $0x6e0] sm:$0xff] }
 0xfac   :  { %8365 = vmatpush3.bf16.msra.mxu1 %v8364_v19  ;;  %8397 = vmatpush3.bf16.msra.mxu0 %v8396_v8  ;;  %v2702_v19 = vmax.f32 %v2444_v61, 0.0  ;;  %v2704_v8 = vmax.f32 %v2521_v63, 0.0  ;;  %v2701_v4 = vmax.f32 %v2442_v25, 0.0  ;;  %v2703_v29 = vmax.f32 %v2519_v26, 0.0  ;;  %v2939_v61 = vld [vmem:[#allocation14 + $0x730] sm:$0xff]  ;;  %v2940_v63 = vld [vmem:[#allocation14 + $0x738] sm:$0xff] }
 0xfad   :  { %8367 = vmatprep.subr.bf16.mxu1 %v8366_v42  ;;  %8399 = vmatprep.subr.bf16.mxu0 %v8398_v62  ;;  %v2936_v42 = vld [vmem:[#allocation14 + $0x718] sm:$0xff]  ;;  %v2921_v62 = vld [vmem:[#allocation14 + $0x6a0] sm:$0xff]  ;;  %v8442_v1 = vpack.c.bf16 %v2954_v23, %v2953_v22  ;;  %v2910_v26 = vld [vmem:[#allocation14 + $0x648] sm:$0xff] }
 0xfae   :  { %v8440_v35 = vpack.c.bf16 %v2936_v42, %v2935_v41  ;;  %v8410_v40 = vpack.c.bf16 %v2922_v13, %v2921_v62  ;;  %v2909_v25 = vld [vmem:[#allocation14 + $0x640] sm:$0xff]  ;;  %v2928_v28 = vld [vmem:[#allocation14 + $0x6d8] sm:$0xff]  ;;  %v2959_v41 = vld [vmem:[#allocation14 + $0x7d0] sm:$0xff] }
 0xfaf   :  { %v2960_v42 = vld [vmem:[#allocation14 + $0x7d8] sm:$0xff]  ;;  %v8420_v62 = vpack.c.bf16 %v2910_v26, %v2909_v25  ;;  %v2911_v22 = vld [vmem:[#allocation14 + $0x650] sm:$0xff]  ;;  %v2930_v0 = vld [vmem:[#allocation14 + $0x6e8] sm:$0xff] }
 0xfb0   :  { %8369 = vmatpush3.bf16.msra.mxu1 %v8368_v20  ;;  %8401 = vmatpush3.bf16.msra.mxu0 %v8400_v43  ;;  %v2937_v20 = vld [vmem:[#allocation14 + $0x720] sm:$0xff]  ;;  %v2938_v43 = vld [vmem:[#allocation14 + $0x728] sm:$0xff]  ;;  %v2912_v23 = vld [vmem:[#allocation14 + $0x658] sm:$0xff] }
 0xfb1   :  { %8403 = vmatprep.subr.bf16.mxu1 %v8402_v37  ;;  %8435 = vmatprep.subr.bf16.mxu0 %v8434_v15  ;;  %v2923_v37 = vld [vmem:[#allocation14 + $0x6b0] sm:$0xff]  ;;  %v8444_v55 = vpack.c.bf16 %v2938_v43, %v2937_v20  ;;  %v2913_v20 = vld [vmem:[#allocation14 + $0x660] sm:$0xff]  ;;  %v2914_v43 = vld [vmem:[#allocation14 + $0x668] sm:$0xff] }
 0xfb2   :  { %v2907_v15 = vld [vmem:[#allocation14 + $0x630] sm:$0xff]  ;;  %v8414_v2 = vpack.c.bf16 %v2924_v49, %v2923_v37  ;;  %v8426_v37 = vpack.c.bf16 %v2930_v0, %v2929_v53  ;;  %v2945_v51 = vld [vmem:[#allocation14 + $0x760] sm:$0xff]  ;;  %v2946_v52 = vld [vmem:[#allocation14 + $0x768] sm:$0xff] }
 0xfb3   :  { %3337 = vmatmul.mubr.f32.vlgmr.msra.gmra.mrb[44].mxu1 %v2685_v12  ;;  %3412 = vmatmul.mubr.f32.vlgmr.msra.gmra.mrb[42].mxu0 %v2687_v16  ;;  %v8416_v12 = vpack.c.bf16 %v2908_v58, %v2907_v15  ;;  %v8448_v16 = vpack.c.bf16 %v2940_v63, %v2939_v61  ;;  %v2963_v15 = vld [vmem:[#allocation14 + $0x7f0] sm:$0xff]  ;;  %v2964_v58 = vld [vmem:[#allocation14 + $0x7f8] sm:$0xff]  ;;  %v8460_v61 = vpack.c.bf16 %v2946_v52, %v2945_v51 }
 0xfb4   :  { %3341 = vmatprep.mubr.f32.mxu1 %v2702_v19  ;;  %3416 = vmatprep.mubr.f32.mxu0 %v2704_v8  ;;  %v2941_v19 = vld [vmem:[#allocation14 + $0x740] sm:$0xff]  ;;  %v2942_v8 = vld [vmem:[#allocation14 + $0x748] sm:$0xff]  ;;  %v2915_v63 = vld [vmem:[#allocation14 + $0x670] sm:$0xff] }
 0xfb5   :  { %8405 = vmatpush3.bf16.msra.mxu1 %v8404_v60  ;;  %8437 = vmatpush3.bf16.msra.mxu0 %v8436_v56  ;;  %v2925_v60 = vld [vmem:[#allocation14 + $0x6c0] sm:$0xff]  ;;  %v2926_v56 = vld [vmem:[#allocation14 + $0x6c8] sm:$0xff]  ;;  %v8452_v13 = vpack.c.bf16 %v2942_v8, %v2941_v19  ;;  %v2675_v19 = vadd.f32 %v9855_v32, %v9893_v59 }
 0xfb6   :  { %8407 = vmatprep.subr.bf16.mxu1 %v8406_v47  ;;  %8439 = vmatprep.subr.bf16.mxu0 %v8438_v48  ;;  %v2957_v47 = vld [vmem:[#allocation14 + $0x7c0] sm:$0xff]  ;;  %v2958_v48 = vld [vmem:[#allocation14 + $0x7c8] sm:$0xff]  ;;  %v8418_v57 = vpack.c.bf16 %v2926_v56, %v2925_v60  ;;  %v2034_v60 = vrot.slane %v9851_v7, %v9833_v36 }
 0xfb7   :  { %3342 = vmatmul.mubr.f32.gmra.mrb[46].mxu1 %v2701_v4  ;;  %3417 = vmatmul.mubr.f32.gmra.mrb[44].mxu0 %v2703_v29  ;;  %v8450_v14 = vpack.c.bf16 %v2958_v48, %v2957_v47  ;;  %v8422_v4 = vpack.c.bf16 %v2928_v28, %v2927_v33  ;;  %v8454_v29 = vpack.c.bf16 %v2960_v42, %v2959_v41  ;;  %v2916_v48 = vld [vmem:[#allocation14 + $0x678] sm:$0xff] }
 0xfb8   :  { %3486 = vmatprep.mubr.f32.mxu1 %v2690_v39  ;;  %3561 = vmatprep.mubr.f32.mxu0 %v2692_v54  ;;  %v2961_v39 = vld [vmem:[#allocation14 + $0x7e0] sm:$0xff]  ;;  %v2962_v54 = vld [vmem:[#allocation14 + $0x7e8] sm:$0xff]  ;;  %v8462_v47 = vpack.c.bf16 %v2964_v58, %v2963_v15  ;;  %v8432_v25 = vpack.c.bf16 %v2916_v48, %v2915_v63  ;;  %v2673_v41 = vadd.f32 %v9849_v21, %v2034_v60 }
 0xfb9   :  { %8409 = vmatpush3.bf16.msra.mxu1 %v8408_v30  ;;  %8441 = vmatpush3.bf16.msra.mxu0 %v8440_v35  ;;  %v2943_v30 = vld [vmem:[#allocation14 + $0x750] sm:$0xff]  ;;  %v2944_v35 = vld [vmem:[#allocation14 + $0x758] sm:$0xff]  ;;  %v8458_v49 = vpack.c.bf16 %v2962_v54, %v2961_v39 }
 0xfba   :  { %8411 = vmatprep.subr.bf16.mxu1 %v8410_v40  ;;  %8443 = vmatprep.subr.bf16.mxu0 %v8442_v1  ;;  %v8424_v40 = vpack.c.bf16 %v2912_v23, %v2911_v22  ;;  %v8456_v1 = vpack.c.bf16 %v2944_v35, %v2943_v30 }
 0xfbd   :  { %8413 = vmatpush3.bf16.msra.mxu1 %v8412_v38  ;;  %8445 = vmatpush3.bf16.msra.mxu0 %v8444_v55  ;;  %v2931_v38 = vld [vmem:[#allocation14 + $0x6f0] sm:$0xff]  ;;  %v2932_v55 = vld [vmem:[#allocation14 + $0x6f8] sm:$0xff] }
 0xfbe   :  { %8415 = vmatprep.subr.bf16.mxu1 %v8414_v2  ;;  %8447 = vmatprep.subr.bf16.mxu0 %v8446_v3  ;;  %v2026_v2 = vrot.slane %v9851_v7, %v9830_v27  ;;  %v8428_v3 = vpack.c.bf16 %v2914_v43, %v2913_v20  ;;  %v8430_v56 = vpack.c.bf16 %v2932_v55, %v2931_v38 }
 0xfbf   :  { %v2598_v7 = vadd.f32 %v9853_v17, %v9889_v50  ;;  %v2707_v50 = vmax.f32 %v2673_v41, 0.0 }
 0xfc0   :  { %v2596_v28 = vadd.f32 %v9847_v9, %v2026_v2  ;;  %v7107_v9 = vld [vmem:[#allocation16] ss:$0 sm:$0xff] }
 0xfc1   :  { %8417 = vmatpush3.bf16.msra.mxu1 %v8416_v12  ;;  %8449 = vmatpush3.bf16.msra.mxu0 %v8448_v16  ;;  %v2947_v12 = vld [vmem:[#allocation14 + $0x770] sm:$0xff]  ;;  %v2948_v16 = vld [vmem:[#allocation14 + $0x778] sm:$0xff] }
 0xfc2   :  { %8419 = vmatprep.subr.bf16.mxu1 %v8418_v57  ;;  %8451 = vmatprep.subr.bf16.mxu0 %v8450_v14  ;;  %v8464_v26 = vpack.c.bf16 %v2948_v16, %v2947_v12  ;;  %v2590_v57 = vadd.f32 %v9835_v45, %v2026_v2  ;;  %v2667_v14 = vadd.f32 %v9837_v46, %v2034_v60  ;;  %v2706_v45 = vmax.f32 %v2598_v7, 0.0 }
 0xfc3   :  { %v2708_v46 = vmax.f32 %v2675_v19, 0.0  ;;  %v2705_v17 = vmax.f32 %v2596_v28, 0.0 }
 0xfc4   :  { %v2689_v8 = vmax.f32 %v2590_v57, 0.0  ;;  %v2691_v33 = vmax.f32 %v2667_v14, 0.0 }
 0xfc5   :  { %8421 = vmatpush3.bf16.msra.mxu1 %v8420_v62  ;;  %8453 = vmatpush3.bf16.msra.mxu0 %v8452_v13 }
 0xfc6   :  { %8423 = vmatprep.subr.bf16.mxu1 %v8422_v4  ;;  %8455 = vmatprep.subr.bf16.mxu0 %v8454_v29 }
 0xfc9   :  { %8425 = vmatpush3.bf16.msra.mxu1 %v8424_v40  ;;  %8457 = vmatpush3.bf16.msra.mxu0 %v8456_v1 }
 0xfca   :  { %8427 = vmatprep.subr.bf16.mxu1 %v8426_v37  ;;  %8459 = vmatprep.subr.bf16.mxu0 %v8458_v49 }
 0xfcd   :  { %8429 = vmatpush3.bf16.msra.mxu1 %v8428_v3  ;;  %8461 = vmatpush3.bf16.msra.mxu0 %v8460_v61 }
 0xfce   :  { %8431 = vmatprep.subr.bf16.mxu1 %v8430_v56  ;;  %8463 = vmatprep.subr.bf16.mxu0 %v8462_v47 }
 0xfd1   :  { %8433 = vmatpush3.bf16.msra.mxu1 %v8432_v25  ;;  %8465 = vmatpush3.bf16.msra.mxu0 %v8464_v26 }
 0xfd2   :  { %8017 = vmatprep.subr.mxu0 %v9220_v18 }
 0xfd4   :  { %3487 = vmatmul.mubr.f32.vlgmr.msra.gmra.mrb[48].mxu1 %v2689_v8  ;;  %3562 = vmatmul.mubr.f32.vlgmr.msra.gmra.mrb[46].mxu0 %v2691_v33 }
 0xfd5   :  { %3491 = vmatprep.mubr.f32.mxu1 %v2706_v45  ;;  %3566 = vmatprep.mubr.f32.mxu0 %v2708_v46 }
 0xfd8   :  { %3492 = vmatmul.mubr.f32.gmra.mrb[50].mxu1 %v2705_v17  ;;  %3567 = vmatmul.mubr.f32.gmra.mrb[48].mxu0 %v2707_v50 }
 0xfd9   :  { %8019 = vmatprep.mubr.msk.f32.mxu0 %vm9221_vm4, %v9220_v18 }
0x1045   :  { %v7254_v32 = vpop.f32.mrb[36].mxu1  ;;  %v7292_v59 = vpop.f32.mrb[34].mxu0 }
0x1046   :  { %v7255_v42 = vpop.f32.mrb[37].mxu1  ;;  %v7293_v21 = vpop.f32.mrb[35].mxu0 }
0x1047   :  { %v7256_v62 = vadd.f32 %v7255_v42, %v7254_v32  ;;  %v7294_v13 = vadd.f32 %v7293_v21, %v7292_v59 }
0x1049   :  { %v3039_v22 = vadd.f32 %v7256_v62, %v7107_v9 }
0x104b   :  { %v3114_v23 = vadd.f32 %v7294_v13, %v3039_v22 }
0x104c   :  { %v7257_v4 = vpop.f32.mrb[38].mxu1  ;;  %v7295_v29 = vpop.f32.mrb[36].mxu0 }
0x104d   :  { %v7258_v30 = vpop.f32.mrb[39].mxu1  ;;  %v7296_v35 = vpop.f32.mrb[37].mxu0 }
0x104e   :  { %v7259_v53 = vadd.f32 %v7258_v30, %v7257_v4  ;;  %v7297_v0 = vadd.f32 %v7296_v35, %v7295_v29 }
0x1050   :  { %v3044_v39 = vadd.f32 %v7259_v53, %v7107_v9 }
0x1052   :  { %v3119_v54 = vadd.f32 %v7297_v0, %v3044_v39 }
0x1065   :  { %v7330_v40 = vpop.f32.mrb[40].mxu1  ;;  %v7368_v1 = vpop.f32.mrb[38].mxu0 }
0x1066   :  { %v7331_v20 = vpop.f32.mrb[41].mxu1  ;;  %v7369_v43 = vpop.f32.mrb[39].mxu0 }
0x1067   :  { %v7332_v37 = vadd.f32 %v7331_v20, %v7330_v40  ;;  %v7370_v49 = vadd.f32 %v7369_v43, %v7368_v1  ;;  %v3623_v43 = vld [vmem:[#allocation5 + $0x20] sm:$0xff] }
0x1069   :  { %v3189_v51 = vadd.f32 %v7332_v37, %v3114_v23  ;;  %v7333_v52 = vpop.f32.mrb[42].mxu1  ;;  %v7371_v38 = vpop.f32.mrb[40].mxu0  ;;  %v3625_v37 = vld [vmem:[#allocation5 + $0x30] sm:$0xff] }
0x106a   :  { %v7334_v55 = vpop.f32.mrb[43].mxu1  ;;  %v7372_v15 = vpop.f32.mrb[41].mxu0 }
0x106b   :  { %v3264_v58 = vadd.f32 %v7370_v49, %v3189_v51  ;;  %v7335_v2 = vadd.f32 %v7334_v55, %v7333_v52  ;;  %v7373_v3 = vadd.f32 %v7372_v15, %v7371_v38  ;;  %v3626_v51 = vld [vmem:[#allocation5 + $0x38] sm:$0xff] }
0x106c   :  { %v8470_v52 = vpack.c.bf16 %v3626_v51, %v3625_v37 }
0x106d   :  { %v3194_v61 = vadd.f32 %v7335_v2, %v3119_v54 }
0x106f   :  { %v3269_v63 = vadd.f32 %v7373_v3, %v3194_v61 }
0x1086   :  { %v7406_v60 = vpop.f32.mrb[44].mxu1  ;;  %v7444_v56 = vpop.f32.mrb[42].mxu0 }
0x1087   :  { %v7407_v47 = vpop.f32.mrb[45].mxu1  ;;  %v7445_v48 = vpop.f32.mrb[43].mxu0 }
0x1088   :  { %v7408_v12 = vadd.f32 %v7407_v47, %v7406_v60  ;;  %v7446_v16 = vadd.f32 %v7445_v48, %v7444_v56 }
0x108a   :  { %v3339_v25 = vadd.f32 %v7408_v12, %v3264_v58  ;;  %v7409_v26 = vpop.f32.mrb[46].mxu1  ;;  %v7447_v57 = vpop.f32.mrb[44].mxu0 }
0x108b   :  { %v7410_v14 = vpop.f32.mrb[47].mxu1  ;;  %v7448_v7 = vpop.f32.mrb[45].mxu0 }
0x108c   :  { %v3414_v19 = vadd.f32 %v7446_v16, %v3339_v25  ;;  %v7411_v8 = vadd.f32 %v7410_v14, %v7409_v26  ;;  %v7449_v33 = vadd.f32 %v7448_v7, %v7447_v57  ;;  %v7108_v26 = vld [vmem:[%s10341_s13] ss:$0 sm:$0xff] }
0x108d   :  { %v7109_v14 = vld [vmem:[%s10342_s14] ss:$0 sm:$0xff] }
0x108e   :  { %v3344_v28 = vadd.f32 %v7411_v8, %v3269_v63 }
0x1090   :  { %v3419_v41 = vadd.f32 %v7449_v33, %v3344_v28 }
0x10a7   :  { %v7482_v45 = vpop.f32.mrb[48].mxu1  ;;  %v7520_v46 = vpop.f32.mrb[46].mxu0 }
0x10a8   :  { %v7483_v17 = vpop.f32.mrb[49].mxu1  ;;  %v7521_v50 = vpop.f32.mrb[47].mxu0 }
0x10a9   :  { %v7484_v32 = vadd.f32 %v7483_v17, %v7482_v45  ;;  %v7522_v59 = vadd.f32 %v7521_v50, %v7520_v46  ;;  %v7110_v46 = vld [vmem:[#allocation7 + $0x1] ss:$0 sm:$0xff] }
0x10ab   :  { %v3489_v9 = vadd.f32 %v7484_v32, %v3414_v19  ;;  %v7485_v42 = vpop.f32.mrb[50].mxu1  ;;  %v7523_v21 = vpop.f32.mrb[48].mxu0 }
0x10ac   :  { %v7486_v62 = vpop.f32.mrb[51].mxu1  ;;  %v7524_v13 = vpop.f32.mrb[49].mxu0 }
0x10ad   :  { %v3564_v22 = vadd.f32 %v7522_v59, %v3489_v9  ;;  %v7487_v23 = vadd.f32 %v7486_v62, %v7485_v42  ;;  %v7525_v4 = vadd.f32 %v7524_v13, %v7523_v21 }
0x10af   :  { %v3572_v29 = vadd.f32 %v3564_v22, %v9709_v24  ;;  %v3494_v30 = vadd.f32 %v7487_v23, %v3419_v41  ;;  %v3624_v24 = vld [vmem:[#allocation5 + $0x28] sm:$0xff] }
0x10b0   :  { %v8466_v49 = vpack.c.bf16 %v3624_v24, %v3623_v43 }
0x10b1   :  { %v3569_v35 = vadd.f32 %v7525_v4, %v3494_v30  ;;  %v3578_v53 = vsel %vm323_vm3, %v3572_v29, 0.0  ;;  %v3576_v0 = vmul.f32 %v3572_v29, %v3572_v29 }
0x10b2   :  { %3579 = vadd.xlane.f32.xlu1 %v3578_v53  ;;  %8467 = vmatprep.subr.bf16.mxu1 %v8466_v49 }
0x10b3   :  { %v3573_v39 = vadd.f32 %v3569_v35, %v9718_v44  ;;  %v3584_v40 = vsel %vm323_vm3, %v3576_v0, 0.0  ;;  %8469 = vmatpush3.bf16.msra.mxu1 %v8466_v49 }
0x10b4   :  { %8471 = vmatprep.subr.bf16.mxu1 %v8470_v52 }
0x10b5   :  { %v3581_v54 = vsel %vm323_vm3, %v3573_v39, 0.0  ;;  %v3577_v1 = vmul.f32 %v3573_v39, %v3573_v39 }
0x10b6   :  { %3582 = vadd.xlane.f32.xlu0 %v3581_v54  ;;  %3585 = vadd.xlane.f32.xlu1 %v3584_v40 }
0x10b7   :  { %v3587_v20 = vsel %vm323_vm3, %v3577_v1, 0.0  ;;  %8473 = vmatpush3.bf16.msra.mxu1 %v8470_v52 }
0x10b8   :  { %8012 = vmatprep.subr.mxu1 %v9220_v18 }
0x10ba   :  { %3588 = vadd.xlane.f32.xlu0 %v3587_v20 }
0x113f   :  { %v3580_v44 = vpop.xlane.xlu1 %3579 }
0x1140   :  { %v3590_v38 = vmul.f32 0.03125, %v3580_v44 }
0x1142   :  { %v3594_v58 = vmul.f32 %v3590_v38, %v3590_v38  ;;  %v3598_v16 = vsub.f32 %v3572_v29, %v3590_v38 }
0x1143   :  { %v3583_v55 = vpop.xlane.xlu0 %3582  ;;  %v3586_v15 = vpop.xlane.xlu1 %3585 }
0x1144   :  { %v3591_v2 = vmul.f32 0.03125, %v3583_v55  ;;  %v3592_v3 = vmul.f32 0.03125, %v3586_v15 }
0x1146   :  { %v3596_v61 = vsub.f32 %v3592_v3, %v3594_v58  ;;  %v3595_v60 = vmul.f32 %v3591_v2, %v3591_v2  ;;  %v3599_v7 = vsub.f32 %v3573_v39, %v3591_v2 }
0x1147   :  { %v3589_v63 = vpop.xlane.xlu0 %3588 }
0x1148   :  { %v3600_v56 = vadd.f32 1e-05, %v3596_v61  ;;  %v3593_v47 = vmul.f32 0.03125, %v3589_v63 }
0x114a   :  { %8880 = vrsqrt.f32 %v3600_v56  ;;  %v3597_v48 = vsub.f32 %v3593_v47, %v3595_v60 }
0x114c   :  { %v3601_v12 = vadd.f32 1e-05, %v3597_v48 }
0x114e   :  { %8882 = vrsqrt.f32 %v3601_v12 }
0x1154   :  { %v8881_v25 = vpop.eup %8880 }
0x1155   :  { %v3604_v57 = vmul.f32 %v8881_v25, %v3598_v16 }
0x1157   :  { %v3612_v19 = vmul.f32 %v7108_v26, %v3604_v57 }
0x1158   :  { %v8883_v8 = vpop.eup %8882 }
0x1159   :  { %v3605_v33 = vmul.f32 %v8883_v8, %v3599_v7  ;;  %v9929_v28 = vadd.f32 %v7109_v14, %v3612_v19 }
0x115b   :  { %v3613_v41 = vmul.f32 %v7108_v26, %v3605_v33  ;;  %8009 = vmatprep.mubr.msk.f32.mxu1 %vm323_vm3, %v9929_v28 }
0x115d   :  { %v9933_v45 = vadd.f32 %v7109_v14, %v3613_v41 }
0x115f   :  { %8010 = vmatmul.mubr.msk.f32.vlgmr.msra.gmra.mrb[52].mxu1 %vm323_vm3, %v9933_v45 }
0x1160   :  { %8014 = vmatprep.mubr.msk.f32.mxu1 %vm9221_vm4, %v9220_v18 }
0x1232   :  { %v8011_v17 = vpop.f32.mrb[52].mxu1 }
0x1233   :  { %v9939_v50 = vadd.f32 %v8011_v17, %v7110_v46  ;;  %v3707_v32 = vpop.f32.mrb[53].mxu1 }
0x1234   :  { %v9941_v59 = vadd.f32 %v7110_v46, %v3707_v32 }
0x1235   :  { %3794 = vrot.lane.b32.xlu0 %v9939_v50, %s9222_s2 }
0x1236   :  { %3717 = vrot.lane.b32.xlu1 %v9941_v59, %s9222_s2 }
0x12a7   :  { %v3795_v9 = vpop.permute.xlu0 %3794 }
0x12a8   :  { %8018 = vmatpush3.xpose.msk.msra.mxu0 %vm408_vm5, %v3795_v9  ;;  %v3718_v42 = vpop.permute.xlu1 %3717 }
0x12a9   :  { %8013 = vmatpush3.xpose.msk.msra.mxu1 %vm408_vm5, %v3718_v42  ;;  %8027 = vmatprep.subr.mxu0 %v9220_v18 }
0x12aa   :  { %8022 = vmatprep.subr.mxu1 %v9220_v18 }
0x12ab   :  { %8020 = vmatmul.mubr.msk.f32.vlgmr.msra.gmra.mrb[50].mxu0 %vm408_vm5, %v9939_v50 }
0x12ac   :  { %8015 = vmatmul.mubr.msk.f32.vlgmr.msra.gmra.mrb[54].mxu1 %vm408_vm5, %v9941_v59  ;;  %8029 = vmatprep.mubr.msk.f32.mxu0 %vm9221_vm4, %v9220_v18 }
0x12ad   :  { %8024 = vmatprep.mubr.msk.f32.mxu1 %vm9221_vm4, %v9220_v18 }
0x137e   :  { %v3866_v21 = vpop.f32.mrb[50].mxu0 }
0x137f   :  { %v3871_v62 = vmul.f32 0.35355338, %v3866_v21  ;;  %v3789_v13 = vpop.f32.mrb[54].mxu1  ;;  %v8021_v22 = vpop.f32.mrb[51].mxu0 }
0x1380   :  { %v3870_v23 = vmul.f32 0.35355338, %v3789_v13  ;;  %v8016_v4 = vpop.f32.mrb[55].mxu1 }
0x1381   :  { %v3875_v29 = vsel %vm408_vm5, %v3871_v62, -inf }
0x1382   :  { %3876 = vmax.xlane.f32.xlu0 %v3875_v29  ;;  %v3872_v30 = vsel %vm408_vm5, %v3870_v23, -inf }
0x1383   :  { %3873 = vmax.xlane.f32.xlu1 %v3872_v30 }
0x1394   :  { %3894 = vrot.lane.b32.xlu1 %v9941_v59, %s9223_s5 }
0x1398   :  { %3970 = vrot.lane.b32.xlu0 %v9939_v50, %s9223_s5  ;;  %4048 = vrot.lane.b32.xlu1 %v9941_v59, %s9224_s29 }
0x139c   :  { %4126 = vrot.lane.b32.xlu1 %v9939_v50, %s9224_s29  ;;  %s9234_s29 = smov [#allocation20]  }
0x140f   :  { %v3877_v35 = vpop.xlane.xlu0 %3876 }
0x1410   :  { %v3879_v53 = vsub.f32 %v3871_v62, %v3877_v35  ;;  %v3874_v0 = vpop.xlane.xlu1 %3873 }
0x1411   :  { %v3878_v39 = vsub.f32 %v3870_v23, %v3874_v0 }
0x1412   :  { %v3882_v54 = vmul.f32 1.442695, %v3879_v53 }
0x1413   :  { %v3880_v40 = vmul.f32 1.442695, %v3878_v39  ;;  %v3971_v1 = vpop.permute.xlu0 %3970 }
0x1414   :  { %8884 = vpow2.f32 %v3882_v54  ;;  %8028 = vmatpush3.msra.mxu0 %v3971_v1  ;;  %v3895_v20 = vpop.permute.xlu1 %3894 }
0x1415   :  { %8886 = vpow2.f32 %v3880_v40  ;;  %8023 = vmatpush3.msra.mxu1 %v3895_v20  ;;  %8037 = vmatprep.subr.mxu0 %v9220_v18 }
0x1416   :  { %8032 = vmatprep.subr.mxu1 %v9220_v18 }
0x1418   :  { %v4049_v51 = vpop.permute.xlu1 %4048 }
0x141c   :  { %v4127_v52 = vpop.permute.xlu1 %4126 }
0x141e   :  { %v8885_v43 = vpop.eup %8884 }
0x141f   :  { %v8887_v24 = vpop.eup %8886  ;;  %v3887_v37 = vsel %vm408_vm5, %v8885_v43, 0.0 }
0x1420   :  { %3888 = vadd.xlane.f32.xlu0 %v3887_v37  ;;  %v3884_v49 = vsel %vm408_vm5, %v8887_v24, 0.0 }
0x1421   :  { %3885 = vadd.xlane.f32.xlu1 %v3884_v49 }
0x1432   :  { %4124 = vrot.lane.b32.xlu1 %v9939_v50, %s9225_s30 }
0x1436   :  { %4046 = vrot.lane.b32.xlu0 %v9941_v59, %s9225_s30  ;;  %s7038_s30 = sshll.u32 %s9234_s29, 4  ;;  %s7039_s30 = int_to_ptr.vmem [resolvable:$true] %s7038_s30 }
0x1437   :  { %p9171_p5 = scmp.lt.s32.totalorder %s7039_s30, %s7039_s30 }
0x14ad   :  { %v3889_v44 = vpop.xlane.xlu0 %3888 }
0x14ae   :  { %8888 = vrcp.f32 %v3889_v44  ;;  %v3886_v38 = vpop.xlane.xlu1 %3885 }
0x14af   :  { %8890 = vrcp.f32 %v3886_v38 }
0x14b1   :  { %v4047_v61 = vpop.permute.xlu0 %4046 }
0x14b2   :  { %v4125_v3 = vpop.permute.xlu1 %4124 }
0x14b8   :  { %v8889_v55 = vpop.eup %8888 }
0x14b9   :  { %v8891_v15 = vpop.eup %8890  ;;  %v3893_v58 = vmul.f32 %v8889_v55, %v8885_v43 }
0x14ba   :  { %v3892_v2 = vmul.f32 %v8891_v15, %v8887_v24 }
0x14bb   :  { %8030 = vmatmul.mubr.msk.f32.vlgmr.msra.gmra.mrb[52].mxu0 %vm408_vm5, %v3893_v58 }
0x14bc   :  { %8038 = vmatpush3.xpose.msk.msra.mxu0 %vm408_vm5, %v4127_v52  ;;  %8025 = vmatmul.mubr.msk.f32.vlgmr.msra.gmra.mrb[56].mxu1 %vm408_vm5, %v3892_v2 }
0x14bd   :  { %8033 = vmatpush3.xpose.msk.msra.mxu1 %vm408_vm5, %v4049_v51  ;;  %8039 = vmatprep.mubr.msk.f32.mxu0 %vm9221_vm4, %v9220_v18 }
0x14be   :  { %8034 = vmatprep.mubr.msk.f32.mxu1 %vm9221_vm4, %v9220_v18  ;;  %8042 = vmatprep.subr.mxu1 %v9220_v18 }
0x14bf   :  { %8040 = vmatmul.mubr.msk.f32.vlgmr.msra.gmra.mrb[54].mxu0 %vm408_vm5, %v4125_v3  ;;  %8047 = vmatprep.subr.mxu0 %v9220_v18 }
0x14c0   :  { %8035 = vmatmul.mubr.msk.f32.vlgmr.msra.gmra.mrb[58].mxu1 %vm408_vm5, %v4047_v61  ;;  %8049 = vmatprep.mubr.msk.f32.mxu0 %vm9221_vm4, %v9220_v18 }
0x14c1   :  { %8044 = vmatprep.mubr.msk.f32.mxu1 %vm9221_vm4, %v9220_v18 }
0x158e   :  { %v9993_v63 = vpop.f32.mrb[52].mxu0 }
0x158f   :  { %v9995_v60 = vpop.f32.mrb[56].mxu1  ;;  %v8031_v56 = vpop.f32.mrb[53].mxu0 }
0x1590   :  { %v8026_v47 = vpop.f32.mrb[57].mxu1 }
0x1592   :  { %v4198_v48 = vpop.f32.mrb[54].mxu0 }
0x1593   :  { %v4203_v12 = vmul.f32 0.35355338, %v4198_v48  ;;  %v4120_v16 = vpop.f32.mrb[58].mxu1  ;;  %v8041_v25 = vpop.f32.mrb[55].mxu0 }
0x1594   :  { %v4202_v26 = vmul.f32 0.35355338, %v4120_v16  ;;  %v8036_v57 = vpop.f32.mrb[59].mxu1 }
0x1595   :  { %v4207_v14 = vsel %vm408_vm5, %v4203_v12, -inf }
0x1596   :  { %4208 = vmax.xlane.f32.xlu1 %v4207_v14  ;;  %v4204_v7 = vsel %vm408_vm5, %v4202_v26, -inf }
0x1597   :  { %4205 = vmax.xlane.f32.xlu0 %v4204_v7 }
0x15a7   :  { %4226 = vrot.lane.b32.xlu1 %v9941_v59, %s9226_s11 }
0x15ab   :  { %4380 = vrot.lane.b32.xlu1 %v9941_v59, %s9227_s6 }
0x15ad   :  { %4302 = vrot.lane.b32.xlu0 %v9939_v50, %s9226_s11 }
0x15af   :  { %4458 = vrot.lane.b32.xlu1 %v9939_v50, %s9227_s6 }
0x15b3   :  { %4456 = vrot.lane.b32.xlu1 %v9939_v50, %s9228_s28 }
0x1623   :  { %v4209_v19 = vpop.xlane.xlu1 %4208 }
0x1624   :  { %v4211_v8 = vsub.f32 %v4203_v12, %v4209_v19  ;;  %v4206_v33 = vpop.xlane.xlu0 %4205 }
0x1625   :  { %v4210_v41 = vsub.f32 %v4202_v26, %v4206_v33 }
0x1626   :  { %v4214_v46 = vmul.f32 1.442695, %v4211_v8 }
0x1627   :  { %v4212_v17 = vmul.f32 1.442695, %v4210_v41  ;;  %v4227_v32 = vpop.permute.xlu1 %4226 }
0x1628   :  { %8892 = vpow2.f32 %v4214_v46  ;;  %8043 = vmatpush3.msra.mxu1 %v4227_v32  ;;  %v4303_v9 = vpop.permute.xlu0 %4302 }
0x1629   :  { %8048 = vmatpush3.msra.mxu0 %v4303_v9  ;;  %8052 = vmatprep.subr.mxu1 %v9220_v18  ;;  %8894 = vpow2.f32 %v4212_v17 }
0x162a   :  { %8057 = vmatprep.subr.mxu0 %v9220_v18 }
0x162b   :  { %v4381_v4 = vpop.permute.xlu1 %4380 }
0x162f   :  { %v4459_v30 = vpop.permute.xlu1 %4458 }
0x1632   :  { %v8893_v42 = vpop.eup %8892 }
0x1633   :  { %v4219_v21 = vsel %vm408_vm5, %v8893_v42, 0.0  ;;  %v8895_v62 = vpop.eup %8894  ;;  %v4457_v39 = vpop.permute.xlu1 %4456 }
0x1634   :  { %4220 = vadd.xlane.f32.xlu0 %v4219_v21  ;;  %v4216_v13 = vsel %vm408_vm5, %v8895_v62, 0.0 }
0x1638   :  { %4217 = vadd.xlane.f32.xlu0 %v4216_v13 }
0x164e   :  { %4378 = vrot.lane.b32.xlu0 %v9941_v59, %s9228_s28 }
0x16c1   :  { %v4221_v22 = vpop.xlane.xlu0 %4220 }
0x16c2   :  { %8896 = vrcp.f32 %v4221_v22 }
0x16c5   :  { %v4218_v23 = vpop.xlane.xlu0 %4217 }
0x16c6   :  { %8898 = vrcp.f32 %v4218_v23 }
0x16c9   :  { %v4379_v54 = vpop.permute.xlu0 %4378 }
0x16cc   :  { %v8897_v29 = vpop.eup %8896 }
0x16cd   :  { %v4225_v35 = vmul.f32 %v8897_v29, %v8893_v42 }
0x16cf   :  { %8050 = vmatmul.mubr.msk.f32.vlgmr.msra.gmra.mrb[56].mxu0 %vm408_vm5, %v4225_v35 }
0x16d0   :  { %v8899_v53 = vpop.eup %8898  ;;  %8058 = vmatpush3.xpose.msk.msra.mxu0 %vm408_vm5, %v4459_v30  ;;  %8059 = vmatprep.mubr.msk.f32.mxu0 %vm9221_vm4, %v9220_v18 }
0x16d1   :  { %v4224_v0 = vmul.f32 %v8899_v53, %v8895_v62  ;;  %8067 = vmatprep.subr.mxu0 %v9220_v18 }
0x16d3   :  { %8045 = vmatmul.mubr.msk.f32.vlgmr.msra.gmra.mrb[60].mxu1 %vm408_vm5, %v4224_v0  ;;  %8060 = vmatmul.mubr.msk.f32.vlgmr.msra.gmra.mrb[58].mxu0 %vm408_vm5, %v4457_v39 }
0x16d4   :  { %8053 = vmatpush3.xpose.msk.msra.mxu1 %vm408_vm5, %v4381_v4  ;;  %8054 = vmatprep.mubr.msk.f32.mxu1 %vm9221_vm4, %v9220_v18 }
0x16d5   :  { %8062 = vmatprep.subr.mxu1 %v9220_v18  ;;  %8069 = vmatprep.mubr.msk.f32.mxu0 %vm9221_vm4, %v9220_v18 }
0x16d7   :  { %8055 = vmatmul.mubr.msk.f32.vlgmr.msra.gmra.mrb[62].mxu1 %vm408_vm5, %v4379_v54 }
0x16d8   :  { %8064 = vmatprep.mubr.msk.f32.mxu1 %vm9221_vm4, %v9220_v18 }
0x17a2   :  { %v10031_v40 = vpop.f32.mrb[56].mxu0 }
0x17a3   :  { %v8051_v1 = vpop.f32.mrb[57].mxu0 }
0x17a6   :  { %v10033_v20 = vpop.f32.mrb[60].mxu1  ;;  %v4530_v43 = vpop.f32.mrb[58].mxu0 }
0x17a7   :  { %v4535_v24 = vmul.f32 0.35355338, %v4530_v43  ;;  %v8046_v37 = vpop.f32.mrb[61].mxu1  ;;  %v8061_v49 = vpop.f32.mrb[59].mxu0 }
0x17a9   :  { %v4539_v51 = vsel %vm408_vm5, %v4535_v24, -inf }
0x17aa   :  { %4540 = vmax.xlane.f32.xlu1 %v4539_v51  ;;  %v4452_v52 = vpop.f32.mrb[62].mxu1 }
0x17ab   :  { %v4534_v44 = vmul.f32 0.35355338, %v4452_v52  ;;  %v8056_v38 = vpop.f32.mrb[63].mxu1 }
0x17ad   :  { %v4536_v55 = vsel %vm408_vm5, %v4534_v44, -inf }
0x17ae   :  { %4537 = vmax.xlane.f32.xlu0 %v4536_v55 }
0x17bb   :  { %4558 = vrot.lane.b32.xlu1 %v9941_v59, %s9229_s26 }
0x17bf   :  { %4712 = vrot.lane.b32.xlu1 %v9941_v59, %s9230_s18 }
0x17c3   :  { %4790 = vrot.lane.b32.xlu1 %v9939_v50, %s9230_s18 }
0x17c4   :  { %4634 = vrot.lane.b32.xlu0 %v9939_v50, %s9229_s26 }
0x17c7   :  { %4788 = vrot.lane.b32.xlu1 %v9939_v50, %s9231_s9 }
0x1837   :  { %v4541_v15 = vpop.xlane.xlu1 %4540 }
0x1838   :  { %v4543_v58 = vsub.f32 %v4535_v24, %v4541_v15 }
0x183a   :  { %v4546_v2 = vmul.f32 1.442695, %v4543_v58 }
0x183b   :  { %v4559_v3 = vpop.permute.xlu1 %4558  ;;  %v4538_v61 = vpop.xlane.xlu0 %4537 }
0x183c   :  { %8900 = vpow2.f32 %v4546_v2  ;;  %v4542_v56 = vsub.f32 %v4534_v44, %v4538_v61  ;;  %8063 = vmatpush3.msra.mxu1 %v4559_v3  ;;  %v5073_v2 = vld [vmem:[#allocation8 + $0x20] sm:$0xff]  ;;  %v5075_v61 = vld [vmem:[#allocation8 + $0x30] sm:$0xff] }
0x183d   :  { %8072 = vmatprep.subr.mxu1 %v9220_v18 }
0x183e   :  { %v4544_v47 = vmul.f32 1.442695, %v4542_v56  ;;  %v5076_v56 = vld [vmem:[#allocation8 + $0x38] sm:$0xff] }
0x183f   :  { %v4635_v48 = vpop.permute.xlu0 %4634  ;;  %v4713_v7 = vpop.permute.xlu1 %4712 }
0x1840   :  { %8902 = vpow2.f32 %v4544_v47  ;;  %8068 = vmatpush3.msra.mxu0 %v4635_v48  ;;  %v8478_v47 = vpack.c.bf16 %v5076_v56, %v5075_v61  ;;  %v5224_v56 = vld [vmem:[#allocation11 + $0x228] sm:$0xff] }
0x1841   :  { %8077 = vmatprep.subr.mxu0 %v9220_v18 }
0x1843   :  { %v4791_v8 = vpop.permute.xlu1 %4790 }
0x1846   :  { %v8901_v12 = vpop.eup %8900 }
0x1847   :  { %v4551_v16 = vsel %vm408_vm5, %v8901_v12, 0.0  ;;  %v4789_v17 = vpop.permute.xlu1 %4788 }
0x1848   :  { %4552 = vadd.xlane.f32.xlu0 %v4551_v16 }
0x184a   :  { %v8903_v25 = vpop.eup %8902 }
0x184b   :  { %v4548_v26 = vsel %vm408_vm5, %v8903_v25, 0.0 }
0x184c   :  { %4549 = vadd.xlane.f32.xlu0 %v4548_v26 }
0x1862   :  { %4710 = vrot.lane.b32.xlu0 %v9941_v59, %s9231_s9 }
0x18d5   :  { %v4553_v57 = vpop.xlane.xlu0 %4552 }
0x18d6   :  { %8904 = vrcp.f32 %v4553_v57 }
0x18d9   :  { %v4550_v14 = vpop.xlane.xlu0 %4549 }
0x18da   :  { %8906 = vrcp.f32 %v4550_v14 }
0x18dd   :  { %v4711_v32 = vpop.permute.xlu0 %4710 }
0x18e0   :  { %v8905_v19 = vpop.eup %8904 }
0x18e1   :  { %v4557_v33 = vmul.f32 %v8905_v19, %v8901_v12 }
0x18e3   :  { %8070 = vmatmul.mubr.msk.f32.vlgmr.msra.gmra.mrb[60].mxu0 %vm408_vm5, %v4557_v33 }
0x18e4   :  { %v8907_v41 = vpop.eup %8906  ;;  %8078 = vmatpush3.xpose.msk.msra.mxu0 %vm408_vm5, %v4791_v8  ;;  %8079 = vmatprep.mubr.msk.f32.mxu0 %vm9221_vm4, %v9220_v18 }
0x18e5   :  { %v4556_v46 = vmul.f32 %v8907_v41, %v8903_v25  ;;  %8087 = vmatprep.subr.mxu0 %v9220_v18 }
0x18e7   :  { %8065 = vmatmul.mubr.msk.f32.vlgmr.msra.gmra.mrb[64].mxu1 %vm408_vm5, %v4556_v46  ;;  %8080 = vmatmul.mubr.msk.f32.vlgmr.msra.gmra.mrb[62].mxu0 %vm408_vm5, %v4789_v17 }
0x18e8   :  { %8073 = vmatpush3.xpose.msk.msra.mxu1 %vm408_vm5, %v4713_v7  ;;  %8074 = vmatprep.mubr.msk.f32.mxu1 %vm9221_vm4, %v9220_v18 }
0x18e9   :  { %8082 = vmatprep.subr.mxu1 %v9220_v18  ;;  %8089 = vmatprep.mubr.msk.f32.mxu0 %vm9221_vm4, %v9220_v18 }
0x18eb   :  { %8075 = vmatmul.mubr.msk.f32.vlgmr.msra.gmra.mrb[66].mxu1 %vm408_vm5, %v4711_v32 }
0x18ec   :  { %8084 = vmatprep.mubr.msk.f32.mxu1 %vm9221_vm4, %v9220_v18 }
0x19b6   :  { %v4706_v9 = vpop.f32.mrb[60].mxu0 }
0x19b7   :  { %v8071_v42 = vpop.f32.mrb[61].mxu0 }
0x19ba   :  { %v4630_v21 = vpop.f32.mrb[64].mxu1  ;;  %v4862_v62 = vpop.f32.mrb[62].mxu0 }
0x19bb   :  { %v4867_v13 = vmul.f32 0.35355338, %v4862_v62  ;;  %v8066_v22 = vpop.f32.mrb[65].mxu1  ;;  %v8081_v23 = vpop.f32.mrb[63].mxu0 }
0x19bd   :  { %v4871_v4 = vsel %vm408_vm5, %v4867_v13, -inf }
0x19be   :  { %4872 = vmax.xlane.f32.xlu1 %v4871_v4  ;;  %v4784_v29 = vpop.f32.mrb[66].mxu1 }
0x19bf   :  { %v4866_v30 = vmul.f32 0.35355338, %v4784_v29  ;;  %v8076_v35 = vpop.f32.mrb[67].mxu1 }
0x19c0   :  { %v5220_v35 = vld [vmem:[#allocation11 + $0x208] sm:$0xff] }
0x19c1   :  { %v4868_v53 = vsel %vm408_vm5, %v4866_v30, -inf }
0x19c2   :  { %4869 = vmax.xlane.f32.xlu0 %v4868_v53  ;;  %v5236_v53 = vld [vmem:[#allocation11 + $0x288] sm:$0xff] }
0x19cf   :  { %4890 = vrot.lane.b32.xlu1 %v9941_v59, %s9232_s0 }
0x19d3   :  { %5044 = vrot.lane.b32.xlu1 %v10033_v20, %s9205_s22 }
0x19d7   :  { %5046 = vrot.lane.b32.xlu1 %v10031_v40, %s9205_s22 }
0x19db   :  { %5054 = vrot.lane.b32.xlu1 %v4706_v9, %s9212_s3 }
0x1a4b   :  { %v4873_v0 = vpop.xlane.xlu1 %4872 }
0x1a4c   :  { %v4875_v39 = vsub.f32 %v4867_v13, %v4873_v0  ;;  %v5222_v0 = vld [vmem:[#allocation11 + $0x218] sm:$0xff] }
0x1a4e   :  { %v4878_v54 = vmul.f32 1.442695, %v4875_v39  ;;  %v8482_v39 = vpack.c.bf16 %v5236_v53, %v5220_v35  ;;  %v5256_v35 = vld [vmem:[#allocation11 + $0x328] sm:$0xff] }
0x1a4f   :  { %v4891_v1 = vpop.permute.xlu1 %4890  ;;  %v4870_v43 = vpop.xlane.xlu0 %4869 }
0x1a50   :  { %8908 = vpow2.f32 %v4878_v54  ;;  %v4874_v24 = vsub.f32 %v4866_v30, %v4870_v43  ;;  %8083 = vmatpush3.msra.mxu1 %v4891_v1  ;;  %v5238_v54 = vld [vmem:[#allocation11 + $0x298] sm:$0xff]  ;;  %v5219_v1 = vld [vmem:[#allocation11 + $0x200] sm:$0xff] }
0x1a51   :  { %v5235_v43 = vld [vmem:[#allocation11 + $0x280] sm:$0xff] }
0x1a52   :  { %v4876_v37 = vmul.f32 1.442695, %v4874_v24  ;;  %v8490_v24 = vpack.c.bf16 %v5238_v54, %v5222_v0  ;;  %v5272_v0 = vld [vmem:[#allocation11 + $0x3a8] sm:$0xff]  ;;  %v5274_v54 = vld [vmem:[#allocation11 + $0x3b8] sm:$0xff] }
0x1a53   :  { %v5045_v26 = vpop.permute.xlu1 %5044 }
0x1a54   :  { %8910 = vpow2.f32 %v4876_v37  ;;  %v5066_v19 = vsel %vm408_vm5, %v9995_v60, %v5045_v26  ;;  %v7137_v60 = vld [vmem:[#allocation10 + $0x1] ss:$0 sm:$0xff]  ;;  %v8484_v37 = vpack.c.bf16 %v5235_v43, %v5219_v1  ;;  %v5255_v43 = vld [vmem:[#allocation11 + $0x320] sm:$0xff] }
0x1a57   :  { %v5047_v57 = vpop.permute.xlu1 %5046 }
0x1a58   :  { %v5067_v33 = vsel %vm408_vm5, %v9993_v63, %v5047_v57 }
0x1a5a   :  { %v8909_v49 = vpop.eup %8908 }
0x1a5b   :  { %v4883_v59 = vsel %vm408_vm5, %v8909_v49, 0.0  ;;  %v5055_v14 = vpop.permute.xlu1 %5054 }
0x1a5c   :  { %4884 = vadd.xlane.f32.xlu0 %v4883_v59  ;;  %v5069_v17 = vsel %vm1758_vm7, %v5067_v33, %v5055_v14  ;;  %v5237_v59 = vld [vmem:[#allocation11 + $0x290] sm:$0xff] }
0x1a5e   :  { %v8911_v20 = vpop.eup %8910 }
0x1a5f   :  { %v4880_v51 = vsel %vm408_vm5, %v8911_v20, 0.0 }
0x1a60   :  { %4881 = vadd.xlane.f32.xlu0 %v4880_v51  ;;  %v5252_v51 = vld [vmem:[#allocation11 + $0x308] sm:$0xff] }
0x1a76   :  { %4966 = vrot.lane.b32.xlu0 %v9939_v50, %s9232_s0  ;;  %v5074_v50 = vld [vmem:[#allocation8 + $0x28] sm:$0xff] }
0x1a77   :  { %v8474_v3 = vpack.c.bf16 %v5074_v50, %v5073_v2  ;;  %v5253_v50 = vld [vmem:[#allocation11 + $0x310] sm:$0xff] }
0x1a79   :  { %8475 = vmatprep.subr.bf16.mxu1 %v8474_v3 }
0x1a7a   :  { %5052 = vrot.lane.b32.xlu0 %v4630_v21, %s9212_s3 }
0x1ae9   :  { %v4885_v40 = vpop.xlane.xlu0 %4884 }
0x1aea   :  { %8912 = vrcp.f32 %v4885_v40  ;;  %v5268_v40 = vld [vmem:[#allocation11 + $0x388] sm:$0xff] }
0x1aed   :  { %v4882_v52 = vpop.xlane.xlu0 %4881 }
0x1aee   :  { %8914 = vrcp.f32 %v4882_v52  ;;  %v5254_v52 = vld [vmem:[#allocation11 + $0x318] sm:$0xff] }
0x1af1   :  { %v4967_v44 = vpop.permute.xlu0 %4966 }
0x1af2   :  { %8088 = vmatpush3.msra.mxu0 %v4967_v44  ;;  %v8486_v44 = vpack.c.bf16 %v5268_v40, %v5252_v51  ;;  %v8502_v40 = vpack.c.bf16 %v5272_v0, %v5256_v35  ;;  %v5264_v35 = vld [vmem:[#allocation11 + $0x368] sm:$0xff]  ;;  %v5266_v0 = vld [vmem:[#allocation11 + $0x378] sm:$0xff] }
0x1af3   :  { %8483 = vmatprep.subr.bf16.mxu0 %v8482_v39  ;;  %v5258_v39 = vld [vmem:[#allocation11 + $0x338] sm:$0xff] }
0x1af4   :  { %v8913_v38 = vpop.eup %8912 }
0x1af5   :  { %v4889_v55 = vmul.f32 %v8913_v38, %v8909_v49  ;;  %v5053_v7 = vpop.permute.xlu0 %5052  ;;  %v5221_v49 = vld [vmem:[#allocation11 + $0x210] sm:$0xff]  ;;  %v5270_v38 = vld [vmem:[#allocation11 + $0x398] sm:$0xff] }
0x1af6   :  { %v5068_v41 = vsel %vm1758_vm7, %v5066_v19, %v5053_v7 }
0x1af7   :  { %8090 = vmatmul.mubr.msk.f32.vlgmr.msra.gmra.mrb[64].mxu0 %vm408_vm5, %v4889_v55  ;;  %v5251_v55 = vld [vmem:[#allocation11 + $0x300] sm:$0xff] }
0x1af8   :  { %v8915_v15 = vpop.eup %8914  ;;  %5438 = vmatprep.mubr.f32.mxu0 %v9220_v18  ;;  %8485 = vmatpush1.bf16.msra.mxu0 %v8484_v37 }
0x1af9   :  { %v4888_v58 = vmul.f32 %v8915_v15, %v8911_v20  ;;  %v8492_v20 = vpack.c.bf16 %v5237_v59, %v5221_v49  ;;  %v5267_v15 = vld [vmem:[#allocation11 + $0x380] sm:$0xff]  ;;  %8487 = vmatprep.subr.bf16.mxu0 %v8486_v44  ;;  %v5257_v59 = vld [vmem:[#allocation11 + $0x330] sm:$0xff] }
0x1afa   :  { %v8488_v2 = vpack.c.bf16 %v5267_v15, %v5251_v55  ;;  %v5271_v49 = vld [vmem:[#allocation11 + $0x3a0] sm:$0xff] }
0x1afb   :  { %8085 = vmatmul.mubr.msk.f32.vlgmr.msra.gmra.mrb[68].mxu1 %vm408_vm5, %v4888_v58  ;;  %v8494_v58 = vpack.c.bf16 %v5270_v38, %v5254_v52  ;;  %v8510_v52 = vpack.c.bf16 %v5274_v54, %v5258_v39  ;;  %v5228_v38 = vld [vmem:[#allocation11 + $0x248] sm:$0xff]  ;;  %v8504_v55 = vpack.c.bf16 %v5271_v49, %v5255_v43  ;;  %v5282_v39 = vld [vmem:[#allocation11 + $0x3f8] sm:$0xff]  ;;  %v5279_v43 = vld [vmem:[#allocation11 + $0x3e0] sm:$0xff] }
0x1afc   :  { %8477 = vmatpush3.bf16.msra.mxu1 %v8474_v3  ;;  %v5269_v3 = vld [vmem:[#allocation11 + $0x390] sm:$0xff]  ;;  %8489 = vmatpush1.bf16.msra.mxu0 %v8488_v2  ;;  %v5246_v2 = vld [vmem:[#allocation11 + $0x2d8] sm:$0xff] }
0x1afd   :  { %8479 = vmatprep.subr.bf16.mxu1 %v8478_v47  ;;  %v8496_v61 = vpack.c.bf16 %v5269_v3, %v5253_v50  ;;  %v5227_v3 = vld [vmem:[#allocation11 + $0x240] sm:$0xff]  ;;  %v5281_v49 = vld [vmem:[#allocation11 + $0x3f0] sm:$0xff] }
0x1b00   :  { %8481 = vmatpush3.bf16.msra.mxu1 %v8478_v47  ;;  %v5240_v47 = vld [vmem:[#allocation11 + $0x2a8] sm:$0xff] }
0x1b01   :  { %8491 = vmatprep.subr.bf16.mxu1 %v8490_v24 }
0x1bca   :  { %v5038_v48 = vpop.f32.mrb[64].mxu0 }
0x1bcb   :  { %5062 = vrot.lane.b32.xlu1 %v5038_v48, %s9233_s1  ;;  %v8091_v12 = vpop.f32.mrb[65].mxu0  ;;  %v5226_v48 = vld [vmem:[#allocation11 + $0x238] sm:$0xff] }
0x1bcc   :  { %v8498_v12 = vpack.c.bf16 %v5240_v47, %v5224_v56 }
0x1bce   :  { %v4962_v16 = vpop.f32.mrb[68].mxu1  ;;  %8499 = vmatprep.subr.bf16.mxu0 %v8498_v12  ;;  %v5229_v12 = vld [vmem:[#allocation11 + $0x250] sm:$0xff] }
0x1bcf   :  { %5060 = vrot.lane.b32.xlu0 %v4962_v16, %s9233_s1  ;;  %v8086_v25 = vpop.f32.mrb[69].mxu1  ;;  %v5242_v16 = vld [vmem:[#allocation11 + $0x2b8] sm:$0xff] }
0x1bd0   :  { %v8506_v25 = vpack.c.bf16 %v5242_v16, %v5226_v48  ;;  %v5243_v48 = vld [vmem:[#allocation11 + $0x2c0] sm:$0xff]  ;;  %v5245_v16 = vld [vmem:[#allocation11 + $0x2d0] sm:$0xff] }
0x1c3d   :  { %v5063_v8 = vpop.permute.xlu1 %5062 }
0x1c3e   :  { %v5071_v9 = vsel %vm1761_vm6, %v5069_v17, %v5063_v8 }
0x1c41   :  { %v5061_v46 = vpop.permute.xlu0 %5060 }
0x1c42   :  { %v5070_v32 = vsel %vm1761_vm6, %v5068_v41, %v5061_v46 }
0x1c43   :  { %8100 = vmatprep.mubr.msk.f32.mxu1 %vm323_vm3, %v5070_v32 }
0x1c44   :  { %8101 = vmatmul.mubr.msk.f32.vlgmr.msra.gmra.mrb[70].mxu1 %vm323_vm3, %v5071_v9 }
0x1c45   :  { %5515 = vmatprep.mubr.f32.mxu1 %v9220_v18  ;;  %8493 = vmatpush1.bf16.msra.mxu1 %v8492_v20  ;;  %v5273_v20 = vld [vmem:[#allocation11 + $0x3b0] sm:$0xff] }
0x1c46   :  { %8495 = vmatprep.subr.bf16.mxu1 %v8494_v58  ;;  %v8512_v15 = vpack.c.bf16 %v5273_v20, %v5257_v59  ;;  %v5244_v58 = vld [vmem:[#allocation11 + $0x2c8] sm:$0xff]  ;;  %v8542_v20 = vpack.c.bf16 %v5282_v39, %v5266_v0 }
0x1c47   :  { %v8514_v56 = vpack.c.bf16 %v5244_v58, %v5228_v38  ;;  %v6024_v58 = vld [vmem:[#allocation14 + $0x808] sm:$0xff] }
0x1c49   :  { %8497 = vmatpush1.bf16.msra.mxu1 %v8496_v61 }
0x1c4a   :  { %8507 = vmatprep.subr.bf16.mxu1 %v8506_v25  ;;  %v5260_v25 = vld [vmem:[#allocation11 + $0x348] sm:$0xff] }
0x1d17   :  { %v8102_v42 = vpop.f32.mrb[70].mxu1 }
0x1d18   :  { %v5157_v21 = vpop.f32.mrb[71].mxu1  ;;  %v5163_v62 = vadd.f32 %v8102_v42, %v7137_v60 }
0x1d19   :  { %v5158_v63 = vadd.f32 %v7137_v60, %v5157_v21 }
0x1d1a   :  { %v10103_v22 = vadd.f32 %v5163_v62, %v9933_v45 }
0x1d1b   :  { %v10100_v13 = vadd.f32 %v5158_v63, %v9929_v28  ;;  %v7142_v63 = vld [vmem:[%s10335_s7 + $0x1] ss:$0 sm:$0xff] }
0x1d1c   :  { %v5177_v30 = vsel %vm323_vm3, %v10103_v22, 0.0  ;;  %v5173_v28 = vmul.f32 %v10103_v22, %v10103_v22 }
0x1d1d   :  { %v5174_v23 = vsel %vm323_vm3, %v10100_v13, 0.0  ;;  %v5172_v4 = vmul.f32 %v10100_v13, %v10100_v13 }
0x1d1e   :  { %5175 = vadd.xlane.f32.xlu0 %v5174_v23  ;;  %v5183_v45 = vsel %vm323_vm3, %v5173_v28, 0.0  ;;  %v5223_v23 = vld [vmem:[#allocation11 + $0x220] sm:$0xff]  ;;  %v5241_v28 = vld [vmem:[#allocation11 + $0x2b0] sm:$0xff] }
0x1d1f   :  { %v5180_v29 = vsel %vm323_vm3, %v5172_v4, 0.0 }
0x1d20   :  { %5181 = vadd.xlane.f32.xlu1 %v5180_v29  ;;  %v5239_v29 = vld [vmem:[#allocation11 + $0x2a0] sm:$0xff] }
0x1d22   :  { %5178 = vadd.xlane.f32.xlu0 %v5177_v30  ;;  %v5225_v30 = vld [vmem:[#allocation11 + $0x230] sm:$0xff] }
0x1d23   :  { %v8508_v1 = vpack.c.bf16 %v5241_v28, %v5225_v30  ;;  %v5249_v30 = vld [vmem:[#allocation11 + $0x2f0] sm:$0xff] }
0x1d26   :  { %5184 = vadd.xlane.f32.xlu0 %v5183_v45  ;;  %v7143_v45 = vld [vmem:[%s10336_s8 + $0x1] ss:$0 sm:$0xff] }
0x1dab   :  { %v5176_v26 = vpop.xlane.xlu0 %5175 }
0x1dac   :  { %v5186_v57 = vmul.f32 0.03125, %v5176_v26  ;;  %v5276_v26 = vld [vmem:[#allocation11 + $0x3c8] sm:$0xff] }
0x1dad   :  { %v5182_v14 = vpop.xlane.xlu1 %5181 }
0x1dae   :  { %v5190_v7 = vmul.f32 %v5186_v57, %v5186_v57  ;;  %v5188_v19 = vmul.f32 0.03125, %v5182_v14  ;;  %v5194_v21 = vsub.f32 %v10100_v13, %v5186_v57  ;;  %v8500_v13 = vpack.c.bf16 %v5239_v29, %v5223_v23  ;;  %v5262_v57 = vld [vmem:[#allocation11 + $0x358] sm:$0xff]  ;;  %v5231_v23 = vld [vmem:[#allocation11 + $0x260] sm:$0xff]  ;;  %v5233_v29 = vld [vmem:[#allocation11 + $0x270] sm:$0xff] }
0x1daf   :  { %v5179_v8 = vpop.xlane.xlu0 %5178  ;;  %v5278_v14 = vld [vmem:[#allocation11 + $0x3d8] sm:$0xff] }
0x1db0   :  { %v5192_v33 = vsub.f32 %v5188_v19, %v5190_v7  ;;  %v5187_v41 = vmul.f32 0.03125, %v5179_v8  ;;  %v8516_v7 = vpack.c.bf16 %v5243_v48, %v5227_v3  ;;  %v8524_v19 = vpack.c.bf16 %v5245_v16, %v5229_v12  ;;  %v5259_v8 = vld [vmem:[#allocation11 + $0x340] sm:$0xff]  ;;  %v6056_v3 = vld [vmem:[#allocation14 + $0x908] sm:$0xff]  ;;  %v6073_v48 = vld [vmem:[#allocation14 + $0x990] sm:$0xff] }
0x1db1   :  { %v6074_v12 = vld [vmem:[#allocation14 + $0x998] sm:$0xff] }
0x1db2   :  { %v5196_v46 = vadd.f32 1e-05, %v5192_v33  ;;  %v5191_v32 = vmul.f32 %v5187_v41, %v5187_v41  ;;  %v5195_v37 = vsub.f32 %v10103_v22, %v5187_v41  ;;  %v5230_v22 = vld [vmem:[#allocation11 + $0x258] sm:$0xff]  ;;  %v5275_v33 = vld [vmem:[#allocation11 + $0x3c0] sm:$0xff]  ;;  %v5261_v41 = vld [vmem:[#allocation11 + $0x350] sm:$0xff] }
0x1db3   :  { %v5185_v17 = vpop.xlane.xlu0 %5184  ;;  %v8522_v47 = vpack.c.bf16 %v5246_v2, %v5230_v22 }
0x1db4   :  { %8916 = vrsqrt.f32 %v5196_v46  ;;  %v5189_v9 = vmul.f32 0.03125, %v5185_v17  ;;  %v5277_v46 = vld [vmem:[#allocation11 + $0x3d0] sm:$0xff]  ;;  %v8518_v17 = vpack.c.bf16 %v5276_v26, %v5260_v25 }
0x1db5   :  { %v6025_v26 = vld [vmem:[#allocation14 + $0x810] sm:$0xff] }
0x1db6   :  { %v5193_v60 = vsub.f32 %v5189_v9, %v5191_v32  ;;  %v8526_v32 = vpack.c.bf16 %v5278_v14, %v5262_v57  ;;  %v5232_v9 = vld [vmem:[#allocation11 + $0x268] sm:$0xff]  ;;  %v6026_v57 = vld [vmem:[#allocation14 + $0x818] sm:$0xff] }
0x1db8   :  { %v5197_v42 = vadd.f32 1e-05, %v5193_v60  ;;  %v5248_v60 = vld [vmem:[#allocation11 + $0x2e8] sm:$0xff] }
0x1db9   :  { %v8530_v28 = vpack.c.bf16 %v5248_v60, %v5232_v9  ;;  %v6027_v60 = vld [vmem:[#allocation14 + $0x820] sm:$0xff] }
0x1dba   :  { %8918 = vrsqrt.f32 %v5197_v42  ;;  %v5234_v42 = vld [vmem:[#allocation11 + $0x278] sm:$0xff] }
0x1dbe   :  { %v8917_v62 = vpop.eup %8916 }
0x1dbf   :  { %v5200_v4 = vmul.f32 %v8917_v62, %v5194_v21  ;;  %v5250_v21 = vld [vmem:[#allocation11 + $0x2f8] sm:$0xff]  ;;  %v8520_v62 = vpack.c.bf16 %v5275_v33, %v5259_v8  ;;  %v6043_v33 = vld [vmem:[#allocation14 + $0x8a0] sm:$0xff] }
0x1dc0   :  { %v6058_v8 = vld [vmem:[#allocation14 + $0x918] sm:$0xff] }
0x1dc1   :  { %v5208_v53 = vmul.f32 %v7142_v63, %v5200_v4  ;;  %v5247_v4 = vld [vmem:[#allocation11 + $0x2e0] sm:$0xff] }
0x1dc2   :  { %v8532_v54 = vpack.c.bf16 %v5247_v4, %v5231_v23  ;;  %v6060_v23 = vld [vmem:[#allocation14 + $0x928] sm:$0xff]  ;;  %v6045_v4 = vld [vmem:[#allocation14 + $0x8b0] sm:$0xff] }
0x1dc3   :  { %v10122_v24 = vadd.f32 %v7143_v45, %v5208_v53  ;;  %v5280_v53 = vld [vmem:[#allocation11 + $0x3e8] sm:$0xff] }
0x1dc4   :  { %v8919_v51 = vpop.eup %8918  ;;  %v8534_v59 = vpack.c.bf16 %v5280_v53, %v5264_v35  ;;  %v6029_v35 = vld [vmem:[#allocation14 + $0x830] sm:$0xff]  ;;  %v6030_v53 = vld [vmem:[#allocation14 + $0x838] sm:$0xff] }
0x1dc5   :  { %v5201_v44 = vmul.f32 %v8919_v51, %v5195_v37  ;;  %7144 = vmatmul.mubr.msk.f32.vlgmr.msra.gmra.mrb[66].mxu0 %vm323_vm3, %v10122_v24  ;;  %7146 = vmatmul.mubr.msk.f32.vlgmr.msra.gmra.mrb[72].mxu1 %vm323_vm3, %v10122_v24  ;;  %v5265_v37 = vld [vmem:[#allocation11 + $0x370] sm:$0xff]  ;;  %v6039_v51 = vld [vmem:[#allocation14 + $0x880] sm:$0xff] }
0x1dc6   :  { %8501 = vmatpush1.bf16.msra.mxu0 %v8500_v13  ;;  %8509 = vmatpush1.bf16.msra.mxu1 %v8508_v1  ;;  %v8540_v13 = vpack.c.bf16 %v5249_v30, %v5233_v29  ;;  %v5263_v1 = vld [vmem:[#allocation11 + $0x360] sm:$0xff]  ;;  %v6077_v29 = vld [vmem:[#allocation14 + $0x9b0] sm:$0xff]  ;;  %v6078_v30 = vld [vmem:[#allocation14 + $0x9b8] sm:$0xff] }
0x1dc7   :  { %v5209_v50 = vmul.f32 %v7142_v63, %v5201_v44  ;;  %5444 = vmatprep.mubr.f32.mxu0 %v9220_v18  ;;  %5521 = vmatprep.mubr.f32.mxu1 %v9220_v18  ;;  %v8528_v63 = vpack.c.bf16 %v5277_v46, %v5261_v41  ;;  %v6072_v44 = vld [vmem:[#allocation14 + $0x988] sm:$0xff]  ;;  %v8536_v38 = vpack.c.bf16 %v5279_v43, %v5263_v1  ;;  %v6075_v46 = vld [vmem:[#allocation14 + $0x9a0] sm:$0xff] }
0x1dc8   :  { %8503 = vmatprep.subr.bf16.mxu0 %v8502_v40  ;;  %8511 = vmatprep.subr.bf16.mxu1 %v8510_v52  ;;  %v6040_v40 = vld [vmem:[#allocation14 + $0x888] sm:$0xff]  ;;  %v6071_v52 = vld [vmem:[#allocation14 + $0x980] sm:$0xff]  ;;  %v8590_v39 = vpack.c.bf16 %v6078_v30, %v6077_v29  ;;  %v6038_v29 = vld [vmem:[#allocation14 + $0x878] sm:$0xff] }
0x1dc9   :  { %v10131_v61 = vadd.f32 %v7143_v45, %v5209_v50  ;;  %v8538_v45 = vpack.c.bf16 %v5250_v21, %v5234_v42  ;;  %v8546_v22 = vpack.c.bf16 %v6040_v40, %v6039_v51  ;;  %v8578_v2 = vpack.c.bf16 %v6072_v44, %v6071_v52  ;;  %v6055_v50 = vld [vmem:[#allocation14 + $0x900] sm:$0xff]  ;;  %v6044_v41 = vld [vmem:[#allocation14 + $0x8a8] sm:$0xff] }
0x1dca   :  { %8505 = vmatpush1.bf16.msra.mxu0 %v8504_v55  ;;  %8513 = vmatpush1.bf16.msra.mxu1 %v8512_v15  ;;  %v8544_v55 = vpack.c.bf16 %v5281_v49, %v5265_v37  ;;  %v6023_v15 = vld [vmem:[#allocation14 + $0x800] sm:$0xff]  ;;  %v8580_v25 = vpack.c.bf16 %v6056_v3, %v6055_v50  ;;  %v6028_v42 = vld [vmem:[#allocation14 + $0x828] sm:$0xff]  ;;  %v8554_v21 = vpack.c.bf16 %v6044_v41, %v6043_v33 }
0x1dcb   :  { %7145 = vmatmul.mubr.msk.f32.gmra.mrb[68].mxu0 %vm323_vm3, %v10131_v61  ;;  %7147 = vmatmul.mubr.msk.f32.gmra.mrb[74].mxu1 %vm323_vm3, %v10131_v61  ;;  %v8548_v16 = vpack.c.bf16 %v6024_v58, %v6023_v15  ;;  %v6047_v1 = vld [vmem:[#allocation14 + $0x8c0] sm:$0xff]  ;;  %v6048_v43 = vld [vmem:[#allocation14 + $0x8c8] sm:$0xff]  ;;  %v6049_v15 = vld [vmem:[#allocation14 + $0x8d0] sm:$0xff] }
0x1dcc   :  { %5592 = vmatprep.mubr.f32.mxu0 %v9220_v18  ;;  %5669 = vmatprep.mubr.f32.mxu1 %v9220_v18  ;;  %v6079_v37 = vld [vmem:[#allocation14 + $0x9c0] sm:$0xff]  ;;  %v6080_v49 = vld [vmem:[#allocation14 + $0x9c8] sm:$0xff]  ;;  %v8562_v52 = vpack.c.bf16 %v6048_v43, %v6047_v1  ;;  %v6050_v58 = vld [vmem:[#allocation14 + $0x8d8] sm:$0xff] }
0x1dcd   :  { %8515 = vmatprep.subr.bf16.mxu0 %v8514_v56  ;;  %8523 = vmatprep.subr.bf16.mxu1 %v8522_v47  ;;  %v6041_v56 = vld [vmem:[#allocation14 + $0x890] sm:$0xff]  ;;  %v6042_v47 = vld [vmem:[#allocation14 + $0x898] sm:$0xff]  ;;  %v6031_v51 = vld [vmem:[#allocation14 + $0x840] sm:$0xff]  ;;  %v8594_v44 = vpack.c.bf16 %v6080_v49, %v6079_v37 }
0x1dce   :  { %v8550_v14 = vpack.c.bf16 %v6042_v47, %v6041_v56  ;;  %v6032_v40 = vld [vmem:[#allocation14 + $0x848] sm:$0xff]  ;;  %v6033_v56 = vld [vmem:[#allocation14 + $0x850] sm:$0xff]  ;;  %v6034_v47 = vld [vmem:[#allocation14 + $0x858] sm:$0xff] }
0x1dcf   :  { %7148 = vmatmul.mubr.msk.f32.vlgmr.msra.gmra.mrb[70].mxu0 %vm323_vm3, %v10122_v24  ;;  %7150 = vmatmul.mubr.msk.f32.vlgmr.msra.gmra.mrb[76].mxu1 %vm323_vm3, %v10122_v24  ;;  %v8564_v50 = vpack.c.bf16 %v6032_v40, %v6031_v51  ;;  %v6035_v33 = vld [vmem:[#allocation14 + $0x860] sm:$0xff]  ;;  %v6136_v1 = vld [vmem:[#allocation14 + $0xb88] sm:$0xff]  ;;  %v10173_v37 = vld [vmem:[#allocation13 + $0x10] sm:$0xff] }
0x1dd0   :  { %8517 = vmatpush1.bf16.msra.mxu0 %v8516_v7  ;;  %8525 = vmatpush1.bf16.msra.mxu1 %v8524_v19  ;;  %v8582_v7 = vpack.c.bf16 %v6074_v12, %v6073_v48  ;;  %v6057_v19 = vld [vmem:[#allocation14 + $0x910] sm:$0xff]  ;;  %v8566_v48 = vpack.c.bf16 %v6050_v58, %v6049_v15  ;;  %v5291_v49 = vrot.slane %v10173_v37, %v9764_v5 }
0x1dd1   :  { %5598 = vmatprep.mubr.f32.mxu0 %v9220_v18  ;;  %5675 = vmatprep.mubr.f32.mxu1 %v9220_v18  ;;  %v8584_v9 = vpack.c.bf16 %v6058_v8, %v6057_v19  ;;  %v8568_v19 = vpack.c.bf16 %v6034_v47, %v6033_v56  ;;  %v5303_v51 = vrot.slane %v10173_v37, %v9775_v11 }
0x1dd2   :  { %8519 = vmatprep.subr.bf16.mxu0 %v8518_v17  ;;  %8527 = vmatprep.subr.bf16.mxu1 %v8526_v32  ;;  %v6076_v17 = vld [vmem:[#allocation14 + $0x9a8] sm:$0xff]  ;;  %v8552_v32 = vpack.c.bf16 %v6026_v57, %v6025_v26  ;;  %v6051_v26 = vld [vmem:[#allocation14 + $0x8e0] sm:$0xff] }
0x1dd3   :  { %7149 = vmatmul.mubr.msk.f32.gmra.mrb[72].mxu0 %vm323_vm3, %v10131_v61  ;;  %7151 = vmatmul.mubr.msk.f32.gmra.mrb[78].mxu1 %vm323_vm3, %v10131_v61  ;;  %v6052_v57 = vld [vmem:[#allocation14 + $0x8e8] sm:$0xff] }
0x1dd4   :  { %8521 = vmatpush1.bf16.msra.mxu0 %v8520_v62  ;;  %8529 = vmatpush1.bf16.msra.mxu1 %v8528_v63  ;;  %v8586_v62 = vpack.c.bf16 %v6076_v17, %v6075_v46  ;;  %v6059_v63 = vld [vmem:[#allocation14 + $0x920] sm:$0xff]  ;;  %v8570_v41 = vpack.c.bf16 %v6052_v57, %v6051_v26  ;;  %v6036_v17 = vld [vmem:[#allocation14 + $0x868] sm:$0xff]  ;;  %v6090_v26 = vld [vmem:[#allocation14 + $0xa18] sm:$0xff] }
0x1dd5   :  { %5746 = vmatprep.mubr.f32.mxu0 %v9220_v18  ;;  %5823 = vmatprep.mubr.f32.mxu1 %v9220_v18 }
0x1dd6   :  { %8531 = vmatprep.subr.bf16.mxu0 %v8530_v28  ;;  %8539 = vmatprep.subr.bf16.mxu1 %v8538_v45  ;;  %v8556_v28 = vpack.c.bf16 %v6028_v42, %v6027_v60  ;;  %v8588_v45 = vpack.c.bf16 %v6060_v23, %v6059_v63  ;;  %v8572_v60 = vpack.c.bf16 %v6036_v17, %v6035_v33  ;;  %v6085_v63 = vld [vmem:[#allocation14 + $0x9f0] sm:$0xff]  ;;  %v6122_v33 = vld [vmem:[#allocation14 + $0xb18] sm:$0xff] }
0x1dd7   :  { %7152 = vmatmul.mubr.msk.f32.vlgmr.msra.gmra.mrb[74].mxu0 %vm323_vm3, %v10122_v24  ;;  %7154 = vmatmul.mubr.msk.f32.vlgmr.msra.gmra.mrb[80].mxu1 %vm323_vm3, %v10122_v24 }
0x1dd8   :  { %8533 = vmatpush1.bf16.msra.mxu0 %v8532_v54  ;;  %8541 = vmatpush1.bf16.msra.mxu1 %v8540_v13  ;;  %v6061_v54 = vld [vmem:[#allocation14 + $0x930] sm:$0xff]  ;;  %v6062_v13 = vld [vmem:[#allocation14 + $0x938] sm:$0xff] }
0x1dd9   :  { %5752 = vmatprep.mubr.f32.mxu0 %v9220_v18  ;;  %5829 = vmatprep.mubr.f32.mxu1 %v9220_v18 }
0x1dda   :  { %8535 = vmatprep.subr.bf16.mxu0 %v8534_v59  ;;  %8543 = vmatprep.subr.bf16.mxu1 %v8542_v20  ;;  %v8560_v59 = vpack.c.bf16 %v6030_v53, %v6029_v35  ;;  %v8592_v20 = vpack.c.bf16 %v6062_v13, %v6061_v54  ;;  %v6070_v35 = vld [vmem:[#allocation14 + $0x978] sm:$0xff]  ;;  %v6135_v54 = vld [vmem:[#allocation14 + $0xb80] sm:$0xff] }
0x1ddb   :  { %7153 = vmatmul.mubr.msk.f32.gmra.mrb[76].mxu0 %vm323_vm3, %v10131_v61  ;;  %7155 = vmatmul.mubr.msk.f32.gmra.mrb[82].mxu1 %vm323_vm3, %v10131_v61  ;;  %v8642_v43 = vpack.c.bf16 %v6136_v1, %v6135_v54  ;;  %v6092_v54 = vld [vmem:[#allocation14 + $0xa28] sm:$0xff] }
0x1ddc   :  { %8537 = vmatpush1.bf16.msra.mxu0 %v8536_v38  ;;  %8545 = vmatpush1.bf16.msra.mxu1 %v8544_v55  ;;  %v6063_v38 = vld [vmem:[#allocation14 + $0x940] sm:$0xff]  ;;  %v6064_v55 = vld [vmem:[#allocation14 + $0x948] sm:$0xff] }
0x1ddd   :  { %5900 = vmatprep.mubr.f32.mxu0 %v9220_v18  ;;  %5977 = vmatprep.mubr.f32.mxu1 %v9220_v18  ;;  %v8596_v3 = vpack.c.bf16 %v6064_v55, %v6063_v38  ;;  %v6088_v38 = vld [vmem:[#allocation14 + $0xa08] sm:$0xff] }
0x1dde   :  { %8547 = vmatprep.subr.bf16.mxu0 %v8546_v22  ;;  %8579 = vmatprep.subr.bf16.mxu1 %v8578_v2  ;;  %v6081_v22 = vld [vmem:[#allocation14 + $0x9d0] sm:$0xff]  ;;  %v6082_v2 = vld [vmem:[#allocation14 + $0x9d8] sm:$0xff]  ;;  %v6124_v1 = vld [vmem:[#allocation14 + $0xb28] sm:$0xff] }
0x1ddf   :  { %7156 = vmatmul.mubr.msk.f32.vlgmr.msra.gmra.mrb[78].mxu0 %vm323_vm3, %v10122_v24  ;;  %7158 = vmatmul.mubr.msk.f32.vlgmr.msra.gmra.mrb[84].mxu1 %vm323_vm3, %v10122_v24  ;;  %v8598_v12 = vpack.c.bf16 %v6082_v2, %v6081_v22  ;;  %v6119_v2 = vld [vmem:[#allocation14 + $0xb00] sm:$0xff] }
0x1de0   :  { %5906 = vmatprep.mubr.f32.mxu0 %v9220_v18  ;;  %5983 = vmatprep.mubr.f32.mxu1 %v9220_v18  ;;  %v6046_v18 = vld [vmem:[#allocation14 + $0x8b8] sm:$0xff] }
0x1de1   :  { %8549 = vmatpush3.bf16.msra.mxu0 %v8548_v16  ;;  %8581 = vmatpush3.bf16.msra.mxu1 %v8580_v25  ;;  %v8558_v0 = vpack.c.bf16 %v6046_v18, %v6045_v4  ;;  %v6065_v16 = vld [vmem:[#allocation14 + $0x950] sm:$0xff]  ;;  %v6066_v25 = vld [vmem:[#allocation14 + $0x958] sm:$0xff] }
0x1de2   :  { %8551 = vmatprep.subr.bf16.mxu0 %v8550_v14  ;;  %8583 = vmatprep.subr.bf16.mxu1 %v8582_v7  ;;  %v6083_v14 = vld [vmem:[#allocation14 + $0x9e0] sm:$0xff]  ;;  %v6084_v7 = vld [vmem:[#allocation14 + $0x9e8] sm:$0xff]  ;;  %v8600_v8 = vpack.c.bf16 %v6066_v25, %v6065_v16  ;;  %v6086_v4 = vld [vmem:[#allocation14 + $0x9f8] sm:$0xff] }
0x1de3   :  { %7157 = vmatmul.mubr.msk.f32.gmra.mrb[80].mxu0 %vm323_vm3, %v10131_v61  ;;  %7159 = vmatmul.mubr.msk.f32.gmra.mrb[86].mxu1 %vm323_vm3, %v10131_v61  ;;  %v8602_v46 = vpack.c.bf16 %v6084_v7, %v6083_v14  ;;  %v6037_v18 = vld [vmem:[#allocation14 + $0x870] sm:$0xff]  ;;  %v8606_v30 = vpack.c.bf16 %v6086_v4, %v6085_v63  ;;  %v6138_v16 = vld [vmem:[#allocation14 + $0xb98] sm:$0xff]  ;;  %v6108_v63 = vld [vmem:[#allocation14 + $0xaa8] sm:$0xff] }
0x1de4   :  { %v6089_v25 = vld [vmem:[#allocation14 + $0xa10] sm:$0xff] }
0x1de5   :  { %8553 = vmatpush3.bf16.msra.mxu0 %v8552_v32  ;;  %8585 = vmatpush3.bf16.msra.mxu1 %v8584_v9  ;;  %v6067_v32 = vld [vmem:[#allocation14 + $0x960] sm:$0xff]  ;;  %v6068_v9 = vld [vmem:[#allocation14 + $0x968] sm:$0xff] }
0x1de6   :  { %8555 = vmatprep.subr.bf16.mxu0 %v8554_v21  ;;  %8587 = vmatprep.subr.bf16.mxu1 %v8586_v62  ;;  %v8604_v42 = vpack.c.bf16 %v6068_v9, %v6067_v32  ;;  %v6053_v21 = vld [vmem:[#allocation14 + $0x8f0] sm:$0xff]  ;;  %v6054_v62 = vld [vmem:[#allocation14 + $0x8f8] sm:$0xff] }
0x1de7   :  { %v8574_v23 = vpack.c.bf16 %v6054_v62, %v6053_v21  ;;  %v8616_v21 = vpack.c.bf16 %v6090_v26, %v6089_v25  ;;  %v6107_v62 = vld [vmem:[#allocation14 + $0xaa0] sm:$0xff]  ;;  %v6126_v25 = vld [vmem:[#allocation14 + $0xb38] sm:$0xff] }
0x1de8   :  { %v6111_v26 = vld [vmem:[#allocation14 + $0xac0] sm:$0xff] }
0x1de9   :  { %8557 = vmatpush3.bf16.msra.mxu0 %v8556_v28  ;;  %8589 = vmatpush3.bf16.msra.mxu1 %v8588_v45  ;;  %v8576_v28 = vpack.c.bf16 %v6038_v29, %v6037_v18  ;;  %v6069_v45 = vld [vmem:[#allocation14 + $0x970] sm:$0xff]  ;;  %v10189_v29 = vrot.slane %v10173_v37, %v9789_v34 }
0x1dea   :  { %8559 = vmatprep.subr.bf16.mxu0 %v8558_v0  ;;  %8591 = vmatprep.subr.bf16.mxu1 %v8590_v39  ;;  %v8608_v53 = vpack.c.bf16 %v6070_v35, %v6069_v45  ;;  %v6103_v0 = vld [vmem:[#allocation14 + $0xa80] sm:$0xff]  ;;  %v6104_v39 = vld [vmem:[#allocation14 + $0xa88] sm:$0xff] }
0x1deb   :  { %v8610_v13 = vpack.c.bf16 %v6104_v39, %v6103_v0  ;;  %v6140_v45 = vld [vmem:[#allocation14 + $0xba8] sm:$0xff]  ;;  %v6091_v35 = vld [vmem:[#allocation14 + $0xa20] sm:$0xff] }
0x1ded   :  { %8561 = vmatpush3.bf16.msra.mxu0 %v8560_v59  ;;  %8593 = vmatpush3.bf16.msra.mxu1 %v8592_v20  ;;  %v5299_v59 = vrot.slane %v10173_v37, %v9767_v6  ;;  %v5295_v20 = vrot.slane %v10173_v37, %v9772_v10 }
0x1dee   :  { %8563 = vmatprep.subr.bf16.mxu0 %v8562_v52  ;;  %8595 = vmatprep.subr.bf16.mxu1 %v8594_v44  ;;  %v6087_v44 = vld [vmem:[#allocation14 + $0xa00] sm:$0xff] }
0x1def   :  { %v8612_v7 = vpack.c.bf16 %v6088_v38, %v6087_v44  ;;  %v6109_v44 = vld [vmem:[#allocation14 + $0xab0] sm:$0xff] }
0x1df1   :  { %8565 = vmatpush3.bf16.msra.mxu0 %v8564_v50  ;;  %8597 = vmatpush3.bf16.msra.mxu1 %v8596_v3  ;;  %v6120_v50 = vld [vmem:[#allocation14 + $0xb08] sm:$0xff]  ;;  %v6105_v3 = vld [vmem:[#allocation14 + $0xa90] sm:$0xff] }
0x1df2   :  { %8567 = vmatprep.subr.bf16.mxu0 %v8566_v48  ;;  %8599 = vmatprep.subr.bf16.mxu1 %v8598_v12  ;;  %v6106_v48 = vld [vmem:[#allocation14 + $0xa98] sm:$0xff]  ;;  %v6137_v12 = vld [vmem:[#allocation14 + $0xb90] sm:$0xff] }
0x1df3   :  { %v8614_v17 = vpack.c.bf16 %v6106_v48, %v6105_v3  ;;  %v8646_v32 = vpack.c.bf16 %v6138_v16, %v6137_v12  ;;  %v6093_v48 = vld [vmem:[#allocation14 + $0xa30] sm:$0xff]  ;;  %v6094_v12 = vld [vmem:[#allocation14 + $0xa38] sm:$0xff] }
0x1df4   :  { %v6125_v16 = vld [vmem:[#allocation14 + $0xb30] sm:$0xff] }
0x1df5   :  { %8569 = vmatpush3.bf16.msra.mxu0 %v8568_v19  ;;  %8601 = vmatpush3.bf16.msra.mxu1 %v8600_v8  ;;  %v8644_v19 = vpack.c.bf16 %v6120_v50, %v6119_v2  ;;  %v6121_v8 = vld [vmem:[#allocation14 + $0xb10] sm:$0xff]  ;;  %v6142_v2 = vld [vmem:[#allocation14 + $0xbb8] sm:$0xff] }
0x1df6   :  { %8571 = vmatprep.subr.bf16.mxu0 %v8570_v41  ;;  %8603 = vmatprep.subr.bf16.mxu1 %v8602_v46 }
0x1df9   :  { %8573 = vmatpush3.bf16.msra.mxu0 %v8572_v60  ;;  %8605 = vmatpush3.bf16.msra.mxu1 %v8604_v42  ;;  %v10185_v42 = vrot.slane %v10173_v37, %v9786_v31 }
0x1dfa   :  { %8575 = vmatprep.subr.bf16.mxu0 %v8574_v23  ;;  %8607 = vmatprep.subr.bf16.mxu1 %v8606_v30  ;;  %v8648_v30 = vpack.c.bf16 %v6122_v33, %v6121_v8 }
0x1dfd   :  { %8577 = vmatpush3.bf16.msra.mxu0 %v8576_v28  ;;  %8609 = vmatpush3.bf16.msra.mxu1 %v8608_v53  ;;  %v6139_v28 = vld [vmem:[#allocation14 + $0xba0] sm:$0xff] }
0x1dfe   :  { %8611 = vmatprep.subr.bf16.mxu0 %v8610_v13  ;;  %8643 = vmatprep.subr.bf16.mxu1 %v8642_v43  ;;  %v6123_v13 = vld [vmem:[#allocation14 + $0xb20] sm:$0xff] }
0x1e98   :  { %v5440_v40 = vpop.f32.mrb[66].mxu0  ;;  %v5517_v52 = vpop.f32.mrb[72].mxu1 }
0x1e99   :  { %v5441_v55 = vadd.f32 %v5440_v40, %v5291_v49  ;;  %v5518_v15 = vadd.f32 %v5517_v52, %v5299_v59  ;;  %v5442_v58 = vpop.f32.mrb[67].mxu0  ;;  %v5519_v22 = vpop.f32.mrb[73].mxu1 }
0x1e9a   :  { %v5443_v56 = vadd.f32 %v5442_v58, %v5295_v20  ;;  %v5520_v47 = vadd.f32 %v5519_v22, %v5303_v51  ;;  %v6110_v58 = vld [vmem:[#allocation14 + $0xab8] sm:$0xff]  ;;  %v6141_v22 = vld [vmem:[#allocation14 + $0xbb0] sm:$0xff] }
0x1e9b   :  { %v5990_v41 = vmax.f32 %v5441_v55, 0.0  ;;  %v5992_v46 = vmax.f32 %v5518_v15, 0.0  ;;  %v8618_v15 = vpack.c.bf16 %v6108_v63, %v6107_v62  ;;  %v8622_v33 = vpack.c.bf16 %v6110_v58, %v6109_v44  ;;  %v6095_v62 = vld [vmem:[#allocation14 + $0xa40] sm:$0xff]  ;;  %v6096_v63 = vld [vmem:[#allocation14 + $0xa48] sm:$0xff]  ;;  %v6098_v44 = vld [vmem:[#allocation14 + $0xa58] sm:$0xff] }
0x1e9c   :  { %v5991_v57 = vmax.f32 %v5443_v56, 0.0  ;;  %v5993_v14 = vmax.f32 %v5520_v47, 0.0 }
0x1e9e   :  { %v5446_v9 = vpop.f32.mrb[68].mxu0  ;;  %v5523_v60 = vpop.f32.mrb[74].mxu1  ;;  %6351 = vmatprep.mubr.f32.mxu0 %v5991_v57  ;;  %6426 = vmatprep.mubr.f32.mxu1 %v5993_v14  ;;  %v6112_v57 = vld [vmem:[#allocation14 + $0xac8] sm:$0xff] }
0x1e9f   :  { %v5447_v23 = vadd.f32 %v5446_v9, %v5291_v49  ;;  %v5448_v4 = vpop.f32.mrb[69].mxu0  ;;  %v5525_v18 = vpop.f32.mrb[75].mxu1  ;;  %6352 = vmatmul.mubr.f32.vlgmr.msra.gmra.mrb[82].mxu0 %v5990_v41  ;;  %6427 = vmatmul.mubr.f32.vlgmr.msra.gmra.mrb[88].mxu1 %v5992_v46  ;;  %v5524_v53 = vadd.f32 %v5523_v60, %v5299_v59  ;;  %v8650_v59 = vpack.c.bf16 %v6140_v45, %v6139_v28  ;;  %v6143_v46 = vld [vmem:[#allocation14 + $0xbc0] sm:$0xff]  ;;  %v6113_v28 = vld [vmem:[#allocation14 + $0xad0] sm:$0xff] }
0x1ea0   :  { %v5449_v0 = vadd.f32 %v5448_v4, %v5295_v20  ;;  %v5526_v39 = vadd.f32 %v5525_v18, %v5303_v51  ;;  %8613 = vmatpush3.bf16.msra.mxu0 %v8612_v7  ;;  %8645 = vmatpush3.bf16.msra.mxu1 %v8644_v19  ;;  %v8620_v20 = vpack.c.bf16 %v6092_v54, %v6091_v35  ;;  %v6127_v18 = vld [vmem:[#allocation14 + $0xb40] sm:$0xff] }
0x1ea1   :  { %8615 = vmatprep.subr.bf16.mxu0 %v8614_v17  ;;  %8647 = vmatprep.subr.bf16.mxu1 %v8646_v32  ;;  %v8652_v51 = vpack.c.bf16 %v6124_v1, %v6123_v13  ;;  %v6006_v50 = vmax.f32 %v5447_v23, 0.0  ;;  %v6008_v3 = vmax.f32 %v5524_v53, 0.0  ;;  %v8654_v41 = vpack.c.bf16 %v6142_v2, %v6141_v22  ;;  %v6144_v17 = vld [vmem:[#allocation14 + $0xbc8] sm:$0xff]  ;;  %v6114_v53 = vld [vmem:[#allocation14 + $0xad8] sm:$0xff]  ;;  %v6147_v2 = vld [vmem:[#allocation14 + $0xbe0] sm:$0xff] }
0x1ea2   :  { %v6007_v43 = vmax.f32 %v5449_v0, 0.0  ;;  %v6009_v49 = vmax.f32 %v5526_v39, 0.0  ;;  %v10191_v40 = vpop.f32.mrb[70].mxu0  ;;  %v10193_v52 = vpop.f32.mrb[76].mxu1  ;;  %v8624_v60 = vpack.c.bf16 %v6094_v12, %v6093_v48  ;;  %v8626_v23 = vpack.c.bf16 %v6112_v57, %v6111_v26  ;;  %v6145_v0 = vld [vmem:[#allocation14 + $0xbd0] sm:$0xff]  ;;  %v6146_v39 = vld [vmem:[#allocation14 + $0xbd8] sm:$0xff] }
0x1ea3   :  { %v5596_v38 = vpop.f32.mrb[71].mxu0  ;;  %v5673_v55 = vpop.f32.mrb[77].mxu1  ;;  %v8658_v4 = vpack.c.bf16 %v6144_v17, %v6143_v46  ;;  %v8628_v1 = vpack.c.bf16 %v6096_v63, %v6095_v62  ;;  %v6116_v22 = vld [vmem:[#allocation14 + $0xae8] sm:$0xff]  ;;  %v6099_v12 = vld [vmem:[#allocation14 + $0xa60] sm:$0xff]  ;;  %v6118_v46 = vld [vmem:[#allocation14 + $0xaf8] sm:$0xff]  ;;  %v5307_v63 = vrot.slane %v10173_v37, %v9830_v27 }
0x1ea4   :  { %v5597_v56 = vadd.f32 %v5596_v38, %v10185_v42  ;;  %v5674_v47 = vadd.f32 %v5673_v55, %v10189_v29  ;;  %8617 = vmatpush3.bf16.msra.mxu0 %v8616_v21  ;;  %8649 = vmatpush3.bf16.msra.mxu1 %v8648_v30  ;;  %v8656_v21 = vpack.c.bf16 %v6126_v25, %v6125_v16  ;;  %v6128_v30 = vld [vmem:[#allocation14 + $0xb48] sm:$0xff]  ;;  %v6131_v57 = vld [vmem:[#allocation14 + $0xb60] sm:$0xff]  ;;  %v6149_v17 = vld [vmem:[#allocation14 + $0xbf0] sm:$0xff] }
0x1ea5   :  { %6356 = vmatprep.mubr.f32.mxu0 %v6007_v43  ;;  %6431 = vmatprep.mubr.f32.mxu1 %v6009_v49  ;;  %v8660_v43 = vpack.c.bf16 %v6128_v30, %v6127_v18  ;;  %v6097_v49 = vld [vmem:[#allocation14 + $0xa50] sm:$0xff]  ;;  %v8630_v38 = vpack.c.bf16 %v6114_v53, %v6113_v28  ;;  %v8662_v55 = vpack.c.bf16 %v6146_v39, %v6145_v0  ;;  %v6100_v16 = vld [vmem:[#allocation14 + $0xa68] sm:$0xff]  ;;  %v6102_v30 = vld [vmem:[#allocation14 + $0xa78] sm:$0xff] }
0x1ea6   :  { %v5995_v14 = vmax.f32 %v5597_v56, 0.0  ;;  %v5997_v7 = vmax.f32 %v5674_v47, 0.0  ;;  %6357 = vmatmul.mubr.f32.gmra.mrb[84].mxu0 %v6006_v50  ;;  %6432 = vmatmul.mubr.f32.gmra.mrb[90].mxu1 %v6008_v3  ;;  %v10197_v19 = vpop.f32.mrb[72].mxu0  ;;  %v10199_v8 = vpop.f32.mrb[78].mxu1  ;;  %v6148_v50 = vld [vmem:[#allocation14 + $0xbe8] sm:$0xff]  ;;  %v8632_v47 = vpack.c.bf16 %v6098_v44, %v6097_v49  ;;  %v6101_v18 = vld [vmem:[#allocation14 + $0xa70] sm:$0xff]  ;;  %v5315_v53 = vrot.slane %v10173_v37, %v9833_v36 }
0x1ea7   :  { %8619 = vmatprep.subr.bf16.mxu0 %v8618_v15  ;;  %8651 = vmatprep.subr.bf16.mxu1 %v8650_v59  ;;  %v10201_v32 = vpop.f32.mrb[73].mxu0  ;;  %v10203_v9 = vpop.f32.mrb[79].mxu1  ;;  %v6129_v15 = vld [vmem:[#allocation14 + $0xb50] sm:$0xff]  ;;  %v6130_v59 = vld [vmem:[#allocation14 + $0xb58] sm:$0xff]  ;;  %v8666_v26 = vpack.c.bf16 %v6148_v50, %v6147_v2  ;;  %v6168_v49 = vld [vmem:[#allocation14 + $0xc88] sm:$0xff]  ;;  %v8640_v50 = vpack.c.bf16 %v6102_v30, %v6101_v18 }
0x1ea8   :  { %8621 = vmatpush3.bf16.msra.mxu0 %v8620_v20  ;;  %8653 = vmatpush3.bf16.msra.mxu1 %v8652_v51  ;;  %v6115_v20 = vld [vmem:[#allocation14 + $0xae0] sm:$0xff]  ;;  %v8664_v48 = vpack.c.bf16 %v6130_v59, %v6129_v15  ;;  %v6133_v28 = vld [vmem:[#allocation14 + $0xb70] sm:$0xff]  ;;  %v6200_v15 = vld [vmem:[#allocation14 + $0xd88] sm:$0xff] }
0x1ea9   :  { %6501 = vmatprep.mubr.f32.mxu0 %v5995_v14  ;;  %6576 = vmatprep.mubr.f32.mxu1 %v5997_v7  ;;  %v8634_v25 = vpack.c.bf16 %v6116_v22, %v6115_v20  ;;  %v6132_v14 = vld [vmem:[#allocation14 + $0xb68] sm:$0xff]  ;;  %v6117_v7 = vld [vmem:[#allocation14 + $0xaf0] sm:$0xff]  ;;  %v10237_v59 = vld [vmem:[#allocation13 + $0x18] sm:$0xff] }
0x1eaa   :  { %v10205_v45 = vpop.f32.mrb[74].mxu0  ;;  %v10207_v35 = vpop.f32.mrb[80].mxu1  ;;  %8623 = vmatprep.subr.bf16.mxu0 %v8622_v33  ;;  %8655 = vmatprep.subr.bf16.mxu1 %v8654_v41  ;;  %v8638_v0 = vpack.c.bf16 %v6118_v46, %v6117_v7  ;;  %v6151_v37 = vld [vmem:[#allocation14 + $0xc00] sm:$0xff]  ;;  %v6152_v2 = vld [vmem:[#allocation14 + $0xc08] sm:$0xff]  ;;  %v6170_v7 = vld [vmem:[#allocation14 + $0xc98] sm:$0xff] }
0x1eab   :  { %v10209_v54 = vpop.f32.mrb[75].mxu0  ;;  %v10211_v13 = vpop.f32.mrb[81].mxu1  ;;  %v6201_v46 = vld [vmem:[#allocation14 + $0xd90] sm:$0xff] }
0x1eac   :  { %8625 = vmatpush3.bf16.msra.mxu0 %v8624_v60  ;;  %8657 = vmatpush3.bf16.msra.mxu1 %v8656_v21  ;;  %v6150_v60 = vld [vmem:[#allocation14 + $0xbf8] sm:$0xff] }
0x1ead   :  { %8627 = vmatprep.subr.bf16.mxu0 %v8626_v23  ;;  %8659 = vmatprep.subr.bf16.mxu1 %v8658_v4  ;;  %v8636_v23 = vpack.c.bf16 %v6100_v16, %v6099_v12  ;;  %v8668_v4 = vpack.c.bf16 %v6132_v14, %v6131_v57  ;;  %v8670_v39 = vpack.c.bf16 %v6150_v60, %v6149_v17  ;;  %v6183_v12 = vld [vmem:[#allocation14 + $0xd00] sm:$0xff]  ;;  %v6184_v16 = vld [vmem:[#allocation14 + $0xd08] sm:$0xff]  ;;  %v6202_v17 = vld [vmem:[#allocation14 + $0xd98] sm:$0xff] }
0x1eae   :  { %v10213_v51 = vpop.f32.mrb[76].mxu0  ;;  %v10215_v58 = vpop.f32.mrb[82].mxu1  ;;  %v5672_v57 = vadd.f32 %v10193_v52, %v5315_v53  ;;  %v5603_v60 = vadd.f32 %v10201_v32, %v10185_v42  ;;  %v8676_v52 = vpack.c.bf16 %v6152_v2, %v6151_v37  ;;  %v8708_v18 = vpack.c.bf16 %v6184_v16, %v6183_v12  ;;  %v6154_v32 = vld [vmem:[#allocation14 + $0xc18] sm:$0xff] }
0x1eaf   :  { %v10217_v3 = vpop.f32.mrb[77].mxu0  ;;  %v10219_v56 = vpop.f32.mrb[83].mxu1  ;;  %v5601_v42 = vadd.f32 %v10197_v19, %v5307_v63  ;;  %v6172_v19 = vld [vmem:[#allocation14 + $0xca8] sm:$0xff] }
0x1eb0   :  { %8629 = vmatpush3.bf16.msra.mxu0 %v8628_v1  ;;  %8661 = vmatpush3.bf16.msra.mxu1 %v8660_v43  ;;  %v6134_v1 = vld [vmem:[#allocation14 + $0xb78] sm:$0xff]  ;;  %v6167_v43 = vld [vmem:[#allocation14 + $0xc80] sm:$0xff] }
0x1eb1   :  { %8631 = vmatprep.subr.bf16.mxu0 %v8630_v38  ;;  %8663 = vmatprep.subr.bf16.mxu1 %v8662_v55  ;;  %v6199_v55 = vld [vmem:[#allocation14 + $0xd80] sm:$0xff] }
0x1eb2   :  { %v10221_v33 = vpop.f32.mrb[78].mxu0  ;;  %v10223_v41 = vpop.f32.mrb[84].mxu1  ;;  %v8706_v14 = vpack.c.bf16 %v6200_v15, %v6199_v55  ;;  %v6186_v55 = vld [vmem:[#allocation14 + $0xd18] sm:$0xff]  ;;  %v6171_v15 = vld [vmem:[#allocation14 + $0xca0] sm:$0xff] }
0x1eb3   :  { %v10225_v21 = vpop.f32.mrb[79].mxu0  ;;  %v10227_v62 = vpop.f32.mrb[85].mxu1  ;;  %v8682_v12 = vpack.c.bf16 %v6172_v19, %v6171_v15  ;;  %v6192_v15 = vld [vmem:[#allocation14 + $0xd48] sm:$0xff]  ;;  %v6177_v19 = vld [vmem:[#allocation14 + $0xcd0] sm:$0xff] }
0x1eb4   :  { %8633 = vmatpush3.bf16.msra.mxu0 %v8632_v47  ;;  %8665 = vmatpush3.bf16.msra.mxu1 %v8664_v48  ;;  %v8672_v47 = vpack.c.bf16 %v6134_v1, %v6133_v28  ;;  %v8674_v48 = vpack.c.bf16 %v6168_v49, %v6167_v43  ;;  %v8710_v28 = vpack.c.bf16 %v6202_v17, %v6201_v46  ;;  %v6185_v49 = vld [vmem:[#allocation14 + $0xd10] sm:$0xff]  ;;  %v6206_v46 = vld [vmem:[#allocation14 + $0xdb8] sm:$0xff] }
0x1eb5   :  { %8635 = vmatprep.subr.bf16.mxu0 %v8634_v25  ;;  %8667 = vmatprep.subr.bf16.mxu1 %v8666_v26  ;;  %v6169_v25 = vld [vmem:[#allocation14 + $0xc90] sm:$0xff]  ;;  %v5595_v26 = vadd.f32 %v10191_v40, %v5307_v63  ;;  %v10255_v40 = vrot.slane %v10237_v59, %v9775_v11  ;;  %v6203_v63 = vld [vmem:[#allocation14 + $0xda0] sm:$0xff] }
0x1eb6   :  { %v10233_v44 = vpop.f32.mrb[80].mxu0  ;;  %v10235_v38 = vpop.f32.mrb[86].mxu1  ;;  %v8678_v30 = vpack.c.bf16 %v6170_v7, %v6169_v25  ;;  %v6187_v25 = vld [vmem:[#allocation14 + $0xd20] sm:$0xff]  ;;  %v6205_v7 = vld [vmem:[#allocation14 + $0xdb0] sm:$0xff] }
0x1eb7   :  { %v10239_v20 = vpop.f32.mrb[81].mxu0  ;;  %v10241_v22 = vpop.f32.mrb[87].mxu1  ;;  %v5828_v43 = vadd.f32 %v10211_v13, %v10255_v40 }
0x1eb8   :  { %8637 = vmatpush3.bf16.msra.mxu0 %v8636_v23  ;;  %8669 = vmatpush3.bf16.msra.mxu1 %v8668_v4  ;;  %v5680_v23 = vadd.f32 %v10203_v9, %v10189_v29  ;;  %v10251_v4 = vrot.slane %v10237_v59, %v9772_v10  ;;  %v5678_v29 = vadd.f32 %v10199_v8, %v5315_v53  ;;  %v6153_v10 = vld [vmem:[#allocation14 + $0xc10] sm:$0xff]  ;;  %v6011_v9 = vmax.f32 %v5603_v60, 0.0  ;;  %v6204_v8 = vld [vmem:[#allocation14 + $0xda8] sm:$0xff] }
0x1eb9   :  { %8639 = vmatprep.subr.bf16.mxu0 %v8638_v0  ;;  %8671 = vmatprep.subr.bf16.mxu1 %v8670_v39  ;;  %v5994_v0 = vmax.f32 %v5595_v26, 0.0  ;;  %v5996_v39 = vmax.f32 %v5672_v57, 0.0  ;;  %v6010_v53 = vmax.f32 %v5601_v42, 0.0  ;;  %v8680_v2 = vpack.c.bf16 %v6154_v32, %v6153_v10  ;;  %v6188_v26 = vld [vmem:[#allocation14 + $0xd28] sm:$0xff]  ;;  %v6173_v57 = vld [vmem:[#allocation14 + $0xcb0] sm:$0xff] }
0x1eba   :  { %v6013_v1 = vmax.f32 %v5680_v23, 0.0  ;;  %v5751_v11 = vadd.f32 %v10209_v54, %v10251_v4  ;;  %v6012_v37 = vmax.f32 %v5678_v29, 0.0  ;;  %v6155_v54 = vld [vmem:[#allocation14 + $0xc20] sm:$0xff]  ;;  %v6001_v13 = vmax.f32 %v5828_v43, 0.0  ;;  %v6157_v23 = vld [vmem:[#allocation14 + $0xc30] sm:$0xff]  ;;  %v6176_v42 = vld [vmem:[#allocation14 + $0xcc8] sm:$0xff] }
0x1ebb   :  { %v8714_v16 = vpack.c.bf16 %v6204_v8, %v6203_v63  ;;  %v8716_v60 = vpack.c.bf16 %v6188_v26, %v6187_v25  ;;  %v6207_v29 = vld [vmem:[#allocation14 + $0xdc0] sm:$0xff]  ;;  %v6208_v10 = vld [vmem:[#allocation14 + $0xdc8] sm:$0xff]  ;;  %v6178_v63 = vld [vmem:[#allocation14 + $0xcd8] sm:$0xff] }
0x1ebc   :  { %8641 = vmatpush3.bf16.msra.mxu0 %v8640_v50  ;;  %8673 = vmatpush3.bf16.msra.mxu1 %v8672_v47  ;;  %v8712_v50 = vpack.c.bf16 %v6186_v55, %v6185_v49  ;;  %v6156_v47 = vld [vmem:[#allocation14 + $0xc28] sm:$0xff]  ;;  %v8722_v49 = vpack.c.bf16 %v6208_v10, %v6207_v29  ;;  %v6191_v55 = vld [vmem:[#allocation14 + $0xd40] sm:$0xff]  ;;  %v6209_v8 = vld [vmem:[#allocation14 + $0xdd0] sm:$0xff] }
0x1ebd   :  { %8675 = vmatprep.subr.bf16.mxu0 %v8674_v48  ;;  %8707 = vmatprep.subr.bf16.mxu1 %v8706_v14  ;;  %v5999_v48 = vmax.f32 %v5751_v11, 0.0  ;;  %v6174_v14 = vld [vmem:[#allocation14 + $0xcb8] sm:$0xff]  ;;  %v8684_v17 = vpack.c.bf16 %v6156_v47, %v6155_v54  ;;  %v6160_v11 = vld [vmem:[#allocation14 + $0xc48] sm:$0xff]  ;;  %v8694_v47 = vpack.c.bf16 %v6178_v63, %v6177_v19  ;;  %v6211_v26 = vld [vmem:[#allocation14 + $0xde0] sm:$0xff] }
0x1ebe   :  { %v6162_v54 = vld [vmem:[#allocation14 + $0xc58] sm:$0xff]  ;;  %v6180_v25 = vld [vmem:[#allocation14 + $0xce8] sm:$0xff]  ;;  %v6263_v63 = vld [vmem:[#allocation14 + $0xf80] sm:$0xff] }
0x1ebf   :  { %6502 = vmatmul.mubr.f32.vlgmr.msra.gmra.mrb[86].mxu0 %v5994_v0  ;;  %6577 = vmatmul.mubr.f32.vlgmr.msra.gmra.mrb[92].mxu1 %v5996_v39  ;;  %v6190_v0 = vld [vmem:[#allocation14 + $0xd38] sm:$0xff]  ;;  %v6175_v39 = vld [vmem:[#allocation14 + $0xcc0] sm:$0xff]  ;;  %v6232_v19 = vld [vmem:[#allocation14 + $0xe88] sm:$0xff] }
0x1ec0   :  { %6506 = vmatprep.mubr.f32.mxu0 %v6011_v9  ;;  %6581 = vmatprep.mubr.f32.mxu1 %v6013_v1  ;;  %v6159_v1 = vld [vmem:[#allocation14 + $0xc40] sm:$0xff]  ;;  %v8690_v43 = vpack.c.bf16 %v6176_v42, %v6175_v39  ;;  %v6214_v39 = vld [vmem:[#allocation14 + $0xdf8] sm:$0xff]  ;;  %v5323_v42 = vrot.slane %v10237_v59, %v9764_v5 }
0x1ec1   :  { %8677 = vmatpush3.bf16.msra.mxu0 %v8676_v52  ;;  %8709 = vmatpush3.bf16.msra.mxu1 %v8708_v18  ;;  %v6158_v52 = vld [vmem:[#allocation14 + $0xc38] sm:$0xff]  ;;  %v8686_v18 = vpack.c.bf16 %v6174_v14, %v6173_v57  ;;  %v6212_v57 = vld [vmem:[#allocation14 + $0xde8] sm:$0xff]  ;;  %v6215_v5 = vld [vmem:[#allocation14 + $0xe00] sm:$0xff] }
0x1ec2   :  { %8679 = vmatprep.subr.bf16.mxu0 %v8678_v30  ;;  %8711 = vmatprep.subr.bf16.mxu1 %v8710_v28  ;;  %v8718_v30 = vpack.c.bf16 %v6206_v46, %v6205_v7  ;;  %v6189_v28 = vld [vmem:[#allocation14 + $0xd30] sm:$0xff]  ;;  %v8688_v32 = vpack.c.bf16 %v6158_v52, %v6157_v23  ;;  %v6163_v46 = vld [vmem:[#allocation14 + $0xc60] sm:$0xff]  ;;  %v8730_v23 = vpack.c.bf16 %v6212_v57, %v6211_v26  ;;  %v6266_v26 = vld [vmem:[#allocation14 + $0xf98] sm:$0xff] }
0x1ec3   :  { %6507 = vmatmul.mubr.f32.gmra.mrb[88].mxu0 %v6010_v53  ;;  %6582 = vmatmul.mubr.f32.gmra.mrb[94].mxu1 %v6012_v37  ;;  %v8720_v9 = vpack.c.bf16 %v6190_v0, %v6189_v28  ;;  %v6210_v53 = vld [vmem:[#allocation14 + $0xdd8] sm:$0xff]  ;;  %v8692_v37 = vpack.c.bf16 %v6160_v11, %v6159_v1  ;;  %v6195_v52 = vld [vmem:[#allocation14 + $0xd60] sm:$0xff]  ;;  %v6213_v0 = vld [vmem:[#allocation14 + $0xdf0] sm:$0xff]  ;;  %v5331_v11 = vrot.slane %v10237_v59, %v9767_v6 }
0x1ec4   :  { %6651 = vmatprep.mubr.f32.mxu0 %v5999_v48  ;;  %6726 = vmatprep.mubr.f32.mxu1 %v6001_v13  ;;  %v8726_v48 = vpack.c.bf16 %v6210_v53, %v6209_v8  ;;  %v6193_v13 = vld [vmem:[#allocation14 + $0xd50] sm:$0xff]  ;;  %v6182_v28 = vld [vmem:[#allocation14 + $0xcf8] sm:$0xff]  ;;  %v6264_v8 = vld [vmem:[#allocation14 + $0xf88] sm:$0xff]  ;;  %v5749_v6 = vadd.f32 %v10205_v45, %v5323_v42  ;;  %v5757_v57 = vadd.f32 %v10217_v3, %v10251_v4 }
0x1ec5   :  { %8681 = vmatpush3.bf16.msra.mxu0 %v8680_v2  ;;  %8713 = vmatpush3.bf16.msra.mxu1 %v8712_v50  ;;  %v8724_v2 = vpack.c.bf16 %v6192_v15, %v6191_v55  ;;  %v6161_v50 = vld [vmem:[#allocation14 + $0xc50] sm:$0xff]  ;;  %v6198_v55 = vld [vmem:[#allocation14 + $0xd78] sm:$0xff]  ;;  %v6231_v15 = vld [vmem:[#allocation14 + $0xe80] sm:$0xff]  ;;  %v10279_v45 = vrot.slane %v10237_v59, %v9789_v34  ;;  %v5755_v3 = vadd.f32 %v10213_v51, %v5323_v42 }
0x1ec6   :  { %8683 = vmatprep.subr.bf16.mxu0 %v8682_v12  ;;  %8715 = vmatprep.subr.bf16.mxu1 %v8714_v16  ;;  %v6194_v12 = vld [vmem:[#allocation14 + $0xd58] sm:$0xff]  ;;  %v6179_v16 = vld [vmem:[#allocation14 + $0xce0] sm:$0xff]  ;;  %v8696_v14 = vpack.c.bf16 %v6162_v54, %v6161_v50  ;;  %v6197_v1 = vld [vmem:[#allocation14 + $0xd70] sm:$0xff]  ;;  %v8738_v50 = vpack.c.bf16 %v6232_v19, %v6231_v15 }
0x1ec7   :  { %v8728_v7 = vpack.c.bf16 %v6194_v12, %v6193_v13  ;;  %v6216_v53 = vld [vmem:[#allocation14 + $0xe08] sm:$0xff]  ;;  %v6247_v54 = vld [vmem:[#allocation14 + $0xf00] sm:$0xff]  ;;  %v5826_v13 = vadd.f32 %v10207_v35, %v5331_v11  ;;  %v8770_v12 = vpack.c.bf16 %v6264_v8, %v6263_v63  ;;  %v6218_v4 = vld [vmem:[#allocation14 + $0xe18] sm:$0xff] }
0x1ec8   :  { %v8740_v35 = vpack.c.bf16 %v6216_v53, %v6215_v5  ;;  %v6236_v51 = vld [vmem:[#allocation14 + $0xea8] sm:$0xff]  ;;  %v6267_v42 = vld [vmem:[#allocation14 + $0xfa0] sm:$0xff]  ;;  %v6237_v19 = vld [vmem:[#allocation14 + $0xeb0] sm:$0xff] }
0x1ec9   :  { %8685 = vmatpush3.bf16.msra.mxu0 %v8684_v17  ;;  %8717 = vmatpush3.bf16.msra.mxu1 %v8716_v60  ;;  %v6164_v17 = vld [vmem:[#allocation14 + $0xc68] sm:$0xff]  ;;  %v8698_v60 = vpack.c.bf16 %v6180_v25, %v6179_v16  ;;  %v6234_v16 = vld [vmem:[#allocation14 + $0xe98] sm:$0xff]  ;;  %v6265_v25 = vld [vmem:[#allocation14 + $0xf90] sm:$0xff] }
0x1eca   :  { %8687 = vmatprep.subr.bf16.mxu0 %v8686_v18  ;;  %8719 = vmatprep.subr.bf16.mxu1 %v8718_v30  ;;  %v6196_v18 = vld [vmem:[#allocation14 + $0xd68] sm:$0xff]  ;;  %v6181_v30 = vld [vmem:[#allocation14 + $0xcf0] sm:$0xff]  ;;  %v8700_v29 = vpack.c.bf16 %v6164_v17, %v6163_v46  ;;  %v6238_v63 = vld [vmem:[#allocation14 + $0xeb8] sm:$0xff] }
0x1ecb   :  { %v8732_v10 = vpack.c.bf16 %v6196_v18, %v6195_v52  ;;  %v6000_v52 = vmax.f32 %v5826_v13, 0.0  ;;  %v6252_v15 = vld [vmem:[#allocation14 + $0xf28] sm:$0xff]  ;;  %v6269_v8 = vld [vmem:[#allocation14 + $0xfb0] sm:$0xff]  ;;  %v6270_v5 = vld [vmem:[#allocation14 + $0xfb8] sm:$0xff] }
0x1ecc   :  { %v6239_v13 = vld [vmem:[#allocation14 + $0xec0] sm:$0xff] }
0x1ecd   :  { %8689 = vmatpush3.bf16.msra.mxu0 %v8688_v32  ;;  %8721 = vmatpush3.bf16.msra.mxu1 %v8720_v9  ;;  %v6165_v32 = vld [vmem:[#allocation14 + $0xc70] sm:$0xff]  ;;  %v6166_v9 = vld [vmem:[#allocation14 + $0xc78] sm:$0xff] }
0x1ece   :  { %8691 = vmatprep.subr.bf16.mxu0 %v8690_v43  ;;  %8723 = vmatprep.subr.bf16.mxu1 %v8722_v49  ;;  %v8702_v43 = vpack.c.bf16 %v6182_v28, %v6181_v30  ;;  %v8734_v49 = vpack.c.bf16 %v6214_v39, %v6213_v0  ;;  %v5982_v30 = vadd.f32 %v10227_v62, %v10279_v45  ;;  %v6249_v28 = vld [vmem:[#allocation14 + $0xf10] sm:$0xff]  ;;  %v6250_v0 = vld [vmem:[#allocation14 + $0xf18] sm:$0xff]  ;;  %v6235_v39 = vld [vmem:[#allocation14 + $0xea0] sm:$0xff] }
0x1ed0   :  { %v6005_v62 = vmax.f32 %v5982_v30, 0.0 }
0x1ed1   :  { %8693 = vmatpush3.bf16.msra.mxu0 %v8692_v37  ;;  %8725 = vmatpush3.bf16.msra.mxu1 %v8724_v2  ;;  %v8704_v37 = vpack.c.bf16 %v6166_v9, %v6165_v32  ;;  %v8736_v2 = vpack.c.bf16 %v6198_v55, %v6197_v1  ;;  %v8776_v9 = vpack.c.bf16 %v6250_v0, %v6249_v28  ;;  %v6220_v1 = vld [vmem:[#allocation14 + $0xe28] sm:$0xff]  ;;  %v6251_v55 = vld [vmem:[#allocation14 + $0xf20] sm:$0xff]  ;;  %v6257_v0 = vld [vmem:[#allocation14 + $0xf50] sm:$0xff] }
0x1ed2   :  { %8695 = vmatprep.subr.bf16.mxu0 %v8694_v47  ;;  %8727 = vmatprep.subr.bf16.mxu1 %v8726_v48  ;;  %v6248_v47 = vld [vmem:[#allocation14 + $0xf08] sm:$0xff]  ;;  %v6233_v48 = vld [vmem:[#allocation14 + $0xe90] sm:$0xff] }
0x1ed3   :  { %v8772_v46 = vpack.c.bf16 %v6248_v47, %v6247_v54  ;;  %v8742_v17 = vpack.c.bf16 %v6234_v16, %v6233_v48  ;;  %v8750_v54 = vpack.c.bf16 %v6238_v63, %v6237_v19  ;;  %v8782_v47 = vpack.c.bf16 %v6270_v5, %v6269_v8  ;;  %v6253_v48 = vld [vmem:[#allocation14 + $0xf30] sm:$0xff]  ;;  %v6271_v16 = vld [vmem:[#allocation14 + $0xfc0] sm:$0xff]  ;;  %v6278_v19 = vld [vmem:[#allocation14 + $0xff8] sm:$0xff] }
0x1ed4   :  { %v5339_v63 = vrot.slane %v10237_v59, %v9830_v27 }
0x1ed5   :  { %8697 = vmatpush3.bf16.msra.mxu0 %v8696_v14  ;;  %8729 = vmatpush3.bf16.msra.mxu1 %v8728_v7  ;;  %v5834_v14 = vadd.f32 %v10219_v56, %v10255_v40  ;;  %v10275_v7 = vrot.slane %v10237_v59, %v9786_v31  ;;  %v5832_v56 = vadd.f32 %v10215_v58, %v5331_v11  ;;  %v6217_v31 = vld [vmem:[#allocation14 + $0xe10] sm:$0xff]  ;;  %v6015_v40 = vmax.f32 %v5757_v57, 0.0  ;;  %v6268_v58 = vld [vmem:[#allocation14 + $0xfa8] sm:$0xff] }
0x1ed6   :  { %8699 = vmatprep.subr.bf16.mxu0 %v8698_v60  ;;  %8731 = vmatprep.subr.bf16.mxu1 %v8730_v23  ;;  %v8774_v60 = vpack.c.bf16 %v6266_v26, %v6265_v25  ;;  %v5998_v23 = vmax.f32 %v5749_v6, 0.0  ;;  %v8744_v32 = vpack.c.bf16 %v6218_v4, %v6217_v31  ;;  %v6254_v6 = vld [vmem:[#allocation14 + $0xf38] sm:$0xff]  ;;  %v6272_v25 = vld [vmem:[#allocation14 + $0xfc8] sm:$0xff]  ;;  %v5903_v27 = vadd.f32 %v10221_v33, %v5339_v63 }
0x1ed7   :  { %v6017_v18 = vmax.f32 %v5834_v14, 0.0  ;;  %v5905_v34 = vadd.f32 %v10225_v21, %v10275_v7  ;;  %v6219_v21 = vld [vmem:[#allocation14 + $0xe20] sm:$0xff]  ;;  %v8784_v57 = vpack.c.bf16 %v6254_v6, %v6253_v48  ;;  %v6274_v31 = vld [vmem:[#allocation14 + $0xfd8] sm:$0xff] }
0x1ed8   :  { %v8748_v53 = vpack.c.bf16 %v6220_v1, %v6219_v21  ;;  %v6223_v14 = vld [vmem:[#allocation14 + $0xe40] sm:$0xff]  ;;  %v6228_v21 = vld [vmem:[#allocation14 + $0xe68] sm:$0xff]  ;;  %v6262_v48 = vld [vmem:[#allocation14 + $0xf78] sm:$0xff] }
0x1ed9   :  { %8701 = vmatpush3.bf16.msra.mxu0 %v8700_v29  ;;  %8733 = vmatpush3.bf16.msra.mxu1 %v8732_v10  ;;  %v6014_v29 = vmax.f32 %v5755_v3, 0.0  ;;  %v6016_v10 = vmax.f32 %v5832_v56, 0.0  ;;  %v6003_v11 = vmax.f32 %v5905_v34, 0.0  ;;  %v6242_v3 = vld [vmem:[#allocation14 + $0xed8] sm:$0xff]  ;;  %v6273_v56 = vld [vmem:[#allocation14 + $0xfd0] sm:$0xff] }
0x1eda   :  { %8703 = vmatprep.subr.bf16.mxu0 %v8702_v43  ;;  %8735 = vmatprep.subr.bf16.mxu1 %v8734_v49  ;;  %v8746_v43 = vpack.c.bf16 %v6236_v51, %v6235_v39  ;;  %v8778_v49 = vpack.c.bf16 %v6268_v58, %v6267_v42  ;;  %v6226_v34 = vld [vmem:[#allocation14 + $0xe58] sm:$0xff]  ;;  %v8790_v28 = vpack.c.bf16 %v6274_v31, %v6273_v56  ;;  %v6243_v51 = vld [vmem:[#allocation14 + $0xee0] sm:$0xff]  ;;  %v6244_v42 = vld [vmem:[#allocation14 + $0xee8] sm:$0xff] }
0x1edb   :  { %v6258_v39 = vld [vmem:[#allocation14 + $0xf58] sm:$0xff]  ;;  %v6275_v58 = vld [vmem:[#allocation14 + $0xfe0] sm:$0xff]  ;;  %v8762_v1 = vpack.c.bf16 %v6244_v42, %v6243_v51 }
0x1edd   :  { %8705 = vmatpush3.bf16.msra.mxu0 %v8704_v37  ;;  %8737 = vmatpush3.bf16.msra.mxu1 %v8736_v2  ;;  %v8780_v37 = vpack.c.bf16 %v6252_v15, %v6251_v55  ;;  %v6221_v2 = vld [vmem:[#allocation14 + $0xe30] sm:$0xff]  ;;  %v6246_v55 = vld [vmem:[#allocation14 + $0xef8] sm:$0xff] }
0x1ede   :  { %8739 = vmatprep.subr.bf16.mxu0 %v8738_v50  ;;  %8771 = vmatprep.subr.bf16.mxu1 %v8770_v12  ;;  %v6222_v50 = vld [vmem:[#allocation14 + $0xe38] sm:$0xff]  ;;  %v6240_v12 = vld [vmem:[#allocation14 + $0xec8] sm:$0xff]  ;;  %v6277_v15 = vld [vmem:[#allocation14 + $0xff0] sm:$0xff] }
0x1edf   :  { %v8752_v26 = vpack.c.bf16 %v6222_v50, %v6221_v2  ;;  %v8798_v50 = vpack.c.bf16 %v6278_v19, %v6277_v15 }
0x1ee0   :  { %6652 = vmatmul.mubr.f32.vlgmr.msra.gmra.mrb[90].mxu0 %v5998_v23  ;;  %6727 = vmatmul.mubr.f32.vlgmr.msra.gmra.mrb[96].mxu1 %v6000_v52  ;;  %v6256_v23 = vld [vmem:[#allocation14 + $0xf48] sm:$0xff]  ;;  %v6241_v52 = vld [vmem:[#allocation14 + $0xed0] sm:$0xff] }
0x1ee1   :  { %6656 = vmatprep.mubr.f32.mxu0 %v6015_v40  ;;  %6731 = vmatprep.mubr.f32.mxu1 %v6017_v18  ;;  %v6225_v18 = vld [vmem:[#allocation14 + $0xe50] sm:$0xff]  ;;  %v8758_v30 = vpack.c.bf16 %v6242_v3, %v6241_v52 }
0x1ee2   :  { %8741 = vmatpush3.bf16.msra.mxu0 %v8740_v35  ;;  %8773 = vmatpush3.bf16.msra.mxu1 %v8772_v46  ;;  %v6224_v35 = vld [vmem:[#allocation14 + $0xe48] sm:$0xff]  ;;  %v8754_v46 = vpack.c.bf16 %v6240_v12, %v6239_v13 }
0x1ee3   :  { %8743 = vmatprep.subr.bf16.mxu0 %v8742_v17  ;;  %8775 = vmatprep.subr.bf16.mxu1 %v8774_v60  ;;  %v8786_v17 = vpack.c.bf16 %v6272_v25, %v6271_v16  ;;  %v6255_v60 = vld [vmem:[#allocation14 + $0xf40] sm:$0xff]  ;;  %v8756_v4 = vpack.c.bf16 %v6224_v35, %v6223_v14  ;;  %v6002_v16 = vmax.f32 %v5903_v27, 0.0 }
0x1ee4   :  { %6657 = vmatmul.mubr.f32.gmra.mrb[92].mxu0 %v6014_v29  ;;  %6732 = vmatmul.mubr.f32.gmra.mrb[98].mxu1 %v6016_v10  ;;  %v8788_v40 = vpack.c.bf16 %v6256_v23, %v6255_v60  ;;  %v6276_v29 = vld [vmem:[#allocation14 + $0xfe8] sm:$0xff]  ;;  %v8760_v10 = vpack.c.bf16 %v6226_v34, %v6225_v18 }
0x1ee5   :  { %6801 = vmatprep.mubr.f32.mxu0 %v6003_v11  ;;  %6876 = vmatprep.mubr.f32.mxu1 %v6005_v62  ;;  %v8794_v11 = vpack.c.bf16 %v6276_v29, %v6275_v58  ;;  %v6259_v62 = vld [vmem:[#allocation14 + $0xf60] sm:$0xff] }
0x1ee6   :  { %8745 = vmatpush3.bf16.msra.mxu0 %v8744_v32  ;;  %8777 = vmatpush3.bf16.msra.mxu1 %v8776_v9  ;;  %v8792_v32 = vpack.c.bf16 %v6258_v39, %v6257_v0  ;;  %v6227_v9 = vld [vmem:[#allocation14 + $0xe60] sm:$0xff] }
0x1ee7   :  { %8747 = vmatprep.subr.bf16.mxu0 %v8746_v43  ;;  %8779 = vmatprep.subr.bf16.mxu1 %v8778_v49  ;;  %v6260_v43 = vld [vmem:[#allocation14 + $0xf68] sm:$0xff]  ;;  %v6245_v49 = vld [vmem:[#allocation14 + $0xef0] sm:$0xff]  ;;  %v8764_v8 = vpack.c.bf16 %v6228_v21, %v6227_v9 }
0x1ee8   :  { %v8796_v5 = vpack.c.bf16 %v6260_v43, %v6259_v62  ;;  %v8766_v2 = vpack.c.bf16 %v6246_v55, %v6245_v49 }
0x1eea   :  { %8749 = vmatpush3.bf16.msra.mxu0 %v8748_v53  ;;  %8781 = vmatpush3.bf16.msra.mxu1 %v8780_v37  ;;  %v6229_v53 = vld [vmem:[#allocation14 + $0xe70] sm:$0xff]  ;;  %v5347_v37 = vrot.slane %v10237_v59, %v9833_v36  ;;  %v5911_v36 = vadd.f32 %v10239_v20, %v10275_v7  ;;  %v5988_v59 = vadd.f32 %v10241_v22, %v10279_v45  ;;  %v7160_v7 = vld [vmem:[#allocation16 + $0x1] ss:$0 sm:$0xff] }
0x1eeb   :  { %8751 = vmatprep.subr.bf16.mxu0 %v8750_v54  ;;  %8783 = vmatprep.subr.bf16.mxu1 %v8782_v47  ;;  %v6230_v54 = vld [vmem:[#allocation14 + $0xe78] sm:$0xff]  ;;  %v6261_v47 = vld [vmem:[#allocation14 + $0xf70] sm:$0xff] }
0x1eec   :  { %v8768_v6 = vpack.c.bf16 %v6230_v54, %v6229_v53  ;;  %v8800_v13 = vpack.c.bf16 %v6262_v48, %v6261_v47  ;;  %v5980_v12 = vadd.f32 %v10223_v41, %v5347_v37  ;;  %v6019_v14 = vmax.f32 %v5911_v36, 0.0 }
0x1eed   :  { %v6021_v33 = vmax.f32 %v5988_v59, 0.0 }
0x1eee   :  { %8753 = vmatpush3.bf16.msra.mxu0 %v8752_v26  ;;  %8785 = vmatpush3.bf16.msra.mxu1 %v8784_v57  ;;  %v6004_v25 = vmax.f32 %v5980_v12, 0.0  ;;  %v5909_v26 = vadd.f32 %v10233_v44, %v5339_v63  ;;  %v5986_v57 = vadd.f32 %v10235_v38, %v5347_v37 }
0x1eef   :  { %8755 = vmatprep.subr.bf16.mxu0 %v8754_v46  ;;  %8787 = vmatprep.subr.bf16.mxu1 %v8786_v17 }
0x1ef0   :  { %v6018_v41 = vmax.f32 %v5909_v26, 0.0  ;;  %v6020_v35 = vmax.f32 %v5986_v57, 0.0 }
0x1ef2   :  { %8757 = vmatpush3.bf16.msra.mxu0 %v8756_v4  ;;  %8789 = vmatpush3.bf16.msra.mxu1 %v8788_v40 }
0x1ef3   :  { %8759 = vmatprep.subr.bf16.mxu0 %v8758_v30  ;;  %8791 = vmatprep.subr.bf16.mxu1 %v8790_v28 }
0x1ef6   :  { %8761 = vmatpush3.bf16.msra.mxu0 %v8760_v10  ;;  %8793 = vmatpush3.bf16.msra.mxu1 %v8792_v32 }
0x1ef7   :  { %8763 = vmatprep.subr.bf16.mxu0 %v8762_v1  ;;  %8795 = vmatprep.subr.bf16.mxu1 %v8794_v11 }
0x1efa   :  { %8765 = vmatpush3.bf16.msra.mxu0 %v8764_v8  ;;  %8797 = vmatpush3.bf16.msra.mxu1 %v8796_v5 }
0x1efb   :  { %8767 = vmatprep.subr.bf16.mxu0 %v8766_v2  ;;  %8799 = vmatprep.subr.bf16.mxu1 %v8798_v50 }
0x1efe   :  { %8769 = vmatpush3.bf16.msra.mxu0 %v8768_v6  ;;  %8801 = vmatpush3.bf16.msra.mxu1 %v8800_v13 }
0x1f01   :  { %6802 = vmatmul.mubr.f32.vlgmr.msra.gmra.mrb[94].mxu0 %v6002_v16  ;;  %6877 = vmatmul.mubr.f32.vlgmr.msra.gmra.mrb[100].mxu1 %v6004_v25 }
0x1f02   :  { %6806 = vmatprep.mubr.f32.mxu0 %v6019_v14  ;;  %6881 = vmatprep.mubr.f32.mxu1 %v6021_v33 }
0x1f05   :  { %6807 = vmatmul.mubr.f32.gmra.mrb[96].mxu0 %v6018_v41  ;;  %6882 = vmatmul.mubr.f32.gmra.mrb[102].mxu1 %v6020_v35 }
0x1f72   :  { %v7602_v20 = vpop.f32.mrb[82].mxu0  ;;  %v7640_v22 = vpop.f32.mrb[88].mxu1 }
0x1f73   :  { %v7603_v45 = vpop.f32.mrb[83].mxu0  ;;  %v7641_v46 = vpop.f32.mrb[89].mxu1 }
0x1f74   :  { %v7604_v17 = vadd.f32 %v7603_v45, %v7602_v20  ;;  %v7642_v60 = vadd.f32 %v7641_v46, %v7640_v22 }
0x1f76   :  { %v6354_v44 = vadd.f32 %v7604_v17, %v7160_v7 }
0x1f78   :  { %v6429_v23 = vadd.f32 %v7642_v60, %v6354_v44 }
0x1f79   :  { %v7605_v38 = vpop.f32.mrb[84].mxu0  ;;  %v7643_v52 = vpop.f32.mrb[90].mxu1 }
0x1f7a   :  { %v7606_v3 = vpop.f32.mrb[85].mxu0  ;;  %v7644_v56 = vpop.f32.mrb[91].mxu1 }
0x1f7b   :  { %v7607_v31 = vadd.f32 %v7606_v3, %v7605_v38  ;;  %v7645_v4 = vadd.f32 %v7644_v56, %v7643_v52  ;;  %v6939_v3 = vld [vmem:[#allocation17] sm:$0xff]  ;;  %v6941_v56 = vld [vmem:[#allocation17 + $0x10] sm:$0xff] }
0x1f7d   :  { %v6359_v40 = vadd.f32 %v7607_v31, %v7160_v7 }
0x1f7f   :  { %v6434_v18 = vadd.f32 %v7645_v4, %v6359_v40  ;;  %v6942_v4 = vld [vmem:[#allocation17 + $0x18] sm:$0xff] }
0x1f80   :  { %v8806_v40 = vpack.c.bf16 %v6942_v4, %v6941_v56 }
0x1f92   :  { %v7678_v34 = vpop.f32.mrb[86].mxu0  ;;  %v7716_v30 = vpop.f32.mrb[92].mxu1 }
0x1f93   :  { %v7679_v28 = vpop.f32.mrb[87].mxu0  ;;  %v7717_v0 = vpop.f32.mrb[93].mxu1 }
0x1f94   :  { %v7680_v39 = vadd.f32 %v7679_v28, %v7678_v34  ;;  %v7718_v51 = vadd.f32 %v7717_v0, %v7716_v30 }
0x1f96   :  { %v6504_v42 = vadd.f32 %v7680_v39, %v6429_v23  ;;  %v7681_v58 = vpop.f32.mrb[88].mxu0  ;;  %v7719_v29 = vpop.f32.mrb[94].mxu1 }
0x1f97   :  { %v7682_v10 = vpop.f32.mrb[89].mxu0  ;;  %v7720_v32 = vpop.f32.mrb[95].mxu1 }
0x1f98   :  { %v6579_v9 = vadd.f32 %v7718_v51, %v6504_v42  ;;  %v7683_v21 = vadd.f32 %v7682_v10, %v7681_v58  ;;  %v7721_v1 = vadd.f32 %v7720_v32, %v7719_v29 }
0x1f9a   :  { %v6509_v11 = vadd.f32 %v7683_v21, %v6434_v18 }
0x1f9c   :  { %v6584_v62 = vadd.f32 %v7721_v1, %v6509_v11  ;;  %v7163_v11 = vld [vmem:[%s10341_s13 + $0x1] ss:$0 sm:$0xff]  ;;  %s9166_s13 = scalar_lea.vmem %s7039_s30, 256 }
0x1f9d   :  { %p9167_p4 = scmp.ne.s32.totalorder %s7039_s30, %s9166_s13  ;;  %p9172_p6 = scmp.lt.s32.totalorder %s9166_s13, %s9166_s13 }
0x1f9f   :  { %p9173_p7 = por %p9172_p6, %p9171_p5 }
0x1fa1   :  { %p9174_p8 = pnand %p9173_p7, %p9167_p4 }
0x1fb3   :  { %v7754_v43 = vpop.f32.mrb[90].mxu0  ;;  %v7792_v49 = vpop.f32.mrb[96].mxu1 }
0x1fb4   :  { %v7755_v55 = vpop.f32.mrb[91].mxu0  ;;  %v7793_v15 = vpop.f32.mrb[97].mxu1 }
0x1fb5   :  { %v7756_v19 = vadd.f32 %v7755_v55, %v7754_v43  ;;  %v7794_v63 = vadd.f32 %v7793_v15, %v7792_v49  ;;  %v7164_v43 = vld [vmem:[%s10342_s14 + $0x1] ss:$0 sm:$0xff] }
0x1fb7   :  { %v6654_v8 = vadd.f32 %v7756_v19, %v6579_v9  ;;  %v7757_v5 = vpop.f32.mrb[92].mxu0  ;;  %v7795_v53 = vpop.f32.mrb[98].mxu1 }
0x1fb8   :  { %v7758_v37 = vpop.f32.mrb[93].mxu0  ;;  %v7796_v2 = vpop.f32.mrb[99].mxu1 }
0x1fb9   :  { %v6729_v50 = vadd.f32 %v7794_v63, %v6654_v8  ;;  %v7759_v54 = vadd.f32 %v7758_v37, %v7757_v5  ;;  %v7797_v47 = vadd.f32 %v7796_v2, %v7795_v53  ;;  %v7165_v53 = vld [vmem:[#allocation19] ss:$0 sm:$0xff] }
0x1fbb   :  { %v6659_v48 = vadd.f32 %v7759_v54, %v6584_v62 }
0x1fbd   :  { %v6734_v6 = vadd.f32 %v7797_v47, %v6659_v48 }
0x1fd4   :  { %v7830_v13 = vpop.f32.mrb[94].mxu0  ;;  %v7868_v27 = vpop.f32.mrb[100].mxu1 }
0x1fd5   :  { %v7831_v12 = vpop.f32.mrb[95].mxu0  ;;  %v7869_v36 = vpop.f32.mrb[101].mxu1 }
0x1fd6   :  { %v7832_v59 = vadd.f32 %v7831_v12, %v7830_v13  ;;  %v7870_v16 = vadd.f32 %v7869_v36, %v7868_v27 }
0x1fd8   :  { %v6804_v25 = vadd.f32 %v7832_v59, %v6729_v50  ;;  %v7833_v26 = vpop.f32.mrb[96].mxu0  ;;  %v7871_v57 = vpop.f32.mrb[102].mxu1 }
0x1fd9   :  { %v7834_v14 = vpop.f32.mrb[97].mxu0  ;;  %v7872_v33 = vpop.f32.mrb[103].mxu1 }
0x1fda   :  { %v6879_v41 = vadd.f32 %v7870_v16, %v6804_v25  ;;  %v7835_v35 = vadd.f32 %v7834_v14, %v7833_v26  ;;  %v7873_v20 = vadd.f32 %v7872_v33, %v7871_v57 }
0x1fdc   :  { %v6887_v22 = vadd.f32 %v6879_v41, %v10122_v24  ;;  %v6809_v7 = vadd.f32 %v7835_v35, %v6734_v6  ;;  %v6940_v24 = vld [vmem:[#allocation17 + $0x8] sm:$0xff] }
0x1fdd   :  { %v8802_v31 = vpack.c.bf16 %v6940_v24, %v6939_v3 }
0x1fde   :  { %v6884_v45 = vadd.f32 %v7873_v20, %v6809_v7  ;;  %v6895_v46 = vsel %vm323_vm3, %v6887_v22, 0.0  ;;  %v6893_v17 = vmul.f32 %v6887_v22, %v6887_v22 }
0x1fdf   :  { %6896 = vadd.xlane.f32.xlu1 %v6895_v46  ;;  %8803 = vmatprep.subr.bf16.mxu0 %v8802_v31 }
0x1fe0   :  { %v6888_v60 = vadd.f32 %v6884_v45, %v10131_v61  ;;  %v6901_v23 = vsel %vm323_vm3, %v6893_v17, 0.0  ;;  %8805 = vmatpush3.bf16.msra.mxu0 %v8802_v31 }
0x1fe1   :  { %8807 = vmatprep.subr.bf16.mxu0 %v8806_v40 }
0x1fe2   :  { %v6898_v44 = vsel %vm323_vm3, %v6888_v60, 0.0  ;;  %v6894_v38 = vmul.f32 %v6888_v60, %v6888_v60 }
0x1fe3   :  { %6899 = vadd.xlane.f32.xlu0 %v6898_v44  ;;  %6902 = vadd.xlane.f32.xlu1 %v6901_v23 }
0x1fe4   :  { %v6904_v52 = vsel %vm323_vm3, %v6894_v38, 0.0  ;;  %8809 = vmatpush3.bf16.msra.mxu0 %v8806_v40 }
0x1fe7   :  { %6905 = vadd.xlane.f32.xlu0 %v6904_v52 }
0x206c   :  { %v6897_v61 = vpop.xlane.xlu1 %6896 }
0x206d   :  { %v6907_v18 = vmul.f32 0.03125, %v6897_v61 }
0x206f   :  { %v6911_v28 = vmul.f32 %v6907_v18, %v6907_v18  ;;  %v6915_v21 = vsub.f32 %v6887_v22, %v6907_v18 }
0x2070   :  { %v6900_v34 = vpop.xlane.xlu0 %6899  ;;  %v6903_v30 = vpop.xlane.xlu1 %6902 }
0x2071   :  { %v6908_v0 = vmul.f32 0.03125, %v6900_v34  ;;  %v6909_v39 = vmul.f32 0.03125, %v6903_v30 }
0x2073   :  { %v6913_v51 = vsub.f32 %v6909_v39, %v6911_v28  ;;  %v6912_v58 = vmul.f32 %v6908_v0, %v6908_v0  ;;  %v6916_v49 = vsub.f32 %v6888_v60, %v6908_v0 }
0x2074   :  { %v6906_v42 = vpop.xlane.xlu0 %6905 }
0x2075   :  { %v6917_v29 = vadd.f32 1e-05, %v6913_v51  ;;  %v6910_v10 = vmul.f32 0.03125, %v6906_v42 }
0x2077   :  { %8920 = vrsqrt.f32 %v6917_v29  ;;  %v6914_v32 = vsub.f32 %v6910_v10, %v6912_v58 }
0x2079   :  { %v6918_v9 = vadd.f32 1e-05, %v6914_v32 }
0x207b   :  { %8922 = vrsqrt.f32 %v6918_v9 }
0x2081   :  { %v8921_v1 = vpop.eup %8920 }
0x2082   :  { %v6921_v62 = vmul.f32 %v8921_v1, %v6915_v21 }
0x2084   :  { %v6929_v55 = vmul.f32 %v7163_v11, %v6921_v62 }
0x2085   :  { %v8923_v15 = vpop.eup %8922 }
0x2086   :  { %v6922_v19 = vmul.f32 %v8923_v15, %v6916_v49  ;;  %v6937_v63 = vadd.f32 %v7164_v43, %v6929_v55 }
0x2088   :  { %v6930_v8 = vmul.f32 %v7163_v11, %v6922_v19  ;;  %8111 = vmatprep.mubr.msk.f32.mxu0 %vm323_vm3, %v6937_v63 }
0x208a   :  { %v6938_v5 = vadd.f32 %v7164_v43, %v6930_v8 }
0x208c   :  { %8112 = vmatmul.mubr.msk.f32.vlgmr.msra.gmra.mrb[98].mxu0 %vm323_vm3, %v6938_v5 }
0x215f   :  { %v8113_v37 = vpop.f32.mrb[98].mxu0 }
0x2160   :  { %v7028_v2 = vadd.f32 %v8113_v37, %v7165_v53  ;;  %v7022_v50 = vpop.f32.mrb[99].mxu0 }
0x2161   :  { %v7023_v54 = vadd.f32 %v7165_v53, %v7022_v50 }
0x2162   :  { %7032 = vst [vmem:[#allocation20 + $0x8] sm:$0xff] %v7028_v2 }
0x2163   :  { %7031 = vst [vmem:[#allocation20] sm:$0xff] %v7023_v54 }
0x2164   :  { %9177 = shalt.err (!%p9174_p8)
}
0x2165   :  { %s9178_s6 = scalar_lea.hbm %s10345_s17, 256 }
0x2166   :  { %p9179_p9 = scmp.ne.s32.totalorder %s10345_s17, %s9178_s6  ;;  %p9182_p10 = scmp.lt.u32.totalorder %s9178_s6, %s10345_s17 }
0x2168   :  { %p9184_p11 = pnand %p9182_p10, %p9179_p9 }
0x216a   :  { %9187 = shalt.err (!%p9184_p11)
}
0x216b   :  { %7044 = dma.vmem_to_hbm [thread:$0]  %s7039_s30, 256, %s10345_s17, [#allocation4], %s9204_s21, %s9204_s21, %s9205_s22  }
0x216c   :  { %9200 = dma.done.wait [#allocation4], 256  }
0x216d   :  { %9201 = vsyncadd [#allocation4], 4294967040 }
0x216e   :  { %7048 = vsyncpa [#allocation3], 1 }
0x216f   :  { %7049 = vsyncpa [#allocation6], 1 }
0x2170   :  { %7050 = vsyncpa [#allocation9], 1 }
0x2171   :  { %7051 = vsyncpa [#allocation12], 1 }
0x2172   :  { %7052 = vsyncpa [#allocation15], 1 }
0x2173   :  { %7053 = vsyncpa [#allocation18], 1 }
0x2174   :  { %7054 = vsyncpa [#allocation4], 1 }

</bundles_post_ra>
